<compile_context>
chip_gen: v6e
topology: v6e:2x2x1
jax: 0.10.0
libtpu: 0.0.40
codegen_flags: <defaults>
</compile_context>

<pallas_src>
import functools
import math

import jax
import jax.numpy as jnp
from jax.experimental import pallas as pl
from jax.experimental.pallas import tpu as pltpu

# ---------------------------------------------------------------------------
# model hyperparameters (small, consistent with the module's forward)
# ---------------------------------------------------------------------------
LATENT_DIM = 32
CHANNELS = 1
IMG_SIZE = 16
IMG_FLAT = CHANNELS * IMG_SIZE * IMG_SIZE      # 256
HIDDEN = (128, 256, 512, 1024)
BN_EPS = 0.8                                   # BatchNorm1d(out_feat, 0.8) -> eps
LEAKY_SLOPE = 0.2
BATCH = 4
SUBLANE = 8                                    # f32 sublane multiple

# Packed-vector layout: all (1, N) parameters concatenated along lanes.
# Every segment size / offset is a multiple of 128 lanes -> vreg-aligned slices.
SEGMENTS = (
    ("b1", HIDDEN[0]),
    ("b2", HIDDEN[1]), ("g2", HIDDEN[1]), ("be2", HIDDEN[1]),
    ("b3", HIDDEN[2]), ("g3", HIDDEN[2]), ("be3", HIDDEN[2]),
    ("b4", HIDDEN[3]), ("g4", HIDDEN[3]), ("be4", HIDDEN[3]),
    ("b5", IMG_FLAT),
)
OFFSETS = {}
_off = 0
for _name, _sz in SEGMENTS:
    OFFSETS[_name] = (_off, _sz)
    _off += _sz
PACKED_LEN = _off                              # 5760 = 45 * 128

DIMS = (LATENT_DIM,) + HIDDEN + (IMG_FLAT,)


def generator_kernel(z_ref, w1_ref, w2_ref, w3_ref, w4_ref, w5_ref, vec_ref,
                     out_ref, *, total_rows, tile_rows):
    """Fused MLP forward for one batch tile of `tile_rows` rows.

    `total_rows` is the real (unpadded) batch size; padding rows are excluded
    from BatchNorm statistics via masking.
    """

    def seg(name):
        off, size = OFFSETS[name]
        return vec_ref[:, off:off + size]          # (1, size) f32, static slice

    def dot_bf16(h, w_ref):
        # bf16 weights streamed once from HBM; accumulate in f32 on the MXU.
        return jnp.dot(h.astype(jnp.bfloat16), w_ref[...],
                       preferred_element_type=jnp.float32)

    def leaky(x):
        # max(x, a*x) == LeakyReLU(a) for a in (0,1); 1 VALU op/elem.
        return jnp.maximum(x, LEAKY_SLOPE * x)

    # ----- per-tile valid-row bookkeeping (padding excluded from BN stats) ---
    if total_rows % tile_rows == 0:
        mask = None                                # all rows are real
        inv_n = 1.0 / float(tile_rows)
    else:
        b = pl.program_id(0)
        valid = jnp.maximum(
            jnp.minimum(total_rows - b * tile_rows, tile_rows), 1)
        row_ids = jax.lax.broadcasted_iota(jnp.int32, (tile_rows, 1), 0)
        mask = (row_ids < valid).astype(jnp.float32)      # (tile_rows, 1)
        inv_n = 1.0 / valid.astype(jnp.float32)

    def bn_leaky(h, gname, bname):
        # Training-mode BatchNorm1d: batch mean / biased batch variance.
        # One-pass E[x^2]-E[x]^2 (eps=0.8 => cancellation is a non-issue).
        if mask is None:
            mean = jnp.mean(h, axis=0, keepdims=True)
            ex2 = jnp.mean(h * h, axis=0, keepdims=True)
        else:
            hm = h * mask
            mean = jnp.sum(hm, axis=0, keepdims=True) * inv_n
            ex2 = jnp.sum(hm * h, axis=0, keepdims=True) * inv_n
        var = ex2 - mean * mean
        inv = jax.lax.rsqrt(var + BN_EPS)          # EUP slot (free vs VALU)
        # Fold affine: scale = gamma*inv, shift = beta - mean*scale.
        scale = inv * seg(gname)
        shift = seg(bname) - mean * scale
        return leaky(h * scale + shift)

    z = z_ref[...]                                  # (tile_rows, latent) f32

    # block(latent, 128, normalize=False) -- full f32 first layer (w1 is tiny).
    h = leaky(jnp.dot(z, w1_ref[...], preferred_element_type=jnp.float32)
              + seg("b1"))
    # block(128, 256)
    h = bn_leaky(dot_bf16(h, w2_ref) + seg("b2"), "g2", "be2")
    # block(256, 512)
    h = bn_leaky(dot_bf16(h, w3_ref) + seg("b3"), "g3", "be3")
    # block(512, 1024)
    h = bn_leaky(dot_bf16(h, w4_ref) + seg("b4"), "g4", "be4")
    # Linear(1024, C*H*W) -> Tanh
    out_ref[...] = jnp.tanh(dot_bf16(h, w5_ref) + seg("b5"))


def init_params(key):
    """Deterministic PyTorch-style init: U(-1/sqrt(fan_in), 1/sqrt(fan_in)).

    Returns (weights_tuple, packed_vectors_f32).  w1 stays f32 (tiny, keeps
    latent precision); w2..w5 are bf16 to halve the dominant HBM traffic.
    """
    weights = []
    parts = {}
    for i in range(len(DIMS) - 1):
        fan_in, fan_out = DIMS[i], DIMS[i + 1]
        key, kw, kb = jax.random.split(key, 3)
        bound = 1.0 / math.sqrt(fan_in)
        w = jax.random.uniform(kw, (fan_in, fan_out), jnp.float32, -bound, bound)
        b = jax.random.uniform(kb, (1, fan_out), jnp.float32, -bound, bound)
        weights.append(w if i == 0 else w.astype(jnp.bfloat16))
        parts[f"b{i + 1}"] = b
    # BatchNorm affine params for layers 2..4 (PyTorch default: gamma=1, beta=0)
    for idx, n in zip((2, 3, 4), HIDDEN[1:]):
        parts[f"g{idx}"] = jnp.ones((1, n), jnp.float32)
        parts[f"be{idx}"] = jnp.zeros((1, n), jnp.float32)
    packed = jnp.concatenate([parts[name] for name, _ in SEGMENTS], axis=1)
    assert packed.shape == (1, PACKED_LEN)
    return tuple(weights), packed


def generator_forward(z, weights, packed_vec, rows_per_tile=None):
    """z: (B, latent_dim) f32 -> img: (B, C, H, W) f32.

    Default (rows_per_tile=None): one batch tile = the whole padded batch,
    exact full-batch training-mode BatchNorm (matches the PyTorch module).
    For very large batches pass rows_per_tile (e.g. 256 on v6e/v7x, 128 on
    v5e) to stream batch tiles over a grid while weights stay VMEM resident.
    # TODO(synk): with >1 tile, BN statistics become per-tile ("ghost" BN);
    # exact full-batch BN across tiles would need a cross-tile reduction pass.
    """
    B = z.shape[0]
    if rows_per_tile is None:
        tile_b = max(SUBLANE, pl.cdiv(B, SUBLANE) * SUBLANE)
    else:
        tile_b = max(SUBLANE, pl.cdiv(rows_per_tile, SUBLANE) * SUBLANE)
    pb = pl.cdiv(B, tile_b) * tile_b
    pad = pb - B
    zp = jnp.pad(z, ((0, pad), (0, 0))) if pad else z
    n_tiles = pb // tile_b

    kernel = functools.partial(generator_kernel,
                               total_rows=B, tile_rows=tile_b)

    # Weights: constant block index across the batch grid -> DMA'd once,
    # VMEM-resident for every tile.
    w_specs = [pl.BlockSpec((DIMS[i], DIMS[i + 1]), lambda b: (0, 0))
               for i in range(5)]

    weight_bytes = sum(int(w.size) * w.dtype.itemsize for w in weights)
    flops = 2 * pb * sum(DIMS[i] * DIMS[i + 1] for i in range(5))
    cost = pl.CostEstimate(
        flops=int(flops),
        transcendentals=int(pb * IMG_FLAT + sum(HIDDEN[1:])),
        bytes_accessed=int(weight_bytes + 4 * PACKED_LEN
                           + 4 * pb * (LATENT_DIM + IMG_FLAT)),
    )

    flat = pl.pallas_call(
        kernel,
        out_shape=jax.ShapeDtypeStruct((pb, IMG_FLAT), jnp.float32),
        grid=(n_tiles,),
        in_specs=[pl.BlockSpec((tile_b, LATENT_DIM), lambda b: (b, 0))]
                 + w_specs
                 + [pl.BlockSpec((1, PACKED_LEN), lambda b: (0, 0))],
        out_specs=pl.BlockSpec((tile_b, IMG_FLAT), lambda b: (b, 0)),
        compiler_params=pltpu.CompilerParams(
            dimension_semantics=("parallel",)),   # v7x: 2nd TC when n_tiles>1
        cost_estimate=cost,
    )(zp, *weights, packed_vec)

    # img.view(img.shape[0], *img_shape) -> NCHW, drop pad rows
    return flat[:B].reshape(B, CHANNELS, IMG_SIZE, IMG_SIZE)


def reference_forward(z, weights, packed):
    """Pure-JAX f32 reference (same weights, all-f32 activations)."""
    def seg(name):
        off, size = OFFSETS[name]
        return packed[:, off:off + size]

    w1, w2, w3, w4, w5 = [w.astype(jnp.float32) for w in weights]

    def leaky(x):
        return jnp.maximum(x, LEAKY_SLOPE * x)

    def bn(h, g, b):
        mean = jnp.mean(h, axis=0, keepdims=True)
        var = jnp.mean((h - mean) ** 2, axis=0, keepdims=True)
        return (h - mean) * jax.lax.rsqrt(var + BN_EPS) * g + b

    h = leaky(z @ w1 + seg("b1"))
    h = leaky(bn(h @ w2 + seg("b2"), seg("g2"), seg("be2")))
    h = leaky(bn(h @ w3 + seg("b3"), seg("g3"), seg("be3")))
    h = leaky(bn(h @ w4 + seg("b4"), seg("g4"), seg("be4")))
    h = jnp.tanh(h @ w5 + seg("b5"))
    return h.reshape(z.shape[0], CHANNELS, IMG_SIZE, IMG_SIZE)


if __name__ == "__main__":
    key = jax.random.PRNGKey(0)
    key, kz = jax.random.split(key)
    z = jax.random.normal(kz, (BATCH, LATENT_DIM), jnp.float32)

    weights, packed = init_params(key)
    img = generator_forward(z, weights, packed)
    jax.block_until_ready(img)

    assert img.shape == (BATCH, CHANNELS, IMG_SIZE, IMG_SIZE)
    assert bool(jnp.all(jnp.isfinite(img)))
    assert bool(jnp.max(jnp.abs(img)) <= 1.0)        # tanh range

    ref = reference_forward(z, weights, packed)
    err = float(jnp.max(jnp.abs(img - ref)))
    assert err < 3e-2, f"max abs err vs f32 reference: {err}"

    print("KERNEL_OK")
</pallas_src>

<mosaic_0001>
module attributes {stable_mosaic.version = 11 : i64} {
  func.func @generator_kernel(%arg0: i32, %arg1: memref<8x32xf32, #tpu.memory_space<vmem>>, %arg2: memref<32x128xf32, #tpu.memory_space<vmem>>, %arg3: memref<128x256xbf16, #tpu.memory_space<vmem>>, %arg4: memref<256x512xbf16, #tpu.memory_space<vmem>>, %arg5: memref<512x1024xbf16, #tpu.memory_space<vmem>>, %arg6: memref<1024x256xbf16, #tpu.memory_space<vmem>>, %arg7: memref<1x5760xf32, #tpu.memory_space<vmem>>, %arg8: memref<8x256xf32, #tpu.memory_space<vmem>>) attributes {dimension_semantics = [#tpu.dimension_semantics<parallel>], iteration_bounds = array<i64: 1>, scalar_prefetch = 0 : i64, scratch_operands = 0 : i64, tpu.core_type = #tpu.core_type<tc>, window_params = [{transform_indices = @transform_0, window_bounds = array<i64: 8, 32>}, {pipeline_mode = #tpu.pipeline_mode<synchronous>, transform_indices = @transform_1, window_bounds = array<i64: 32, 128>}, {pipeline_mode = #tpu.pipeline_mode<synchronous>, transform_indices = @transform_2, window_bounds = array<i64: 128, 256>}, {pipeline_mode = #tpu.pipeline_mode<synchronous>, transform_indices = @transform_3, window_bounds = array<i64: 256, 512>}, {pipeline_mode = #tpu.pipeline_mode<synchronous>, transform_indices = @transform_4, window_bounds = array<i64: 512, 1024>}, {pipeline_mode = #tpu.pipeline_mode<synchronous>, transform_indices = @transform_5, window_bounds = array<i64: 1024, 256>}, {pipeline_mode = #tpu.pipeline_mode<synchronous>, transform_indices = @transform_6, window_bounds = array<i64: 1, 5760>}, {transform_indices = @transform_7, window_bounds = array<i64: 8, 256>}]} {
    %c8_i32 = arith.constant 8 : i32
    %0 = arith.muli %arg0, %c8_i32 : i32
    %c4_i32 = arith.constant 4 : i32
    %1 = arith.subi %c4_i32, %0 : i32
    %c8_i32_0 = arith.constant 8 : i32
    %2 = arith.minsi %1, %c8_i32_0 : i32
    %c1_i32 = arith.constant 1 : i32
    %3 = arith.maxsi %2, %c1_i32 : i32
    %4 = tpu.iota {dimensions = array<i32: 0>} : vector<8x1xi32>
    %5 = vector.broadcast %3 : i32 to vector<8x1xi32>
    %6 = arith.cmpi slt, %4, %5 : vector<8x1xi32>
    %7 = arith.extui %6 : vector<8x1xi1> to vector<8x1xi32>
    %8 = arith.sitofp %7 : vector<8x1xi32> to vector<8x1xf32>
    %9 = arith.sitofp %3 : i32 to f32
    %cst = arith.constant 1.000000e+00 : f32
    %10 = arith.divf %cst, %9 : f32
    %c0 = arith.constant 0 : index
    %c0_1 = arith.constant 0 : index
    %11 = vector.load %arg1[%c0, %c0_1] : memref<8x32xf32, #tpu.memory_space<vmem>>, vector<8x32xf32>
    %c0_2 = arith.constant 0 : index
    %c0_3 = arith.constant 0 : index
    %12 = vector.load %arg2[%c0_2, %c0_3] : memref<32x128xf32, #tpu.memory_space<vmem>>, vector<32x128xf32>
    %cst_4 = arith.constant dense<0.000000e+00> : vector<8x128xf32>
    %13 = tpu.matmul %11, %12, %cst_4 {dimension_numbers = #tpu.dot_dimension_numbers<[1], [0], [0], [1], [0, 0, 1, 1], [], []>} : vector<8x32xf32>, vector<32x128xf32>, vector<8x128xf32> -> vector<8x128xf32>
    %c0_5 = arith.constant 0 : index
    %c0_6 = arith.constant 0 : index
    %14 = vector.load %arg7[%c0_5, %c0_6] : memref<1x5760xf32, #tpu.memory_space<vmem>>, vector<1x128xf32>
    %15 = vector.broadcast %14 : vector<1x128xf32> to vector<8x128xf32>
    %16 = arith.addf %13, %15 : vector<8x128xf32>
    %cst_7 = arith.constant 2.000000e-01 : f32
    %17 = vector.broadcast %cst_7 : f32 to vector<8x128xf32>
    %18 = arith.mulf %17, %16 : vector<8x128xf32>
    %19 = arith.maximumf %16, %18 : vector<8x128xf32>
    %20 = arith.truncf %19 : vector<8x128xf32> to vector<8x128xbf16>
    %c0_8 = arith.constant 0 : index
    %c0_9 = arith.constant 0 : index
    %21 = vector.load %arg3[%c0_8, %c0_9] : memref<128x256xbf16, #tpu.memory_space<vmem>>, vector<128x256xbf16>
    %cst_10 = arith.constant dense<0.000000e+00> : vector<8x256xf32>
    %22 = tpu.matmul %20, %21, %cst_10 {dimension_numbers = #tpu.dot_dimension_numbers<[1], [0], [0], [1], [0, 0, 1, 1], [], []>} : vector<8x128xbf16>, vector<128x256xbf16>, vector<8x256xf32> -> vector<8x256xf32>
    %c0_11 = arith.constant 0 : index
    %c128 = arith.constant 128 : index
    %23 = vector.load %arg7[%c0_11, %c128] : memref<1x5760xf32, #tpu.memory_space<vmem>>, vector<1x256xf32>
    %24 = vector.broadcast %23 : vector<1x256xf32> to vector<8x256xf32>
    %25 = arith.addf %22, %24 : vector<8x256xf32>
    %26 = vector.broadcast %8 : vector<8x1xf32> to vector<8x256xf32>
    %27 = arith.mulf %25, %26 : vector<8x256xf32>
    %cst_12 = arith.constant dense<0.000000e+00> : vector<256xf32>
    %28 = vector.multi_reduction <add>, %27, %cst_12 [0] : vector<8x256xf32> to vector<256xf32>
    %29 = vector.shape_cast %28 : vector<256xf32> to vector<1x256xf32>
    %30 = vector.broadcast %10 : f32 to vector<1x256xf32>
    %31 = arith.mulf %29, %30 : vector<1x256xf32>
    %32 = arith.mulf %27, %25 : vector<8x256xf32>
    %cst_13 = arith.constant dense<0.000000e+00> : vector<256xf32>
    %33 = vector.multi_reduction <add>, %32, %cst_13 [0] : vector<8x256xf32> to vector<256xf32>
    %34 = vector.shape_cast %33 : vector<256xf32> to vector<1x256xf32>
    %35 = vector.broadcast %10 : f32 to vector<1x256xf32>
    %36 = arith.mulf %34, %35 : vector<1x256xf32>
    %37 = arith.mulf %31, %31 : vector<1x256xf32>
    %38 = arith.subf %36, %37 : vector<1x256xf32>
    %cst_14 = arith.constant 8.000000e-01 : f32
    %39 = vector.broadcast %cst_14 : f32 to vector<1x256xf32>
    %40 = arith.addf %38, %39 : vector<1x256xf32>
    %41 = math.rsqrt %40 : vector<1x256xf32>
    %c0_15 = arith.constant 0 : index
    %c384 = arith.constant 384 : index
    %42 = vector.load %arg7[%c0_15, %c384] : memref<1x5760xf32, #tpu.memory_space<vmem>>, vector<1x256xf32>
    %43 = arith.mulf %41, %42 : vector<1x256xf32>
    %c0_16 = arith.constant 0 : index
    %c640 = arith.constant 640 : index
    %44 = vector.load %arg7[%c0_16, %c640] : memref<1x5760xf32, #tpu.memory_space<vmem>>, vector<1x256xf32>
    %45 = arith.mulf %31, %43 : vector<1x256xf32>
    %46 = arith.subf %44, %45 : vector<1x256xf32>
    %47 = vector.broadcast %43 : vector<1x256xf32> to vector<8x256xf32>
    %48 = arith.mulf %25, %47 : vector<8x256xf32>
    %49 = vector.broadcast %46 : vector<1x256xf32> to vector<8x256xf32>
    %50 = arith.addf %48, %49 : vector<8x256xf32>
    %cst_17 = arith.constant 2.000000e-01 : f32
    %51 = vector.broadcast %cst_17 : f32 to vector<8x256xf32>
    %52 = arith.mulf %51, %50 : vector<8x256xf32>
    %53 = arith.maximumf %50, %52 : vector<8x256xf32>
    %54 = arith.truncf %53 : vector<8x256xf32> to vector<8x256xbf16>
    %c0_18 = arith.constant 0 : index
    %c0_19 = arith.constant 0 : index
    %55 = vector.load %arg4[%c0_18, %c0_19] : memref<256x512xbf16, #tpu.memory_space<vmem>>, vector<256x512xbf16>
    %cst_20 = arith.constant dense<0.000000e+00> : vector<8x512xf32>
    %56 = tpu.matmul %54, %55, %cst_20 {dimension_numbers = #tpu.dot_dimension_numbers<[1], [0], [0], [1], [0, 0, 1, 1], [], []>} : vector<8x256xbf16>, vector<256x512xbf16>, vector<8x512xf32> -> vector<8x512xf32>
    %c0_21 = arith.constant 0 : index
    %c896 = arith.constant 896 : index
    %57 = vector.load %arg7[%c0_21, %c896] : memref<1x5760xf32, #tpu.memory_space<vmem>>, vector<1x512xf32>
    %58 = vector.broadcast %57 : vector<1x512xf32> to vector<8x512xf32>
    %59 = arith.addf %56, %58 : vector<8x512xf32>
    %60 = vector.broadcast %8 : vector<8x1xf32> to vector<8x512xf32>
    %61 = arith.mulf %59, %60 : vector<8x512xf32>
    %cst_22 = arith.constant dense<0.000000e+00> : vector<512xf32>
    %62 = vector.multi_reduction <add>, %61, %cst_22 [0] : vector<8x512xf32> to vector<512xf32>
    %63 = vector.shape_cast %62 : vector<512xf32> to vector<1x512xf32>
    %64 = vector.broadcast %10 : f32 to vector<1x512xf32>
    %65 = arith.mulf %63, %64 : vector<1x512xf32>
    %66 = arith.mulf %61, %59 : vector<8x512xf32>
    %cst_23 = arith.constant dense<0.000000e+00> : vector<512xf32>
    %67 = vector.multi_reduction <add>, %66, %cst_23 [0] : vector<8x512xf32> to vector<512xf32>
    %68 = vector.shape_cast %67 : vector<512xf32> to vector<1x512xf32>
    %69 = vector.broadcast %10 : f32 to vector<1x512xf32>
    %70 = arith.mulf %68, %69 : vector<1x512xf32>
    %71 = arith.mulf %65, %65 : vector<1x512xf32>
    %72 = arith.subf %70, %71 : vector<1x512xf32>
    %cst_24 = arith.constant 8.000000e-01 : f32
    %73 = vector.broadcast %cst_24 : f32 to vector<1x512xf32>
    %74 = arith.addf %72, %73 : vector<1x512xf32>
    %75 = math.rsqrt %74 : vector<1x512xf32>
    %c0_25 = arith.constant 0 : index
    %c1408 = arith.constant 1408 : index
    %76 = vector.load %arg7[%c0_25, %c1408] : memref<1x5760xf32, #tpu.memory_space<vmem>>, vector<1x512xf32>
    %77 = arith.mulf %75, %76 : vector<1x512xf32>
    %c0_26 = arith.constant 0 : index
    %c1920 = arith.constant 1920 : index
    %78 = vector.load %arg7[%c0_26, %c1920] : memref<1x5760xf32, #tpu.memory_space<vmem>>, vector<1x512xf32>
    %79 = arith.mulf %65, %77 : vector<1x512xf32>
    %80 = arith.subf %78, %79 : vector<1x512xf32>
    %81 = vector.broadcast %77 : vector<1x512xf32> to vector<8x512xf32>
    %82 = arith.mulf %59, %81 : vector<8x512xf32>
    %83 = vector.broadcast %80 : vector<1x512xf32> to vector<8x512xf32>
    %84 = arith.addf %82, %83 : vector<8x512xf32>
    %cst_27 = arith.constant 2.000000e-01 : f32
    %85 = vector.broadcast %cst_27 : f32 to vector<8x512xf32>
    %86 = arith.mulf %85, %84 : vector<8x512xf32>
    %87 = arith.maximumf %84, %86 : vector<8x512xf32>
    %88 = arith.truncf %87 : vector<8x512xf32> to vector<8x512xbf16>
    %c0_28 = arith.constant 0 : index
    %c0_29 = arith.constant 0 : index
    %89 = vector.load %arg5[%c0_28, %c0_29] : memref<512x1024xbf16, #tpu.memory_space<vmem>>, vector<512x1024xbf16>
    %cst_30 = arith.constant dense<0.000000e+00> : vector<8x1024xf32>
    %90 = tpu.matmul %88, %89, %cst_30 {dimension_numbers = #tpu.dot_dimension_numbers<[1], [0], [0], [1], [0, 0, 1, 1], [], []>} : vector<8x512xbf16>, vector<512x1024xbf16>, vector<8x1024xf32> -> vector<8x1024xf32>
    %c0_31 = arith.constant 0 : index
    %c2432 = arith.constant 2432 : index
    %91 = vector.load %arg7[%c0_31, %c2432] : memref<1x5760xf32, #tpu.memory_space<vmem>>, vector<1x1024xf32>
    %92 = vector.broadcast %91 : vector<1x1024xf32> to vector<8x1024xf32>
    %93 = arith.addf %90, %92 : vector<8x1024xf32>
    %94 = vector.broadcast %8 : vector<8x1xf32> to vector<8x1024xf32>
    %95 = arith.mulf %93, %94 : vector<8x1024xf32>
    %cst_32 = arith.constant dense<0.000000e+00> : vector<1024xf32>
    %96 = vector.multi_reduction <add>, %95, %cst_32 [0] : vector<8x1024xf32> to vector<1024xf32>
    %97 = vector.shape_cast %96 : vector<1024xf32> to vector<1x1024xf32>
    %98 = vector.broadcast %10 : f32 to vector<1x1024xf32>
    %99 = arith.mulf %97, %98 : vector<1x1024xf32>
    %100 = arith.mulf %95, %93 : vector<8x1024xf32>
    %cst_33 = arith.constant dense<0.000000e+00> : vector<1024xf32>
    %101 = vector.multi_reduction <add>, %100, %cst_33 [0] : vector<8x1024xf32> to vector<1024xf32>
    %102 = vector.shape_cast %101 : vector<1024xf32> to vector<1x1024xf32>
    %103 = vector.broadcast %10 : f32 to vector<1x1024xf32>
    %104 = arith.mulf %102, %103 : vector<1x1024xf32>
    %105 = arith.mulf %99, %99 : vector<1x1024xf32>
    %106 = arith.subf %104, %105 : vector<1x1024xf32>
    %cst_34 = arith.constant 8.000000e-01 : f32
    %107 = vector.broadcast %cst_34 : f32 to vector<1x1024xf32>
    %108 = arith.addf %106, %107 : vector<1x1024xf32>
    %109 = math.rsqrt %108 : vector<1x1024xf32>
    %c0_35 = arith.constant 0 : index
    %c3456 = arith.constant 3456 : index
    %110 = vector.load %arg7[%c0_35, %c3456] : memref<1x5760xf32, #tpu.memory_space<vmem>>, vector<1x1024xf32>
    %111 = arith.mulf %109, %110 : vector<1x1024xf32>
    %c0_36 = arith.constant 0 : index
    %c4480 = arith.constant 4480 : index
    %112 = vector.load %arg7[%c0_36, %c4480] : memref<1x5760xf32, #tpu.memory_space<vmem>>, vector<1x1024xf32>
    %113 = arith.mulf %99, %111 : vector<1x1024xf32>
    %114 = arith.subf %112, %113 : vector<1x1024xf32>
    %115 = vector.broadcast %111 : vector<1x1024xf32> to vector<8x1024xf32>
    %116 = arith.mulf %93, %115 : vector<8x1024xf32>
    %117 = vector.broadcast %114 : vector<1x1024xf32> to vector<8x1024xf32>
    %118 = arith.addf %116, %117 : vector<8x1024xf32>
    %cst_37 = arith.constant 2.000000e-01 : f32
    %119 = vector.broadcast %cst_37 : f32 to vector<8x1024xf32>
    %120 = arith.mulf %119, %118 : vector<8x1024xf32>
    %121 = arith.maximumf %118, %120 : vector<8x1024xf32>
    %122 = arith.truncf %121 : vector<8x1024xf32> to vector<8x1024xbf16>
    %c0_38 = arith.constant 0 : index
    %c0_39 = arith.constant 0 : index
    %123 = vector.load %arg6[%c0_38, %c0_39] : memref<1024x256xbf16, #tpu.memory_space<vmem>>, vector<1024x256xbf16>
    %cst_40 = arith.constant dense<0.000000e+00> : vector<8x256xf32>
    %124 = tpu.matmul %122, %123, %cst_40 {dimension_numbers = #tpu.dot_dimension_numbers<[1], [0], [0], [1], [0, 0, 1, 1], [], []>} : vector<8x1024xbf16>, vector<1024x256xbf16>, vector<8x256xf32> -> vector<8x256xf32>
    %c0_41 = arith.constant 0 : index
    %c5504 = arith.constant 5504 : index
    %125 = vector.load %arg7[%c0_41, %c5504] : memref<1x5760xf32, #tpu.memory_space<vmem>>, vector<1x256xf32>
    %126 = vector.broadcast %125 : vector<1x256xf32> to vector<8x256xf32>
    %127 = arith.addf %124, %126 : vector<8x256xf32>
    %128 = math.tanh %127 : vector<8x256xf32>
    %c0_42 = arith.constant 0 : index
    %c0_43 = arith.constant 0 : index
    %129 = vector.load %arg8[%c0_42, %c0_43] : memref<8x256xf32, #tpu.memory_space<vmem>>, vector<8x256xf32>
    tpu.vector_store %arg8[%c0_42, %c0_43], %128 {strides = array<i32>} : memref<8x256xf32, #tpu.memory_space<vmem>>, vector<8x256xf32>,
    return
  }
  func.func @transform_0(%arg0: i32) -> (i32, i32) {
    %c0_i32 = arith.constant 0 : i32
    %c0_i32_0 = arith.constant 0 : i32
    return %arg0, %c0_i32 : i32, i32
  }
  func.func @transform_1(%arg0: i32) -> (i32, i32) {
    %c0_i32 = arith.constant 0 : i32
    %c0_i32_0 = arith.constant 0 : i32
    %c0_i32_1 = arith.constant 0 : i32
    return %c0_i32, %c0_i32_0 : i32, i32
  }
  func.func @transform_2(%arg0: i32) -> (i32, i32) {
    %c0_i32 = arith.constant 0 : i32
    %c0_i32_0 = arith.constant 0 : i32
    %c0_i32_1 = arith.constant 0 : i32
    return %c0_i32, %c0_i32_0 : i32, i32
  }
  func.func @transform_3(%arg0: i32) -> (i32, i32) {
    %c0_i32 = arith.constant 0 : i32
    %c0_i32_0 = arith.constant 0 : i32
    %c0_i32_1 = arith.constant 0 : i32
    return %c0_i32, %c0_i32_0 : i32, i32
  }
  func.func @transform_4(%arg0: i32) -> (i32, i32) {
    %c0_i32 = arith.constant 0 : i32
    %c0_i32_0 = arith.constant 0 : i32
    %c0_i32_1 = arith.constant 0 : i32
    return %c0_i32, %c0_i32_0 : i32, i32
  }
  func.func @transform_5(%arg0: i32) -> (i32, i32) {
    %c0_i32 = arith.constant 0 : i32
    %c0_i32_0 = arith.constant 0 : i32
    %c0_i32_1 = arith.constant 0 : i32
    return %c0_i32, %c0_i32_0 : i32, i32
  }
  func.func @transform_6(%arg0: i32) -> (i32, i32) {
    %c0_i32 = arith.constant 0 : i32
    %c0_i32_0 = arith.constant 0 : i32
    %c0_i32_1 = arith.constant 0 : i32
    return %c0_i32, %c0_i32_0 : i32, i32
  }
  func.func @transform_7(%arg0: i32) -> (i32, i32) {
    %c0_i32 = arith.constant 0 : i32
    %c0_i32_0 = arith.constant 0 : i32
    return %arg0, %c0_i32 : i32, i32
  }
}

</mosaic_0001>

<bundles_post_ra>
// kernel: tpu_custom_call.1
= control target key start
LH: loop header
LB: loop body
LE: loop exit
PB: predicated region body
PF: predicated region fallthrough
CT: control target
= control target key end

     0   :  { %12 = vsyncpa [#allocation3], 0  ;;  %s5849_s0 = inlined_call_operand.hbm [shape: f32[8,32], index: 0, kind: input, shape index: {}]   ;;  %s5850_s1 = inlined_call_operand.hbm [shape: f32[32,128], index: 1, kind: input, shape index: {}]   ;;  %s5851_s2 = inlined_call_operand.hbm [shape: bf16[128,256], index: 2, kind: input, shape index: {}]   ;;  %s5852_s3 = inlined_call_operand.hbm [shape: bf16[256,512], index: 3, kind: input, shape index: {}]   ;;  %s5853_s4 = inlined_call_operand.hbm [shape: bf16[512,1024], index: 4, kind: input, shape index: {}]   ;;  %s5854_s5 = inlined_call_operand.hbm [shape: bf16[1024,256], index: 5, kind: input, shape index: {}]   ;;  %s5855_s6 = inlined_call_operand.hbm [shape: f32[1,5760], index: 6, kind: input, shape index: {}]   ;;  %s5856_s7 = inlined_call_operand.hbm [shape: f32[8,256], index: 7, kind: output, shape index: {}]  }
   0x1   :  { %13 = vsyncpa [#allocation6], 0 }
   0x2   :  { %14 = vsyncpa [#allocation9], 0 }
   0x3   :  { %15 = vsyncpa [#allocation12], 0 }
   0x4   :  { %16 = vsyncpa [#allocation4], 0  ;;  %s5443_s24 = smov [#allocation5]  }
   0x5   :  { %s32_s25 = sshll.u32 %s5443_s24, 4  ;;  %s33_s25 = int_to_ptr.vmem [resolvable:$true] %s32_s25 }
   0x6   :  { %s5281_s26 = scalar_lea.vmem %s33_s25, 512  ;;  %p5286_p1 = scmp.lt.s32.totalorder %s33_s25, %s33_s25 }
   0x7   :  { %p5282_p0 = scmp.ne.s32.totalorder %s33_s25, %s5281_s26  ;;  %p5287_p2 = scmp.lt.s32.totalorder %s5281_s26, %s5281_s26 }
   0x9   :  { %p5288_p3 = por %p5287_p2, %p5286_p1 }
   0xb   :  { %p5289_p4 = pnand %p5288_p3, %p5282_p0 }
   0xd   :  { %5292 = shalt.err (!%p5289_p4)
}
   0xe   :  { %s5444_s27 = smov 128   ;;  %s5445_s28 = smov 8  }
   0xf   :  { %38 = dma.hbm_to_vmem [thread:$0]  %s5850_s1, 512, %s33_s25, [#allocation6], %s5444_s27, %s5444_s27, %s5445_s28  }
  0x10   :  { %s5446_s8 = smov [#allocation8]  }
  0x11   :  { %s56_s9 = sshll.u32 %s5446_s8, 4  ;;  %s57_s9 = int_to_ptr.vmem [resolvable:$true] %s56_s9 }
  0x12   :  { %s5301_s10 = scalar_lea.vmem %s57_s9, 8192  ;;  %p5306_p6 = scmp.lt.s32.totalorder %s57_s9, %s57_s9 }
  0x13   :  { %p5302_p5 = scmp.ne.s32.totalorder %s57_s9, %s5301_s10  ;;  %p5307_p7 = scmp.lt.s32.totalorder %s5301_s10, %s5301_s10 }
  0x15   :  { %p5308_p8 = por %p5307_p7, %p5306_p6 }
  0x17   :  { %p5309_p9 = pnand %p5308_p8, %p5302_p5 }
  0x19   :  { %5312 = shalt.err (!%p5309_p9)
}
  0x1a   :  { %s5447_s11 = smov 256   ;;  %s5448_s12 = smov 16  }
  0x1b   :  { %62 = dma.hbm_to_vmem [thread:$0]  %s5852_s3, 8192, %s57_s9, [#allocation9], %s5447_s11, %s5447_s11, %s5448_s12  }
  0x1c   :  { %s5449_s15 = smov [#allocation11]   ;;  %s5450_s17 = smov [#allocation2]  }
  0x1d   :  { %s80_s16 = sshll.u32 %s5449_s15, 4  ;;  %s23_s1 = sshll.u32 %s5450_s17, 4  ;;  %s81_s16 = int_to_ptr.vmem [resolvable:$true] %s80_s16  ;;  %s24_s1 = int_to_ptr.vmem [resolvable:$true] %s23_s1 }
  0x1e   :  { %s5321_s18 = scalar_lea.vmem %s81_s16, 16384  ;;  %p5326_p11 = scmp.lt.s32.totalorder %s81_s16, %s81_s16 }
  0x1f   :  { %p5322_p10 = scmp.ne.s32.totalorder %s81_s16, %s5321_s18  ;;  %p5327_p12 = scmp.lt.s32.totalorder %s5321_s18, %s5321_s18 }
  0x21   :  { %p5328_p13 = por %p5327_p12, %p5326_p11 }
  0x23   :  { %p5329_p0 = pnand %p5328_p13, %p5322_p10 }
  0x25   :  { %5332 = shalt.err (!%p5329_p0)
}
  0x26   :  { %86 = dma.hbm_to_vmem [thread:$0]  %s5854_s5, 16384, %s81_s16, [#allocation12], %s5444_s27, %s5444_s27, %s5445_s28  }
  0x27   :  { %s5341_s3 = scalar_lea.vmem %s24_s1, 128  ;;  %p5346_p2 = scmp.lt.s32.totalorder %s24_s1, %s24_s1 }
  0x28   :  { %p5342_p1 = scmp.ne.s32.totalorder %s24_s1, %s5341_s3  ;;  %p5347_p3 = scmp.lt.s32.totalorder %s5341_s3, %s5341_s3 }
  0x2a   :  { %p5348_p4 = por %p5347_p3, %p5346_p2 }
  0x2c   :  { %p5349_p5 = pnand %p5348_p4, %p5342_p1 }
  0x2e   :  { %5352 = shalt.err (!%p5349_p5)
}
  0x2f   :  { %26 = dma.hbm_to_vmem [thread:$0]  %s5849_s0, 128, %s24_s1, [#allocation3]  }
  0x30   :  { %s5451_s23 = smov [#allocation7]   ;;  %s5452_s25 = smov [#allocation10]  }
  0x31   :  { %s44_s24 = sshll.u32 %s5451_s23, 4  ;;  %s68_s26 = sshll.u32 %s5452_s25, 4  ;;  %s45_s24 = int_to_ptr.vmem [resolvable:$true] %s44_s24  ;;  %s69_s26 = int_to_ptr.vmem [resolvable:$true] %s68_s26 }
  0x32   :  { %s5361_s29 = scalar_lea.vmem %s45_s24, 2048  ;;  %p5366_p7 = scmp.lt.s32.totalorder %s45_s24, %s45_s24 }
  0x33   :  { %p5362_p6 = scmp.ne.s32.totalorder %s45_s24, %s5361_s29  ;;  %p5367_p8 = scmp.lt.s32.totalorder %s5361_s29, %s5361_s29 }
  0x35   :  { %p5368_p9 = por %p5367_p8, %p5366_p7 }
  0x37   :  { %p5369_p10 = pnand %p5368_p9, %p5362_p6 }
  0x39   :  { %5372 = shalt.err (!%p5369_p10)
}
  0x3a   :  { %50 = dma.hbm_to_vmem [thread:$0]  %s5851_s2, 2048, %s45_s24, [#allocation6], %s5444_s27, %s5444_s27, %s5445_s28  }
  0x3b   :  { %s5381_s0 = scalar_lea.vmem %s69_s26, 32768  ;;  %p5386_p12 = scmp.lt.s32.totalorder %s69_s26, %s69_s26 }
  0x3c   :  { %p5382_p11 = scmp.ne.s32.totalorder %s69_s26, %s5381_s0  ;;  %p5387_p13 = scmp.lt.s32.totalorder %s5381_s0, %s5381_s0 }
  0x3e   :  { %p5388_p0 = por %p5387_p13, %p5386_p12 }
  0x40   :  { %p5389_p1 = pnand %p5388_p0, %p5382_p11 }
  0x42   :  { %5392 = shalt.err (!%p5389_p1)
}
  0x43   :  { %s5453_s8 = smov 512   ;;  %s5454_s9 = smov 32  }
  0x44   :  { %74 = dma.hbm_to_vmem [thread:$0]  %s5853_s4, 32768, %s69_s26, [#allocation9], %s5453_s8, %s5453_s8, %s5454_s9  }
  0x45   :  { %s5455_s12 = smov [#allocation13]  }
  0x46   :  { %s93_s13 = sshll.u32 %s5455_s12, 4  ;;  %s94_s13 = int_to_ptr.vmem [resolvable:$true] %s93_s13 }
  0x47   :  { %s5401_s14 = scalar_lea.vmem %s94_s13, 720  ;;  %s5405_s15 = scalar_lea.vmem %s94_s13, 736 }
  0x48   :  { %p5402_p2 = scmp.ne.s32.totalorder %s94_s13, %s5401_s14  ;;  %p5406_p3 = scmp.lt.s32.totalorder %s94_s13, %s94_s13 }
  0x49   :  { %p5407_p4 = scmp.lt.s32.totalorder %s5405_s15, %s5401_s14 }
  0x4b   :  { %p5408_p5 = por %p5407_p4, %p5406_p3 }
  0x4d   :  { %p5409_p6 = pnand %p5408_p5, %p5402_p2 }
  0x4f   :  { %5412 = shalt.err (!%p5409_p6)
}
  0x50   :  { %96 = dma.hbm_to_vmem [thread:$0]  %s5855_s6, 720, %s94_s13, [#allocation12]  }
  0x51   :  { %5433 = dma.done.wait [#allocation3], 128  }
  0x52   :  { %5434 = vsyncadd [#allocation3], 4294967168 }
  0x53   :  { %5435 = dma.done.wait [#allocation6], 2560  }
  0x54   :  { %5436 = vsyncadd [#allocation6], 4294964736 }
  0x55   :  { %5437 = dma.done.wait [#allocation9], 40960  }
  0x56   :  { %5438 = vsyncadd [#allocation9], 4294926336 }
  0x57   :  { %5439 = dma.done.wait [#allocation12], 17104  }
  0x58   :  { %5440 = vsyncadd [#allocation12], 4294950192  ;;  %v5456_v0 = vmov 0.0   ;;  %vm5457_vm0 = vmmov 0   ;;  %v139_v1 = vld [vmem:[#allocation5 + $0x18] sm:$0xff]  ;;  %v138_v2 = vld [vmem:[#allocation5 + $0x10] sm:$0xff] }
  0x59   :  { %4900 = vmatprep.subr.mxu0 %v5456_v0  ;;  %4908 = vmatprep.mubr.msk.f32.mxu0 %vm5457_vm0, %v5456_v0  ;;  %v137_v3 = vld [vmem:[#allocation5 + $0x8] sm:$0xff]  ;;  %v4929_v4 = vld [vmem:[#allocation7 + $0x74] ss:$8 sps:$4 sm:$0xff]   ;;  %v4931_v5 = vld [vmem:[#allocation7 + $0x70] ss:$8 sps:$4 sm:$0xff]   ;;  %vm147_vm1 = vcmask 261120  }
  0x5a   :  { %4901 = vmatpush3.msra.mxu0 %v139_v1  ;;  %v4932_v6 = vld [vmem:[#allocation7 + $0x64] ss:$8 sps:$4 sm:$0xff]   ;;  %332 = vmatprep.subr.bf16.mxu1 %v4929_v4  ;;  %v135_v8 = vld [vmem:[#allocation2] sm:$0xff]  ;;  %v4934_v9 = vld [vmem:[#allocation7 + $0x60] ss:$8 sps:$4 sm:$0xff]   ;;  %v5458_v22 = vmov 0  }
  0x5b   :  { %4902 = vmatprep.subr.mxu0 %v5456_v0  ;;  %v136_v7 = vld [vmem:[#allocation5] sm:$0xff]  ;;  %333 = vmatpush1.bf16.msra.mxu1 %v4931_v5  ;;  %v4935_v10 = vld [vmem:[#allocation7 + $0x54] ss:$8 sps:$4 sm:$0xff]   ;;  %v4937_v11 = vld [vmem:[#allocation7 + $0x50] ss:$8 sps:$4 sm:$0xff]   ;;  %s5460_s4 = smov [#allocation14]  }
  0x5c   :  { %4903 = vmatpush3.msra.mxu0 %v138_v2  ;;  %334 = vmatprep.subr.bf16.mxu1 %v4932_v6  ;;  %v4938_v12 = vld [vmem:[#allocation7 + $0x44] ss:$8 sps:$4 sm:$0xff]   ;;  %v4940_v13 = vld [vmem:[#allocation7 + $0x40] ss:$8 sps:$4 sm:$0xff]   ;;  %v4941_v14 = vld [vmem:[#allocation7 + $0x34] ss:$8 sps:$4 sm:$0xff]  }
  0x5d   :  { %4904 = vmatprep.subr.mxu0 %v5456_v0  ;;  %v4943_v15 = vld [vmem:[#allocation7 + $0x30] ss:$8 sps:$4 sm:$0xff]   ;;  %v4944_v16 = vld [vmem:[#allocation7 + $0x24] ss:$8 sps:$4 sm:$0xff]   ;;  %v4946_v17 = vld [vmem:[#allocation7 + $0x20] ss:$8 sps:$4 sm:$0xff]   ;;  %364 = vmatprep.mubr.bf16.mxu1 %v5458_v22 }
  0x5e   :  { %4905 = vmatpush3.msra.mxu0 %v137_v3  ;;  %v4947_v18 = vld [vmem:[#allocation7 + $0x14] ss:$8 sps:$4 sm:$0xff]   ;;  %v4949_v19 = vld [vmem:[#allocation7 + $0x10] ss:$8 sps:$4 sm:$0xff]   ;;  %v4950_v20 = vld [vmem:[#allocation7 + $0x4] ss:$8 sps:$4 sm:$0xff]  }
  0x5f   :  { %4906 = vmatprep.subr.mxu0 %v5456_v0  ;;  %335 = vmatpush1.bf16.msra.mxu1 %v4934_v9  ;;  %v4952_v21 = vld [vmem:[#allocation7] ss:$8 sps:$4 sm:$0xff]   ;;  %v4955_v30 = vld [vmem:[#allocation8 + $0xe4] ss:$16 sps:$4 sm:$0xff]   ;;  %v4958_v31 = vld [vmem:[#allocation8 + $0xec] ss:$16 sps:$4 sm:$0xff]  }
  0x60   :  { %4907 = vmatpush3.msra.mxu0 %v136_v7  ;;  %336 = vmatprep.subr.bf16.mxu1 %v4935_v10  ;;  %v4429_v23 = vld [vmem:[#allocation13] ss:$0 sm:$0xff]  ;;  %v4956_v33 = vld [vmem:[#allocation8 + $0xe8] ss:$16 sps:$4 sm:$0xff]   ;;  %v4961_v34 = vld [vmem:[#allocation8 + $0xc4] ss:$16 sps:$4 sm:$0xff]  }
  0x61   :  { %4909 = vmatmul.mubr.msk.f32.vlgmr.msra.gmra.mxu0 %vm147_vm1, %v135_v8  ;;  %v4953_v32 = vld [vmem:[#allocation8 + $0xe0] ss:$16 sps:$4 sm:$0xff]   ;;  %885 = vmatprep.subr.bf16.mxu0 %v4955_v30  ;;  %v4964_v35 = vld [vmem:[#allocation8 + $0xcc] ss:$16 sps:$4 sm:$0xff]   ;;  %v4962_v37 = vld [vmem:[#allocation8 + $0xc8] ss:$16 sps:$4 sm:$0xff]  }
  0x62   :  { %886 = vmatpush1.bf16.msra.mxu0 %v4953_v32  ;;  %v4959_v36 = vld [vmem:[#allocation8 + $0xc0] ss:$16 sps:$4 sm:$0xff]   ;;  %v4967_v38 = vld [vmem:[#allocation8 + $0xa4] ss:$16 sps:$4 sm:$0xff]   ;;  %v4970_v39 = vld [vmem:[#allocation8 + $0xac] ss:$16 sps:$4 sm:$0xff]  }
  0x63   :  { %337 = vmatpush1.bf16.msra.mxu1 %v4937_v11  ;;  %887 = vmatprep.subr.bf16.mxu0 %v4961_v34  ;;  %v4965_v40 = vld [vmem:[#allocation8 + $0xa0] ss:$16 sps:$4 sm:$0xff]   ;;  %v4968_v41 = vld [vmem:[#allocation8 + $0xa8] ss:$16 sps:$4 sm:$0xff]   ;;  %v4973_v42 = vld [vmem:[#allocation8 + $0x84] ss:$16 sps:$4 sm:$0xff]  }
  0x64   :  { %338 = vmatprep.subr.bf16.mxu1 %v4938_v12  ;;  %v4976_v43 = vld [vmem:[#allocation8 + $0x8c] ss:$16 sps:$4 sm:$0xff]   ;;  %v4971_v44 = vld [vmem:[#allocation8 + $0x80] ss:$16 sps:$4 sm:$0xff]   ;;  %v4974_v45 = vld [vmem:[#allocation8 + $0x88] ss:$16 sps:$4 sm:$0xff]  }
  0x65   :  { %v4979_v46 = vld [vmem:[#allocation8 + $0x64] ss:$16 sps:$4 sm:$0xff]   ;;  %v4982_v47 = vld [vmem:[#allocation8 + $0x6c] ss:$16 sps:$4 sm:$0xff]   ;;  %v4977_v48 = vld [vmem:[#allocation8 + $0x60] ss:$16 sps:$4 sm:$0xff]  }
  0x66   :  { %888 = vmatpush1.bf16.msra.mxu0 %v4959_v36  ;;  %v4980_v49 = vld [vmem:[#allocation8 + $0x68] ss:$16 sps:$4 sm:$0xff]   ;;  %v4985_v50 = vld [vmem:[#allocation8 + $0x44] ss:$16 sps:$4 sm:$0xff]   ;;  %v4988_v51 = vld [vmem:[#allocation8 + $0x4c] ss:$16 sps:$4 sm:$0xff]  }
  0x67   :  { %339 = vmatpush1.bf16.msra.mxu1 %v4940_v13  ;;  %889 = vmatprep.subr.bf16.mxu0 %v4967_v38  ;;  %v4983_v52 = vld [vmem:[#allocation8 + $0x40] ss:$16 sps:$4 sm:$0xff]   ;;  %v4986_v53 = vld [vmem:[#allocation8 + $0x48] ss:$16 sps:$4 sm:$0xff]   ;;  %v4991_v54 = vld [vmem:[#allocation8 + $0x24] ss:$16 sps:$4 sm:$0xff]  }
  0x68   :  { %340 = vmatprep.subr.bf16.mxu1 %v4941_v14  ;;  %v4994_v55 = vld [vmem:[#allocation8 + $0x2c] ss:$16 sps:$4 sm:$0xff]   ;;  %v4989_v56 = vld [vmem:[#allocation8 + $0x20] ss:$16 sps:$4 sm:$0xff]   ;;  %v4992_v57 = vld [vmem:[#allocation8 + $0x28] ss:$16 sps:$4 sm:$0xff]  }
  0x69   :  { %v4997_v58 = vld [vmem:[#allocation8 + $0x4] ss:$16 sps:$4 sm:$0xff]   ;;  %v5000_v59 = vld [vmem:[#allocation8 + $0xc] ss:$16 sps:$4 sm:$0xff]   ;;  %v4995_v60 = vld [vmem:[#allocation8] ss:$16 sps:$4 sm:$0xff]  }
  0x6a   :  { %890 = vmatpush1.bf16.msra.mxu0 %v4965_v40  ;;  %v4998_v61 = vld [vmem:[#allocation8 + $0x8] ss:$16 sps:$4 sm:$0xff]   ;;  %v5003_v62 = vld [vmem:[#allocation8 + $0x1e4] ss:$16 sps:$4 sm:$0xff]   ;;  %v5006_v63 = vld [vmem:[#allocation8 + $0x1ec] ss:$16 sps:$4 sm:$0xff]  }
  0x6b   :  { %341 = vmatpush1.bf16.msra.mxu1 %v4943_v15  ;;  %891 = vmatprep.subr.bf16.mxu0 %v4973_v42  ;;  %v5001_v1 = vld [vmem:[#allocation8 + $0x1e0] ss:$16 sps:$4 sm:$0xff]   ;;  %v5004_v2 = vld [vmem:[#allocation8 + $0x1e8] ss:$16 sps:$4 sm:$0xff]   ;;  %v5009_v3 = vld [vmem:[#allocation8 + $0x1c4] ss:$16 sps:$4 sm:$0xff]  }
  0x6c   :  { %342 = vmatprep.subr.bf16.mxu1 %v4944_v16  ;;  %v5012_v4 = vld [vmem:[#allocation8 + $0x1cc] ss:$16 sps:$4 sm:$0xff]   ;;  %v5007_v5 = vld [vmem:[#allocation8 + $0x1c0] ss:$16 sps:$4 sm:$0xff]   ;;  %v5010_v6 = vld [vmem:[#allocation8 + $0x1c8] ss:$16 sps:$4 sm:$0xff]  }
  0x6d   :  { %v5015_v7 = vld [vmem:[#allocation8 + $0x1a4] ss:$16 sps:$4 sm:$0xff]   ;;  %v5018_v8 = vld [vmem:[#allocation8 + $0x1ac] ss:$16 sps:$4 sm:$0xff]   ;;  %v5013_v9 = vld [vmem:[#allocation8 + $0x1a0] ss:$16 sps:$4 sm:$0xff]  }
  0x6e   :  { %892 = vmatpush1.bf16.msra.mxu0 %v4971_v44  ;;  %v5016_v10 = vld [vmem:[#allocation8 + $0x1a8] ss:$16 sps:$4 sm:$0xff]   ;;  %v5021_v11 = vld [vmem:[#allocation8 + $0x184] ss:$16 sps:$4 sm:$0xff]   ;;  %v5024_v12 = vld [vmem:[#allocation8 + $0x18c] ss:$16 sps:$4 sm:$0xff]  }
  0x6f   :  { %343 = vmatpush1.bf16.msra.mxu1 %v4946_v17  ;;  %893 = vmatprep.subr.bf16.mxu0 %v4979_v46  ;;  %v5019_v13 = vld [vmem:[#allocation8 + $0x180] ss:$16 sps:$4 sm:$0xff]   ;;  %v5022_v14 = vld [vmem:[#allocation8 + $0x188] ss:$16 sps:$4 sm:$0xff]   ;;  %v5027_v16 = vld [vmem:[#allocation8 + $0x164] ss:$16 sps:$4 sm:$0xff]  }
  0x70   :  { %344 = vmatprep.subr.bf16.mxu1 %v4947_v18  ;;  %v5025_v15 = vld [vmem:[#allocation8 + $0x160] ss:$16 sps:$4 sm:$0xff]   ;;  %v5028_v17 = vld [vmem:[#allocation8 + $0x168] ss:$16 sps:$4 sm:$0xff]   ;;  %v5030_v18 = vld [vmem:[#allocation8 + $0x16c] ss:$16 sps:$4 sm:$0xff]  }
  0x71   :  { %v5034_v22 = vld [vmem:[#allocation8 + $0x148] ss:$16 sps:$4 sm:$0xff]   ;;  %v240_v34 = vld [vmem:[#allocation13 + $0x1] sm:$0x3]  ;;  %s4416_s6 = sshll.u32 %s5460_s4, 4  ;;  %s4417_s6 = int_to_ptr.vmem [resolvable:$true] %s4416_s6 }
  0x72   :  { %894 = vmatpush1.bf16.msra.mxu0 %v4977_v48  ;;  %v5046_v30 = vld [vmem:[#allocation8 + $0x108] ss:$16 sps:$4 sm:$0xff]   ;;  %s5413_s28 = scalar_lea.vmem %s4417_s6, 256  ;;  %p5418_p8 = scmp.lt.s32.totalorder %s4417_s6, %s4417_s6 }
  0x73   :  { %345 = vmatpush1.bf16.msra.mxu1 %v4949_v19  ;;  %895 = vmatprep.subr.bf16.mxu0 %v4985_v50  ;;  %v5033_v19 = vld [vmem:[#allocation8 + $0x144] ss:$16 sps:$4 sm:$0xff]   ;;  %p5414_p7 = scmp.ne.s32.totalorder %s4417_s6, %s5413_s28  ;;  %p5419_p9 = scmp.lt.s32.totalorder %s5413_s28, %s5413_s28 }
  0x74   :  { %346 = vmatprep.subr.bf16.mxu1 %v4950_v20  ;;  %v5036_v20 = vld [vmem:[#allocation8 + $0x14c] ss:$16 sps:$4 sm:$0xff]  }
  0x75   :  { %p5420_p10 = por %p5419_p9, %p5418_p8 }
  0x76   :  { %896 = vmatpush1.bf16.msra.mxu0 %v4983_v52 }
  0x77   :  { %347 = vmatpush1.bf16.msra.mxu1 %v4952_v21  ;;  %897 = vmatprep.subr.bf16.mxu0 %v4991_v54  ;;  %v5031_v21 = vld [vmem:[#allocation8 + $0x140] ss:$16 sps:$4 sm:$0xff]   ;;  %p5421_p11 = pnand %p5420_p10, %p5414_p7 }
  0x78   :  { %926 = vmatprep.subr.bf16.mxu1 %v4958_v31  ;;  %v125_v31 = vlaneseq }
  0x7a   :  { %898 = vmatpush1.bf16.msra.mxu0 %v4989_v56  ;;  %v5536_v32 = vshrl.u32 %v125_v31, 7 }
  0x7b   :  { %899 = vmatprep.subr.bf16.mxu0 %v4997_v58 }
  0x7c   :  { %vm128_vm2 = vcmp.lt.s32.totalorder %v5536_v32, 4 }
  0x7d   :  { %v5548_v38 = vsel %vm128_vm2, 1.0, %v5456_v0 }
  0x7e   :  { %900 = vmatpush1.bf16.msra.mxu0 %v4995_v60 }
  0x7f   :  { %901 = vmatprep.subr.bf16.mxu0 %v5003_v62 }
  0x82   :  { %902 = vmatpush2.bf16.msra.mxu0 %v5001_v1 }
  0x83   :  { %903 = vmatprep.subr.bf16.mxu0 %v5009_v3 }
  0x86   :  { %904 = vmatpush2.bf16.msra.mxu0 %v5007_v5 }
  0x87   :  { %905 = vmatprep.subr.bf16.mxu0 %v5015_v7 }
  0x8a   :  { %906 = vmatpush2.bf16.msra.mxu0 %v5013_v9 }
  0x8b   :  { %907 = vmatprep.subr.bf16.mxu0 %v5021_v11 }
  0x8e   :  { %908 = vmatpush2.bf16.msra.mxu0 %v5019_v13 }
  0x8f   :  { %909 = vmatprep.subr.bf16.mxu0 %v5027_v16 }
  0x92   :  { %910 = vmatpush2.bf16.msra.mxu0 %v5025_v15 }
  0x93   :  { %911 = vmatprep.subr.bf16.mxu0 %v5033_v19  ;;  %v414_v19 = vld [vmem:[#allocation13 + $0x3] sm:$0x3] }
  0x96   :  { %912 = vmatpush2.bf16.msra.mxu0 %v5031_v21  ;;  %v5459_v21 = vmov 1966171168  }
 0x121   :  { %v217_v24 = vpop.f32.mrf.mxu0 }
 0x122   :  { %v218_v25 = vadd.f32 %v4429_v23, %v217_v24  ;;  %v5039_v23 = vld [vmem:[#allocation8 + $0x124] ss:$16 sps:$4 sm:$0xff]   ;;  %v5042_v24 = vld [vmem:[#allocation8 + $0x12c] ss:$16 sps:$4 sm:$0xff]  }
 0x123   :  { %v4910_v26 = vpop.f32.mrf.mxu0  ;;  %913 = vmatprep.subr.bf16.mxu0 %v5039_v23 }
 0x124   :  { %v221_v27 = vmul.f32 0.2, %v218_v25  ;;  %v5040_v26 = vld [vmem:[#allocation8 + $0x128] ss:$16 sps:$4 sm:$0xff]  }
 0x126   :  { %v222_v28 = vmax.f32 %v218_v25, %v221_v27  ;;  %v5037_v25 = vld [vmem:[#allocation8 + $0x120] ss:$16 sps:$4 sm:$0xff]   ;;  %v5045_v27 = vld [vmem:[#allocation8 + $0x104] ss:$16 sps:$4 sm:$0xff]  }
 0x127   :  { %914 = vmatpush2.bf16.msra.mxu0 %v5037_v25 }
 0x128   :  { %v223_v29 = vpack.c.bf16 %v222_v28, %v222_v28  ;;  %v5048_v28 = vld [vmem:[#allocation8 + $0x10c] ss:$16 sps:$4 sm:$0xff]   ;;  %915 = vmatprep.subr.bf16.mxu0 %v5045_v27 }
 0x12a   :  { %365 = vmatmul.mubr.bf16.vlgmr.msra.gmra.mxu1 %v223_v29  ;;  %v5043_v29 = vld [vmem:[#allocation8 + $0x100] ss:$16 sps:$4 sm:$0xff]  }
 0x12b   :  { %927 = vmatpush1.bf16.msra.mxu1 %v4956_v33  ;;  %916 = vmatpush2.bf16.msra.mxu0 %v5043_v29  ;;  %v5539_v33 = vsub.s32 0, %v5536_v32 }
 0x12c   :  { %928 = vmatprep.subr.bf16.mxu1 %v4964_v35  ;;  %v5542_v35 = vsub.s32 1, %v5536_v32 }
 0x12d   :  { %v245_v36 = vrot.slane %v240_v34, %v5539_v33 }
 0x12e   :  { %v423_v23 = vrot.slane %v414_v19, %v5542_v35 }
 0x12f   :  { %929 = vmatpush1.bf16.msra.mxu1 %v4962_v37  ;;  %v249_v37 = vrot.slane %v240_v34, %v5542_v35 }
 0x130   :  { %930 = vmatprep.subr.bf16.mxu1 %v4970_v39 }
 0x133   :  { %931 = vmatpush1.bf16.msra.mxu1 %v4968_v41 }
 0x134   :  { %932 = vmatprep.subr.bf16.mxu1 %v4976_v43 }
 0x137   :  { %933 = vmatpush1.bf16.msra.mxu1 %v4974_v45 }
 0x138   :  { %934 = vmatprep.subr.bf16.mxu1 %v4982_v47 }
 0x13b   :  { %935 = vmatpush1.bf16.msra.mxu1 %v4980_v49 }
 0x13c   :  { %936 = vmatprep.subr.bf16.mxu1 %v4988_v51 }
 0x13f   :  { %937 = vmatpush1.bf16.msra.mxu1 %v4986_v53 }
 0x140   :  { %938 = vmatprep.subr.bf16.mxu1 %v4994_v55 }
 0x143   :  { %939 = vmatpush1.bf16.msra.mxu1 %v4992_v57 }
 0x144   :  { %940 = vmatprep.subr.bf16.mxu1 %v5000_v59 }
 0x147   :  { %941 = vmatpush1.bf16.msra.mxu1 %v4998_v61 }
 0x148   :  { %942 = vmatprep.subr.bf16.mxu1 %v5006_v63 }
 0x14b   :  { %943 = vmatpush2.bf16.msra.mxu1 %v5004_v2 }
 0x14c   :  { %944 = vmatprep.subr.bf16.mxu1 %v5012_v4 }
 0x14f   :  { %945 = vmatpush2.bf16.msra.mxu1 %v5010_v6 }
 0x150   :  { %946 = vmatprep.subr.bf16.mxu1 %v5018_v8 }
 0x153   :  { %947 = vmatpush2.bf16.msra.mxu1 %v5016_v10 }
 0x154   :  { %948 = vmatprep.subr.bf16.mxu1 %v5024_v12 }
 0x157   :  { %949 = vmatpush2.bf16.msra.mxu1 %v5022_v14 }
 0x158   :  { %950 = vmatprep.subr.bf16.mxu1 %v5030_v18 }
 0x15b   :  { %951 = vmatpush2.bf16.msra.mxu1 %v5028_v17 }
 0x15c   :  { %952 = vmatprep.subr.bf16.mxu1 %v5036_v20  ;;  %v419_v20 = vrot.slane %v414_v19, %v5539_v33  ;;  %v1329_v19 = vld [vmem:[#allocation10 + $0x520] sm:$0xff] }
 0x15f   :  { %953 = vmatpush2.bf16.msra.mxu1 %v5034_v22  ;;  %v435_v22 = vunpack.c.l.s4 %v5459_v21 }
 0x160   :  { %954 = vmatprep.subr.bf16.mxu1 %v5042_v24 }
 0x163   :  { %955 = vmatpush2.bf16.msra.mxu1 %v5040_v26  ;;  %v436_v26 = vunpack.c.0.s8 %v435_v22 }
 0x164   :  { %956 = vmatprep.subr.bf16.mxu1 %v5048_v28 }
 0x165   :  { %v5563_v31 = vsub.s32 %v436_v26, %v5536_v32 }
 0x167   :  { %957 = vmatpush2.bf16.msra.mxu1 %v5046_v30 }
 0x1ea   :  { %v366_v39 = vpop.f32.mrf.mxu1 }
 0x1eb   :  { %v5550_v40 = vadd.f32 %v366_v39, %v245_v36 }
 0x1ec   :  { %v368_v41 = vpop.f32.mrf.mxu1 }
 0x1ed   :  { %v373_v42 = vmul.f32 %v5548_v38, %v5550_v40  ;;  %v5554_v43 = vadd.f32 %v368_v41, %v249_v37  ;;  %v428_v37 = vld [vmem:[#allocation13 + $0x5] sm:$0x3] }
 0x1ee   :  { %v370_v44 = vpop.f32.mrf.mxu1 }
 0x1ef   :  { %v375_v45 = vrot.slane %v373_v42, 4  ;;  %v390_v46 = vmul.f32 %v373_v42, %v5550_v40  ;;  %v374_v47 = vmul.f32 %v5548_v38, %v5554_v43 }
 0x1f0   :  { %v371_v48 = vpop.f32.mrf.mxu1 }
 0x1f1   :  { %v376_v49 = vadd.f32 %v375_v45, %v373_v42  ;;  %v392_v0 = vrot.slane %v390_v46, 4  ;;  %v381_v50 = vrot.slane %v374_v47, 4  ;;  %v391_v51 = vmul.f32 %v374_v47, %v5554_v43 }
 0x1f3   :  { %v377_v52 = vrot.slane %v376_v49, 2  ;;  %v393_v53 = vadd.f32 %v392_v0, %v390_v46  ;;  %v382_v54 = vadd.f32 %v381_v50, %v374_v47  ;;  %v398_v55 = vrot.slane %v391_v51, 4 }
 0x1f5   :  { %v378_v56 = vadd.f32 %v377_v52, %v376_v49  ;;  %v394_v57 = vrot.slane %v393_v53, 2  ;;  %v383_v58 = vrot.slane %v382_v54, 2  ;;  %v399_v59 = vadd.f32 %v398_v55, %v391_v51 }
 0x1f7   :  { %v379_v60 = vrot.slane %v378_v56, 1  ;;  %v395_v61 = vadd.f32 %v394_v57, %v393_v53  ;;  %v384_v62 = vadd.f32 %v383_v58, %v382_v54  ;;  %v400_v63 = vrot.slane %v399_v59, 2  ;;  %v1349_v57 = vld [vmem:[#allocation10 + $0x5c0] sm:$0xff] }
 0x1f8   :  { %v1353_v58 = vld [vmem:[#allocation10 + $0x5e0] sm:$0xff] }
 0x1f9   :  { %v380_v1 = vadd.f32 %v379_v60, %v378_v56  ;;  %v396_v2 = vrot.slane %v395_v61, 1  ;;  %v385_v3 = vrot.slane %v384_v62, 1  ;;  %v401_v4 = vadd.f32 %v400_v63, %v399_v59  ;;  %v1221_v56 = vld [vmem:[#allocation10 + $0x1c0] sm:$0xff] }
 0x1fa   :  { %v4695_v60 = vcombine.low %v1349_v57, %v1353_v58  ;;  %v1217_v63 = vld [vmem:[#allocation10 + $0x1a0] sm:$0xff] }
 0x1fb   :  { %v388_v5 = vmul.f32 0.25, %v380_v1  ;;  %v397_v6 = vadd.f32 %v396_v2, %v395_v61  ;;  %v386_v7 = vadd.f32 %v385_v3, %v384_v62  ;;  %v402_v8 = vrot.slane %v401_v4, 1  ;;  %v1213_v62 = vld [vmem:[#allocation10 + $0x180] sm:$0xff] }
 0x1fc   :  { %v4696_v61 = vcombine.high %v1349_v57, %v1353_v58  ;;  %v1341_v1 = vld [vmem:[#allocation10 + $0x580] sm:$0xff]  ;;  %v4560_v2 = vcombine.high %v1213_v62, %v1217_v63 }
 0x1fd   :  { %v404_v9 = vmul.f32 0.25, %v397_v6  ;;  %v406_v10 = vmul.f32 %v388_v5, %v388_v5  ;;  %v389_v11 = vmul.f32 0.25, %v386_v7  ;;  %v403_v12 = vadd.f32 %v402_v8, %v401_v4  ;;  %v1345_v3 = vld [vmem:[#allocation10 + $0x5a0] sm:$0xff] }
 0x1fe   :  { %2784 = vmatprep.subr.bf16.mxu1 %v4696_v61  ;;  %v4559_v4 = vcombine.low %v1213_v62, %v1217_v63  ;;  %v4688_v6 = vcombine.high %v1341_v1, %v1345_v3  ;;  %v1205_v7 = vld [vmem:[#allocation10 + $0x140] sm:$0xff] }
 0x1ff   :  { %v408_v13 = vsub.f32 %v404_v9, %v406_v10  ;;  %v405_v14 = vmul.f32 0.25, %v403_v12  ;;  %v407_v15 = vmul.f32 %v389_v11, %v389_v11  ;;  %v1209_v8 = vld [vmem:[#allocation10 + $0x160] sm:$0xff] }
 0x200   :  { %v1333_v9 = vld [vmem:[#allocation10 + $0x540] sm:$0xff]  ;;  %v4552_v10 = vcombine.high %v1205_v7, %v1209_v8  ;;  %v4551_v12 = vcombine.low %v1205_v7, %v1209_v8 }
 0x201   :  { %v410_v16 = vadd.f32 0.8, %v408_v13  ;;  %v409_v17 = vsub.f32 %v405_v14, %v407_v15  ;;  %v1197_v15 = vld [vmem:[#allocation10 + $0x100] sm:$0xff] }
 0x202   :  { %v1413_v61 = vld [vmem:[#allocation10 + $0x7c0] sm:$0xff] }
 0x203   :  { %5241 = vrsqrt.f32 %v410_v16  ;;  %v411_v18 = vadd.f32 0.8, %v409_v17  ;;  %v1201_v16 = vld [vmem:[#allocation10 + $0x120] sm:$0xff] }
 0x204   :  { %v1325_v17 = vld [vmem:[#allocation10 + $0x500] sm:$0xff] }
 0x205   :  { %5243 = vrsqrt.f32 %v411_v18  ;;  %v4544_v18 = vcombine.high %v1197_v15, %v1201_v16  ;;  %v4671_v21 = vcombine.low %v1325_v17, %v1329_v19  ;;  %v4672_v22 = vcombine.high %v1325_v17, %v1329_v19  ;;  %v1417_v63 = vld [vmem:[#allocation10 + $0x7e0] sm:$0xff] }
 0x206   :  { %v1409_v8 = vld [vmem:[#allocation10 + $0x7a0] sm:$0xff] }
 0x210   :  { %v5242_v24 = vpop.eup %5241 }
 0x211   :  { %v426_v25 = vmul.f32 %v5242_v24, %v419_v20  ;;  %v4543_v20 = vcombine.low %v1197_v15, %v1201_v16  ;;  %v1193_v24 = vld [vmem:[#allocation10 + $0xe0] sm:$0xff] }
 0x212   :  { %v5244_v27 = vpop.eup %5243  ;;  %v1401_v16 = vld [vmem:[#allocation10 + $0x760] sm:$0xff] }
 0x213   :  { %v427_v28 = vmul.f32 %v5244_v27, %v423_v23  ;;  %v429_v29 = vmul.f32 %v426_v25, %v388_v5  ;;  %v453_v39 = vrot.slane %v426_v25, %v5539_v33  ;;  %v4687_v5 = vcombine.low %v1341_v1, %v1345_v3  ;;  %v1189_v23 = vld [vmem:[#allocation10 + $0xc0] sm:$0xff] }
 0x214   :  { %v1317_v25 = vld [vmem:[#allocation10 + $0x4c0] sm:$0xff]  ;;  %v4536_v26 = vcombine.high %v1189_v23, %v1193_v24  ;;  %v4760_v3 = vcombine.high %v1413_v61, %v1417_v63 }
 0x215   :  { %v430_v30 = vmul.f32 %v427_v28, %v389_v11  ;;  %v457_v41 = vrot.slane %v427_v28, %v5539_v33  ;;  %v458_v45 = vmul.f32 %v453_v39, %v5550_v40  ;;  %v1225_v40 = vld [vmem:[#allocation10 + $0x1e0] sm:$0xff]  ;;  %v4535_v28 = vcombine.low %v1189_v23, %v1193_v24 }
 0x216   :  { %v4567_v59 = vcombine.low %v1221_v56, %v1225_v40  ;;  %v1337_v11 = vld [vmem:[#allocation10 + $0x560] sm:$0xff] }
 0x217   :  { %v433_v34 = vcombine.low %v429_v29, %v430_v30  ;;  %v459_v46 = vmul.f32 %v457_v41, %v5554_v43  ;;  %v4568_v43 = vcombine.high %v1221_v56, %v1225_v40  ;;  %v4679_v13 = vcombine.low %v1333_v9, %v1337_v11  ;;  %v1321_v27 = vld [vmem:[#allocation10 + $0x4e0] sm:$0xff] }
 0x218   :  { %v4680_v14 = vcombine.high %v1333_v9, %v1337_v11  ;;  %v4663_v29 = vcombine.low %v1317_v25, %v1321_v27  ;;  %v4664_v30 = vcombine.high %v1317_v25, %v1321_v27  ;;  %v1313_v41 = vld [vmem:[#allocation10 + $0x4a0] sm:$0xff] }
 0x219   :  { %v440_v36 = vrot.slane %v433_v34, %v5563_v31  ;;  %2743 = vmatprep.subr.bf16.mxu0 %v4568_v43  ;;  %v1181_v34 = vld [vmem:[#allocation10 + $0x80] sm:$0xff] }
 0x21a   :  { %v1297_v40 = vld [vmem:[#allocation10 + $0x420] sm:$0xff] }
 0x21b   :  { %v447_v42 = vrot.slane %v440_v36, %v5563_v31  ;;  %v1185_v36 = vld [vmem:[#allocation10 + $0xa0] sm:$0xff] }
 0x21c   :  { %v4528_v39 = vcombine.high %v1181_v34, %v1185_v36  ;;  %v1393_v24 = vld [vmem:[#allocation10 + $0x720] sm:$0xff] }
 0x21d   :  { %v449_v44 = vsub.f32 %v428_v37, %v447_v42  ;;  %v1309_v37 = vld [vmem:[#allocation10 + $0x480] sm:$0xff]  ;;  %v4527_v42 = vcombine.low %v1181_v34, %v1185_v36 }
 0x21e   :  { %v1381_v34 = vld [vmem:[#allocation10 + $0x6c0] sm:$0xff] }
 0x21f   :  { %v468_v47 = vrot.slane %v449_v44, %v5542_v35  ;;  %v464_v48 = vrot.slane %v449_v44, %v5539_v33  ;;  %v4655_v44 = vcombine.low %v1309_v37, %v1313_v41  ;;  %v1385_v36 = vld [vmem:[#allocation10 + $0x6e0] sm:$0xff] }
 0x221   :  { %v472_v49 = vadd.f32 %v468_v47, %v459_v46  ;;  %v471_v0 = vadd.f32 %v464_v48, %v458_v45  ;;  %v4656_v45 = vcombine.high %v1309_v37, %v1313_v41  ;;  %v1173_v46 = vld [vmem:[#allocation10 + $0x40] sm:$0xff]  ;;  %v4728_v41 = vcombine.high %v1381_v34, %v1385_v36 }
 0x222   :  { %v1177_v47 = vld [vmem:[#allocation10 + $0x60] sm:$0xff] }
 0x223   :  { %v474_v50 = vmul.f32 0.2, %v472_v49  ;;  %v473_v51 = vmul.f32 0.2, %v471_v0  ;;  %v1301_v48 = vld [vmem:[#allocation10 + $0x440] sm:$0xff] }
 0x225   :  { %v476_v52 = vmax.f32 %v472_v49, %v474_v50  ;;  %v475_v53 = vmax.f32 %v471_v0, %v473_v51  ;;  %v4520_v49 = vcombine.high %v1173_v46, %v1177_v47  ;;  %v1305_v0 = vld [vmem:[#allocation10 + $0x460] sm:$0xff]  ;;  %v4519_v50 = vcombine.low %v1173_v46, %v1177_v47 }
 0x226   :  { %v4647_v51 = vcombine.low %v1301_v48, %v1305_v0  ;;  %v1377_v47 = vld [vmem:[#allocation10 + $0x6a0] sm:$0xff] }
 0x227   :  { %v478_v54 = vpack.c.bf16 %v476_v52, %v476_v52  ;;  %v477_v55 = vpack.c.bf16 %v475_v53, %v475_v53  ;;  %v4648_v52 = vcombine.high %v1301_v48, %v1305_v0  ;;  %v1165_v53 = vld [vmem:[#allocation10] sm:$0xff] }
 0x229   :  { %917 = vmatprep.mubr.bf16.mxu0 %v478_v54  ;;  %958 = vmatprep.mubr.bf16.mxu1 %v478_v54  ;;  %v1169_v54 = vld [vmem:[#allocation10 + $0x20] sm:$0xff] }
 0x22a   :  { %918 = vmatmul.mubr.bf16.vlgmr.msra.gmra.mxu0 %v477_v55  ;;  %959 = vmatmul.mubr.bf16.vlgmr.msra.gmra.mxu1 %v477_v55  ;;  %v1293_v55 = vld [vmem:[#allocation10 + $0x400] sm:$0xff]  ;;  %v4512_v56 = vcombine.high %v1165_v53, %v1169_v54  ;;  %v4511_v57 = vcombine.low %v1165_v53, %v1169_v54 }
 0x22b   :  { %2744 = vmatpush1.bf16.msra.mxu0 %v4567_v59  ;;  %2785 = vmatpush1.bf16.msra.mxu1 %v4695_v60  ;;  %v4639_v43 = vcombine.low %v1293_v55, %v1297_v40  ;;  %v4640_v58 = vcombine.high %v1293_v55, %v1297_v40  ;;  %v1285_v59 = vld [vmem:[#allocation10 + $0x3c0] sm:$0xff] }
 0x22c   :  { %2745 = vmatprep.subr.bf16.mxu0 %v4560_v2  ;;  %2786 = vmatprep.subr.bf16.mxu1 %v4688_v6  ;;  %v1289_v60 = vld [vmem:[#allocation10 + $0x3e0] sm:$0xff]  ;;  %v4759_v2 = vcombine.low %v1413_v61, %v1417_v63 }
 0x22d   :  { %v4632_v62 = vcombine.high %v1285_v59, %v1289_v60  ;;  %v4631_v1 = vcombine.low %v1285_v59, %v1289_v60  ;;  %v1405_v6 = vld [vmem:[#allocation10 + $0x780] sm:$0xff] }
 0x22e   :  { %v4752_v11 = vcombine.high %v1405_v6, %v1409_v8  ;;  %v1369_v54 = vld [vmem:[#allocation10 + $0x660] sm:$0xff] }
 0x22f   :  { %2746 = vmatpush1.bf16.msra.mxu0 %v4559_v4  ;;  %2787 = vmatpush1.bf16.msra.mxu1 %v4687_v5  ;;  %v1277_v4 = vld [vmem:[#allocation10 + $0x380] sm:$0xff] }
 0x230   :  { %2747 = vmatprep.subr.bf16.mxu0 %v4552_v10  ;;  %2788 = vmatprep.subr.bf16.mxu1 %v4680_v14  ;;  %v1281_v5 = vld [vmem:[#allocation10 + $0x3a0] sm:$0xff]  ;;  %v4751_v10 = vcombine.low %v1405_v6, %v1409_v8 }
 0x231   :  { %v4624_v7 = vcombine.high %v1277_v4, %v1281_v5  ;;  %v4623_v9 = vcombine.low %v1277_v4, %v1281_v5  ;;  %v1397_v14 = vld [vmem:[#allocation10 + $0x740] sm:$0xff]  ;;  %v5581_v5 = vld [vmem:[#allocation10 + $0x5e8] sm:$0xff] }
 0x232   :  { %v4744_v19 = vcombine.high %v1397_v14, %v1401_v16  ;;  %v1361_v61 = vld [vmem:[#allocation10 + $0x620] sm:$0xff] }
 0x233   :  { %2748 = vmatpush1.bf16.msra.mxu0 %v4551_v12  ;;  %2789 = vmatpush1.bf16.msra.mxu1 %v4679_v13  ;;  %v1269_v12 = vld [vmem:[#allocation10 + $0x340] sm:$0xff] }
 0x234   :  { %2749 = vmatprep.subr.bf16.mxu0 %v4544_v18  ;;  %2790 = vmatprep.subr.bf16.mxu1 %v4672_v22  ;;  %v1273_v13 = vld [vmem:[#allocation10 + $0x360] sm:$0xff]  ;;  %v4743_v18 = vcombine.low %v1397_v14, %v1401_v16 }
 0x235   :  { %v4616_v15 = vcombine.high %v1269_v12, %v1273_v13  ;;  %v4615_v17 = vcombine.low %v1269_v12, %v1273_v13  ;;  %v1389_v22 = vld [vmem:[#allocation10 + $0x700] sm:$0xff] }
 0x236   :  { %v4736_v27 = vcombine.high %v1389_v22, %v1393_v24 }
 0x237   :  { %2750 = vmatpush1.bf16.msra.mxu0 %v4543_v20  ;;  %2791 = vmatpush1.bf16.msra.mxu1 %v4671_v21  ;;  %v1261_v20 = vld [vmem:[#allocation10 + $0x300] sm:$0xff] }
 0x238   :  { %2751 = vmatprep.subr.bf16.mxu0 %v4536_v26  ;;  %2792 = vmatprep.subr.bf16.mxu1 %v4664_v30  ;;  %v1265_v21 = vld [vmem:[#allocation10 + $0x320] sm:$0xff]  ;;  %v4735_v26 = vcombine.low %v1389_v22, %v1393_v24 }
 0x239   :  { %v4608_v23 = vcombine.high %v1261_v20, %v1265_v21  ;;  %v4607_v25 = vcombine.low %v1261_v20, %v1265_v21 }
 0x23b   :  { %2752 = vmatpush1.bf16.msra.mxu0 %v4535_v28  ;;  %2793 = vmatpush1.bf16.msra.mxu1 %v4663_v29  ;;  %v1253_v28 = vld [vmem:[#allocation10 + $0x2c0] sm:$0xff] }
 0x23c   :  { %2753 = vmatprep.subr.bf16.mxu0 %v4528_v39  ;;  %2794 = vmatprep.subr.bf16.mxu1 %v4656_v45  ;;  %v1257_v29 = vld [vmem:[#allocation10 + $0x2e0] sm:$0xff]  ;;  %v4727_v39 = vcombine.low %v1381_v34, %v1385_v36 }
 0x23d   :  { %v4600_v30 = vcombine.high %v1253_v28, %v1257_v29  ;;  %v4599_v37 = vcombine.low %v1253_v28, %v1257_v29  ;;  %v1373_v45 = vld [vmem:[#allocation10 + $0x680] sm:$0xff] }
 0x23e   :  { %v4720_v0 = vcombine.high %v1373_v45, %v1377_v47 }
 0x23f   :  { %2754 = vmatpush1.bf16.msra.mxu0 %v4527_v42  ;;  %2795 = vmatpush1.bf16.msra.mxu1 %v4655_v44  ;;  %v1245_v42 = vld [vmem:[#allocation10 + $0x280] sm:$0xff] }
 0x240   :  { %2755 = vmatprep.subr.bf16.mxu0 %v4520_v49  ;;  %2796 = vmatprep.subr.bf16.mxu1 %v4648_v52  ;;  %v1249_v44 = vld [vmem:[#allocation10 + $0x2a0] sm:$0xff]  ;;  %v4719_v49 = vcombine.low %v1373_v45, %v1377_v47 }
 0x241   :  { %v4592_v46 = vcombine.high %v1245_v42, %v1249_v44  ;;  %v4591_v48 = vcombine.low %v1245_v42, %v1249_v44  ;;  %v1365_v52 = vld [vmem:[#allocation10 + $0x640] sm:$0xff] }
 0x242   :  { %v4712_v40 = vcombine.high %v1365_v52, %v1369_v54 }
 0x243   :  { %2756 = vmatpush1.bf16.msra.mxu0 %v4519_v50  ;;  %2797 = vmatpush1.bf16.msra.mxu1 %v4647_v51  ;;  %v1237_v50 = vld [vmem:[#allocation10 + $0x240] sm:$0xff] }
 0x244   :  { %2757 = vmatprep.subr.bf16.mxu0 %v4512_v56  ;;  %2798 = vmatprep.subr.bf16.mxu1 %v4640_v58  ;;  %v1241_v51 = vld [vmem:[#allocation10 + $0x260] sm:$0xff]  ;;  %v4711_v56 = vcombine.low %v1365_v52, %v1369_v54 }
 0x245   :  { %v4584_v53 = vcombine.high %v1237_v50, %v1241_v51  ;;  %v4583_v55 = vcombine.low %v1237_v50, %v1241_v51  ;;  %v1357_v58 = vld [vmem:[#allocation10 + $0x600] sm:$0xff] }
 0x246   :  { %v4704_v63 = vcombine.high %v1357_v58, %v1361_v61 }
 0x247   :  { %2758 = vmatpush1.bf16.msra.mxu0 %v4511_v57  ;;  %2799 = vmatpush1.bf16.msra.mxu1 %v4639_v43  ;;  %v1229_v57 = vld [vmem:[#allocation10 + $0x200] sm:$0xff] }
 0x248   :  { %2759 = vmatprep.subr.bf16.mxu0 %v4632_v62  ;;  %2800 = vmatprep.subr.bf16.mxu1 %v4760_v3  ;;  %v1233_v43 = vld [vmem:[#allocation10 + $0x220] sm:$0xff]  ;;  %v4703_v62 = vcombine.low %v1357_v58, %v1361_v61  ;;  %v5577_v3 = vld [vmem:[#allocation10 + $0x5c8] sm:$0xff] }
 0x249   :  { %v4575_v59 = vcombine.low %v1229_v57, %v1233_v43  ;;  %v4576_v60 = vcombine.high %v1229_v57, %v1233_v43  ;;  %v4698_v8 = vcombine.high %v5577_v3, %v5581_v5 }
 0x24b   :  { %2760 = vmatpush2.bf16.msra.mxu0 %v4631_v1  ;;  %2801 = vmatpush2.bf16.msra.mxu1 %v4759_v2  ;;  %v5573_v1 = vld [vmem:[#allocation10 + $0x1c8] sm:$0xff] }
 0x24c   :  { %2761 = vmatprep.subr.bf16.mxu0 %v4624_v7  ;;  %2802 = vmatprep.subr.bf16.mxu1 %v4752_v11  ;;  %v5575_v2 = vld [vmem:[#allocation10 + $0x1e8] sm:$0xff]  ;;  %v4697_v7 = vcombine.low %v5577_v3, %v5581_v5  ;;  %v5593_v11 = vsub.s32 3, %v5536_v32 }
 0x24d   :  { %v4570_v4 = vcombine.high %v5573_v1, %v5575_v2  ;;  %v4569_v6 = vcombine.low %v5573_v1, %v5575_v2 }
 0x24f   :  { %2762 = vmatpush2.bf16.msra.mxu0 %v4623_v9  ;;  %2803 = vmatpush2.bf16.msra.mxu1 %v4751_v10  ;;  %v5590_v9 = vsub.s32 2, %v5536_v32  ;;  %v543_v10 = vld [vmem:[#allocation13 + $0x7] sm:$0xf] }
 0x250   :  { %2763 = vmatprep.subr.bf16.mxu0 %v4616_v15  ;;  %2804 = vmatprep.subr.bf16.mxu1 %v4744_v19  ;;  %v548_v12 = vrot.slane %v543_v10, %v5539_v33  ;;  %v552_v14 = vrot.slane %v543_v10, %v5542_v35  ;;  %v560_v15 = vrot.slane %v543_v10, %v5593_v11 }
 0x251   :  { %v556_v13 = vrot.slane %v543_v10, %v5590_v9 }
 0x253   :  { %2764 = vmatpush2.bf16.msra.mxu0 %v4615_v17  ;;  %2805 = vmatpush2.bf16.msra.mxu1 %v4743_v18 }
 0x254   :  { %2765 = vmatprep.subr.bf16.mxu0 %v4608_v23  ;;  %2806 = vmatprep.subr.bf16.mxu1 %v4736_v27 }
 0x257   :  { %2766 = vmatpush2.bf16.msra.mxu0 %v4607_v25  ;;  %2807 = vmatpush2.bf16.msra.mxu1 %v4735_v26 }
 0x258   :  { %2767 = vmatprep.subr.bf16.mxu0 %v4600_v30  ;;  %2808 = vmatprep.subr.bf16.mxu1 %v4728_v41 }
 0x25b   :  { %2768 = vmatpush2.bf16.msra.mxu0 %v4599_v37  ;;  %2809 = vmatpush2.bf16.msra.mxu1 %v4727_v39 }
 0x25c   :  { %2769 = vmatprep.subr.bf16.mxu0 %v4592_v46  ;;  %2810 = vmatprep.subr.bf16.mxu1 %v4720_v0 }
 0x25f   :  { %2770 = vmatpush2.bf16.msra.mxu0 %v4591_v48  ;;  %2811 = vmatpush2.bf16.msra.mxu1 %v4719_v49 }
 0x260   :  { %2771 = vmatprep.subr.bf16.mxu0 %v4584_v53  ;;  %2812 = vmatprep.subr.bf16.mxu1 %v4712_v40 }
 0x263   :  { %2772 = vmatpush2.bf16.msra.mxu0 %v4583_v55  ;;  %2813 = vmatpush2.bf16.msra.mxu1 %v4711_v56 }
 0x264   :  { %2773 = vmatprep.subr.bf16.mxu0 %v4576_v60  ;;  %2814 = vmatprep.subr.bf16.mxu1 %v4704_v63 }
 0x267   :  { %2774 = vmatpush2.bf16.msra.mxu0 %v4575_v59  ;;  %2815 = vmatpush2.bf16.msra.mxu1 %v4703_v62 }
 0x268   :  { %2825 = vmatprep.subr.bf16.mxu0 %v4570_v4  ;;  %2866 = vmatprep.subr.bf16.mxu1 %v4698_v8 }
 0x2ea   :  { %v919_v16 = vpop.f32.mrf.mxu0  ;;  %v960_v17 = vpop.f32.mrf.mxu1 }
 0x2eb   :  { %v5599_v18 = vadd.f32 %v919_v16, %v548_v12  ;;  %v5601_v19 = vadd.f32 %v960_v17, %v556_v13 }
 0x2ec   :  { %v921_v20 = vpop.f32.mrf.mxu0  ;;  %v962_v21 = vpop.f32.mrf.mxu1 }
 0x2ed   :  { %v967_v22 = vmul.f32 %v5548_v38, %v5599_v18  ;;  %v969_v23 = vmul.f32 %v5548_v38, %v5601_v19  ;;  %v5607_v24 = vadd.f32 %v921_v20, %v552_v14  ;;  %v5609_v25 = vadd.f32 %v962_v21, %v560_v15 }
 0x2ee   :  { %v923_v26 = vpop.f32.mrf.mxu0  ;;  %v964_v27 = vpop.f32.mrf.mxu1 }
 0x2ef   :  { %v971_v28 = vrot.slane %v967_v22, 4  ;;  %v999_v29 = vmul.f32 %v967_v22, %v5599_v18  ;;  %v983_v30 = vrot.slane %v969_v23, 4  ;;  %v1001_v34 = vmul.f32 %v969_v23, %v5601_v19 }
 0x2f0   :  { %v968_v36 = vmul.f32 %v5548_v38, %v5607_v24  ;;  %v970_v37 = vmul.f32 %v5548_v38, %v5609_v25  ;;  %v924_v39 = vpop.f32.mrf.mxu0  ;;  %v965_v41 = vpop.f32.mrf.mxu1 }
 0x2f1   :  { %v972_v42 = vadd.f32 %v971_v28, %v967_v22  ;;  %v1003_v44 = vrot.slane %v999_v29, 4  ;;  %v984_v45 = vadd.f32 %v983_v30, %v969_v23  ;;  %v1015_v46 = vrot.slane %v1001_v34, 4 }
 0x2f2   :  { %v977_v47 = vrot.slane %v968_v36, 4  ;;  %v1000_v48 = vmul.f32 %v968_v36, %v5607_v24  ;;  %v989_v49 = vrot.slane %v970_v37, 4  ;;  %v1002_v0 = vmul.f32 %v970_v37, %v5609_v25 }
 0x2f3   :  { %v973_v50 = vrot.slane %v972_v42, 2  ;;  %v1004_v51 = vadd.f32 %v1003_v44, %v999_v29  ;;  %v985_v52 = vrot.slane %v984_v45, 2  ;;  %v1016_v53 = vadd.f32 %v1015_v46, %v1001_v34 }
 0x2f4   :  { %v978_v54 = vadd.f32 %v977_v47, %v968_v36  ;;  %v1009_v55 = vrot.slane %v1000_v48, 4  ;;  %v990_v56 = vadd.f32 %v989_v49, %v970_v37  ;;  %v1021_v40 = vrot.slane %v1002_v0, 4 }
 0x2f5   :  { %v974_v57 = vadd.f32 %v973_v50, %v972_v42  ;;  %v1005_v43 = vrot.slane %v1004_v51, 2  ;;  %v986_v58 = vadd.f32 %v985_v52, %v984_v45  ;;  %v1017_v59 = vrot.slane %v1016_v53, 2 }
 0x2f6   :  { %v979_v60 = vrot.slane %v978_v54, 2  ;;  %v1010_v61 = vadd.f32 %v1009_v55, %v1000_v48  ;;  %v991_v62 = vrot.slane %v990_v56, 2  ;;  %v1022_v63 = vadd.f32 %v1021_v40, %v1002_v0 }
 0x2f7   :  { %v975_v4 = vrot.slane %v974_v57, 1  ;;  %v1006_v8 = vadd.f32 %v1005_v43, %v1004_v51  ;;  %v987_v10 = vrot.slane %v986_v58, 1  ;;  %v1018_v12 = vadd.f32 %v1017_v59, %v1016_v53 }
 0x2f8   :  { %v980_v13 = vadd.f32 %v979_v60, %v978_v54  ;;  %v1011_v14 = vrot.slane %v1010_v61, 2  ;;  %v992_v15 = vadd.f32 %v991_v62, %v990_v56  ;;  %v1023_v16 = vrot.slane %v1022_v63, 2 }
 0x2f9   :  { %v976_v17 = vadd.f32 %v975_v4, %v974_v57  ;;  %v1007_v20 = vrot.slane %v1006_v8, 1  ;;  %v988_v21 = vadd.f32 %v987_v10, %v986_v58  ;;  %v1019_v22 = vrot.slane %v1018_v12, 1 }
 0x2fa   :  { %v981_v23 = vrot.slane %v980_v13, 1  ;;  %v1012_v26 = vadd.f32 %v1011_v14, %v1010_v61  ;;  %v993_v27 = vrot.slane %v992_v15, 1  ;;  %v1024_v28 = vadd.f32 %v1023_v16, %v1022_v63  ;;  %v1047_v61 = vld [vmem:[#allocation13 + $0xb] sm:$0xf] }
 0x2fb   :  { %v995_v29 = vmul.f32 0.25, %v976_v17  ;;  %v1008_v30 = vadd.f32 %v1007_v20, %v1006_v8  ;;  %v997_v34 = vmul.f32 0.25, %v988_v21  ;;  %v1020_v36 = vadd.f32 %v1019_v22, %v1018_v12 }
 0x2fc   :  { %v982_v37 = vadd.f32 %v981_v23, %v980_v13  ;;  %v1013_v39 = vrot.slane %v1012_v26, 1  ;;  %v994_v41 = vadd.f32 %v993_v27, %v992_v15  ;;  %v1025_v42 = vrot.slane %v1024_v28, 1 }
 0x2fd   :  { %v1027_v44 = vmul.f32 0.25, %v1008_v30  ;;  %v1031_v45 = vmul.f32 %v995_v29, %v995_v29  ;;  %v1029_v46 = vmul.f32 0.25, %v1020_v36  ;;  %v1033_v47 = vmul.f32 %v997_v34, %v997_v34 }
 0x2fe   :  { %v996_v48 = vmul.f32 0.25, %v982_v37  ;;  %v1014_v49 = vadd.f32 %v1013_v39, %v1012_v26  ;;  %v998_v0 = vmul.f32 0.25, %v994_v41  ;;  %v1026_v50 = vadd.f32 %v1025_v42, %v1024_v28 }
 0x2ff   :  { %v1035_v51 = vsub.f32 %v1027_v44, %v1031_v45  ;;  %v1037_v52 = vsub.f32 %v1029_v46, %v1033_v47  ;;  %v1052_v62 = vrot.slane %v1047_v61, %v5539_v33  ;;  %v1060_v63 = vrot.slane %v1047_v61, %v5590_v9  ;;  %v1073_v44 = vld [vmem:[#allocation13 + $0xf] sm:$0xf] }
 0x300   :  { %v1028_v53 = vmul.f32 0.25, %v1014_v49  ;;  %v1032_v54 = vmul.f32 %v996_v48, %v996_v48  ;;  %v1030_v55 = vmul.f32 0.25, %v1026_v50  ;;  %v1034_v56 = vmul.f32 %v998_v0, %v998_v0 }
 0x301   :  { %v1039_v40 = vadd.f32 0.8, %v1035_v51  ;;  %v1041_v57 = vadd.f32 0.8, %v1037_v52  ;;  %v1056_v8 = vrot.slane %v1047_v61, %v5542_v35  ;;  %v1064_v12 = vrot.slane %v1047_v61, %v5593_v11  ;;  %v1342_v61 = vld [vmem:[#allocation10 + $0x588] sm:$0xff] }
 0x302   :  { %v1036_v43 = vsub.f32 %v1028_v53, %v1032_v54  ;;  %v1038_v58 = vsub.f32 %v1030_v55, %v1034_v56 }
 0x303   :  { %5245 = vrsqrt.f32 %v1039_v40 }
 0x304   :  { %5247 = vrsqrt.f32 %v1041_v57  ;;  %v1040_v59 = vadd.f32 0.8, %v1036_v43  ;;  %v1042_v60 = vadd.f32 0.8, %v1038_v58 }
 0x306   :  { %5249 = vrsqrt.f32 %v1040_v59 }
 0x307   :  { %5251 = vrsqrt.f32 %v1042_v60  ;;  %v1218_v60 = vld [vmem:[#allocation10 + $0x1a8] sm:$0xff] }
 0x310   :  { %v5246_v4 = vpop.eup %5245 }
 0x311   :  { %v5248_v10 = vpop.eup %5247  ;;  %v1069_v13 = vmul.f32 %v5246_v4, %v1052_v62  ;;  %v1346_v62 = vld [vmem:[#allocation10 + $0x5a8] sm:$0xff] }
 0x312   :  { %v1071_v15 = vmul.f32 %v5248_v10, %v1060_v63 }
 0x313   :  { %v5250_v14 = vpop.eup %5249  ;;  %v1074_v21 = vmul.f32 %v1069_v13, %v995_v29  ;;  %v1111_v39 = vrot.slane %v1069_v13, %v5539_v33 }
 0x314   :  { %v5252_v16 = vpop.eup %5251  ;;  %v1070_v17 = vmul.f32 %v5250_v14, %v1056_v8  ;;  %v1076_v23 = vmul.f32 %v1071_v15, %v997_v34  ;;  %v1119_v41 = vrot.slane %v1071_v15, %v5539_v33  ;;  %v4690_v14 = vcombine.high %v1342_v61, %v1346_v62  ;;  %v1210_v15 = vld [vmem:[#allocation10 + $0x168] sm:$0xff] }
 0x315   :  { %v1072_v20 = vmul.f32 %v5252_v16, %v1064_v12  ;;  %v1124_v46 = vmul.f32 %v1111_v39, %v5599_v18  ;;  %v1206_v12 = vld [vmem:[#allocation10 + $0x148] sm:$0xff] }
 0x316   :  { %v1075_v22 = vmul.f32 %v1070_v17, %v996_v48  ;;  %v1115_v42 = vrot.slane %v1070_v17, %v5539_v33  ;;  %v1126_v47 = vmul.f32 %v1119_v41, %v5601_v19  ;;  %v1334_v16 = vld [vmem:[#allocation10 + $0x548] sm:$0xff]  ;;  %v4553_v1 = vcombine.low %v1206_v12, %v1210_v15 }
 0x317   :  { %v1077_v26 = vmul.f32 %v1072_v20, %v998_v0  ;;  %v1123_v45 = vrot.slane %v1072_v20, %v5539_v33  ;;  %v1338_v17 = vld [vmem:[#allocation10 + $0x568] sm:$0xff] }
 0x318   :  { %v1082_v27 = vcombine.low %v1074_v21, %v1075_v22  ;;  %v1125_v48 = vmul.f32 %v1115_v42, %v5607_v24  ;;  %v4689_v21 = vcombine.low %v1342_v61, %v1346_v62  ;;  %v4554_v22 = vcombine.high %v1206_v12, %v1210_v15  ;;  %v1290_v61 = vld [vmem:[#allocation10 + $0x3e8] sm:$0xff] }
 0x319   :  { %v1083_v28 = vcombine.low %v1076_v23, %v1077_v26  ;;  %v1127_v49 = vmul.f32 %v1123_v45, %v5609_v25  ;;  %v1214_v25 = vld [vmem:[#allocation10 + $0x188] sm:$0xff]  ;;  %v4682_v23 = vcombine.high %v1334_v16, %v1338_v17  ;;  %v4681_v2 = vcombine.low %v1334_v16, %v1338_v17 }
 0x31a   :  { %v1090_v30 = vrot.slane %v1082_v27, %v5563_v31  ;;  %v4562_v13 = vcombine.high %v1214_v25, %v1218_v60  ;;  %v4561_v20 = vcombine.low %v1214_v25, %v1218_v60  ;;  %v1198_v26 = vld [vmem:[#allocation10 + $0x108] sm:$0xff] }
 0x31b   :  { %v1097_v36 = vrot.slane %v1083_v28, %v5563_v31  ;;  %v1202_v27 = vld [vmem:[#allocation10 + $0x128] sm:$0xff] }
 0x31c   :  { %v1326_v28 = vld [vmem:[#allocation10 + $0x508] sm:$0xff]  ;;  %v4546_v3 = vcombine.high %v1198_v26, %v1202_v27  ;;  %v4545_v39 = vcombine.low %v1198_v26, %v1202_v27 }
 0x31d   :  { %v1098_v37 = vcombine.low %v1090_v30, %v1097_v36  ;;  %v1330_v30 = vld [vmem:[#allocation10 + $0x528] sm:$0xff] }
 0x31e   :  { %v4674_v5 = vcombine.high %v1326_v28, %v1330_v30  ;;  %v1318_v36 = vld [vmem:[#allocation10 + $0x4c8] sm:$0xff]  ;;  %v4673_v41 = vcombine.low %v1326_v28, %v1330_v30 }
 0x31f   :  { %v1105_v29 = vrot.slane %v1098_v37, %v5563_v31  ;;  %v1322_v37 = vld [vmem:[#allocation10 + $0x4e8] sm:$0xff] }
 0x320   :  { %v1182_v45 = vld [vmem:[#allocation10 + $0x88] sm:$0xff] }
 0x321   :  { %v1107_v34 = vsub.f32 %v1073_v44, %v1105_v29  ;;  %v4666_v44 = vcombine.high %v1318_v36, %v1322_v37  ;;  %v1186_v29 = vld [vmem:[#allocation10 + $0xa8] sm:$0xff] }
 0x322   :  { %v1286_v60 = vld [vmem:[#allocation10 + $0x3c8] sm:$0xff] }
 0x323   :  { %v1144_v0 = vrot.slane %v1107_v34, %v5593_v11  ;;  %v1136_v50 = vrot.slane %v1107_v34, %v5542_v35  ;;  %v1132_v51 = vrot.slane %v1107_v34, %v5539_v33  ;;  %v1140_v52 = vrot.slane %v1107_v34, %v5590_v9  ;;  %v1310_v34 = vld [vmem:[#allocation10 + $0x488] sm:$0xff] }
 0x324   :  { %v1414_v62 = vld [vmem:[#allocation10 + $0x7c8] sm:$0xff]  ;;  %v4634_v15 = vcombine.high %v1286_v60, %v1290_v61 }
 0x325   :  { %v1152_v53 = vadd.f32 %v1144_v0, %v1127_v49  ;;  %v1150_v54 = vadd.f32 %v1136_v50, %v1125_v48  ;;  %v1149_v55 = vadd.f32 %v1132_v51, %v1124_v46  ;;  %v1151_v56 = vadd.f32 %v1140_v52, %v1126_v47  ;;  %v1314_v46 = vld [vmem:[#allocation10 + $0x4a8] sm:$0xff] }
 0x326   :  { %v4665_v48 = vcombine.low %v1318_v36, %v1322_v37  ;;  %v4530_v49 = vcombine.high %v1182_v45, %v1186_v29  ;;  %v4658_v0 = vcombine.high %v1310_v34, %v1314_v46  ;;  %v1174_v50 = vld [vmem:[#allocation10 + $0x48] sm:$0xff] }
 0x327   :  { %v1156_v40 = vmul.f32 0.2, %v1152_v53  ;;  %v1154_v18 = vmul.f32 0.2, %v1150_v54  ;;  %v1153_v57 = vmul.f32 0.2, %v1149_v55 }
 0x328   :  { %v1155_v19 = vmul.f32 0.2, %v1151_v56  ;;  %v1178_v51 = vld [vmem:[#allocation10 + $0x68] sm:$0xff] }
 0x329   :  { %v1158_v43 = vmax.f32 %v1150_v54, %v1154_v18  ;;  %v1160_v24 = vmax.f32 %v1152_v53, %v1156_v40  ;;  %v1157_v58 = vmax.f32 %v1149_v55, %v1153_v57  ;;  %v1302_v52 = vld [vmem:[#allocation10 + $0x448] sm:$0xff]  ;;  %v4529_v54 = vcombine.low %v1182_v45, %v1186_v29 }
 0x32a   :  { %v1159_v59 = vmax.f32 %v1151_v56, %v1155_v19  ;;  %v1306_v53 = vld [vmem:[#allocation10 + $0x468] sm:$0xff]  ;;  %v4657_v55 = vcombine.low %v1310_v34, %v1314_v46  ;;  %v4522_v56 = vcombine.high %v1174_v50, %v1178_v51 }
 0x32b   :  { %v5638_v63 = vpack.c.bf16 %v1158_v43, %v1158_v43  ;;  %v5640_v4 = vpack.c.bf16 %v1160_v24, %v1160_v24  ;;  %v5642_v8 = vpack.c.bf16 %v1157_v58, %v1157_v58  ;;  %v4650_v40 = vcombine.high %v1302_v52, %v1306_v53  ;;  %v1166_v18 = vld [vmem:[#allocation10 + $0x8] sm:$0xff] }
 0x32c   :  { %v5644_v10 = vpack.c.bf16 %v1159_v59, %v1159_v59  ;;  %v1170_v57 = vld [vmem:[#allocation10 + $0x28] sm:$0xff]  ;;  %v4521_v24 = vcombine.low %v1174_v50, %v1178_v51  ;;  %v4649_v58 = vcombine.low %v1302_v52, %v1306_v53 }
 0x32d   :  { %2775 = vmatprep.mubr.bf16.mxu0 %v5638_v63  ;;  %2816 = vmatprep.mubr.bf16.mxu1 %v5640_v4  ;;  %v1294_v19 = vld [vmem:[#allocation10 + $0x408] sm:$0xff]  ;;  %v4514_v25 = vcombine.high %v1166_v18, %v1170_v57 }
 0x32e   :  { %2776 = vmatmul.mubr.bf16.vlgmr.msra.gmra.mxu0 %v5642_v8  ;;  %2817 = vmatmul.mubr.bf16.vlgmr.msra.gmra.mxu1 %v5644_v10  ;;  %v1298_v43 = vld [vmem:[#allocation10 + $0x428] sm:$0xff] }
 0x32f   :  { %2826 = vmatpush1.bf16.msra.mxu0 %v4569_v6  ;;  %2867 = vmatpush1.bf16.msra.mxu1 %v4697_v7  ;;  %v1190_v6 = vld [vmem:[#allocation10 + $0xc8] sm:$0xff]  ;;  %v4642_v59 = vcombine.high %v1294_v19, %v1298_v43 }
 0x330   :  { %2857 = vmatprep.mubr.bf16.mxu0 %v5638_v63  ;;  %2898 = vmatprep.mubr.bf16.mxu1 %v5640_v4  ;;  %v1194_v7 = vld [vmem:[#allocation10 + $0xe8] sm:$0xff] }
 0x331   :  { %2827 = vmatprep.subr.bf16.mxu0 %v4562_v13  ;;  %2868 = vmatprep.subr.bf16.mxu1 %v4690_v14  ;;  %v4538_v42 = vcombine.high %v1190_v6, %v1194_v7  ;;  %v4537_v47 = vcombine.low %v1190_v6, %v1194_v7  ;;  %v1418_v12 = vld [vmem:[#allocation10 + $0x7e8] sm:$0xff]  ;;  %v4513_v13 = vcombine.low %v1166_v18, %v1170_v57 }
 0x332   :  { %v4641_v14 = vcombine.low %v1294_v19, %v1298_v43  ;;  %v4762_v16 = vcombine.high %v1414_v62, %v1418_v12  ;;  %v1278_v17 = vld [vmem:[#allocation10 + $0x388] sm:$0xff]  ;;  %v4761_v26 = vcombine.low %v1414_v62, %v1418_v12 }
 0x333   :  { %2828 = vmatpush1.bf16.msra.mxu0 %v4561_v20  ;;  %2869 = vmatpush1.bf16.msra.mxu1 %v4689_v21  ;;  %v1282_v20 = vld [vmem:[#allocation10 + $0x3a8] sm:$0xff] }
 0x334   :  { %2829 = vmatprep.subr.bf16.mxu0 %v4554_v22  ;;  %2870 = vmatprep.subr.bf16.mxu1 %v4682_v23  ;;  %v1406_v21 = vld [vmem:[#allocation10 + $0x788] sm:$0xff]  ;;  %v4633_v23 = vcombine.low %v1286_v60, %v1290_v61  ;;  %v4626_v27 = vcombine.high %v1278_v17, %v1282_v20 }
 0x335   :  { %v1410_v22 = vld [vmem:[#allocation10 + $0x7a8] sm:$0xff] }
 0x336   :  { %v4754_v28 = vcombine.high %v1406_v21, %v1410_v22  ;;  %v1270_v30 = vld [vmem:[#allocation10 + $0x348] sm:$0xff]  ;;  %v4753_v6 = vcombine.low %v1406_v21, %v1410_v22  ;;  %v1223_v22 = vld [vmem:[#allocation10 + $0x1d0] sm:$0xff] }
 0x337   :  { %2830 = vmatpush1.bf16.msra.mxu0 %v4553_v1  ;;  %2871 = vmatpush1.bf16.msra.mxu1 %v4681_v2  ;;  %v1274_v1 = vld [vmem:[#allocation10 + $0x368] sm:$0xff] }
 0x338   :  { %2831 = vmatprep.subr.bf16.mxu0 %v4546_v3  ;;  %2872 = vmatprep.subr.bf16.mxu1 %v4674_v5  ;;  %v1398_v2 = vld [vmem:[#allocation10 + $0x748] sm:$0xff]  ;;  %v4625_v5 = vcombine.low %v1278_v17, %v1282_v20  ;;  %v4618_v7 = vcombine.high %v1270_v30, %v1274_v1 }
 0x339   :  { %v1402_v3 = vld [vmem:[#allocation10 + $0x768] sm:$0xff] }
 0x33a   :  { %v4746_v36 = vcombine.high %v1398_v2, %v1402_v3  ;;  %v1262_v37 = vld [vmem:[#allocation10 + $0x308] sm:$0xff]  ;;  %v4745_v45 = vcombine.low %v1398_v2, %v1402_v3  ;;  %v1215_v3 = vld [vmem:[#allocation10 + $0x190] sm:$0xff] }
 0x33b   :  { %2832 = vmatpush1.bf16.msra.mxu0 %v4545_v39  ;;  %2873 = vmatpush1.bf16.msra.mxu1 %v4673_v41  ;;  %v1266_v39 = vld [vmem:[#allocation10 + $0x328] sm:$0xff] }
 0x33c   :  { %2833 = vmatprep.subr.bf16.mxu0 %v4538_v42  ;;  %2874 = vmatprep.subr.bf16.mxu1 %v4666_v44  ;;  %v1390_v41 = vld [vmem:[#allocation10 + $0x708] sm:$0xff]  ;;  %v4617_v44 = vcombine.low %v1270_v30, %v1274_v1  ;;  %v4610_v29 = vcombine.high %v1262_v37, %v1266_v39 }
 0x33d   :  { %v1394_v42 = vld [vmem:[#allocation10 + $0x728] sm:$0xff] }
 0x33e   :  { %v4738_v34 = vcombine.high %v1390_v41, %v1394_v42  ;;  %v1254_v46 = vld [vmem:[#allocation10 + $0x2c8] sm:$0xff]  ;;  %v4737_v50 = vcombine.low %v1390_v41, %v1394_v42  ;;  %v1207_v42 = vld [vmem:[#allocation10 + $0x150] sm:$0xff] }
 0x33f   :  { %2834 = vmatpush1.bf16.msra.mxu0 %v4537_v47  ;;  %2875 = vmatpush1.bf16.msra.mxu1 %v4665_v48  ;;  %v1258_v47 = vld [vmem:[#allocation10 + $0x2e8] sm:$0xff] }
 0x340   :  { %2835 = vmatprep.subr.bf16.mxu0 %v4530_v49  ;;  %2876 = vmatprep.subr.bf16.mxu1 %v4658_v0  ;;  %v1382_v48 = vld [vmem:[#allocation10 + $0x6c8] sm:$0xff]  ;;  %v4609_v0 = vcombine.low %v1262_v37, %v1266_v39  ;;  %v4602_v51 = vcombine.high %v1254_v46, %v1258_v47 }
 0x341   :  { %v1386_v49 = vld [vmem:[#allocation10 + $0x6e8] sm:$0xff] }
 0x342   :  { %v4730_v52 = vcombine.high %v1382_v48, %v1386_v49  ;;  %v1246_v53 = vld [vmem:[#allocation10 + $0x288] sm:$0xff]  ;;  %v4729_v18 = vcombine.low %v1382_v48, %v1386_v49  ;;  %v1199_v49 = vld [vmem:[#allocation10 + $0x110] sm:$0xff] }
 0x343   :  { %2836 = vmatpush1.bf16.msra.mxu0 %v4529_v54  ;;  %2877 = vmatpush1.bf16.msra.mxu1 %v4657_v55  ;;  %v1250_v54 = vld [vmem:[#allocation10 + $0x2a8] sm:$0xff] }
 0x344   :  { %2837 = vmatprep.subr.bf16.mxu0 %v4522_v56  ;;  %2878 = vmatprep.subr.bf16.mxu1 %v4650_v40  ;;  %v1374_v55 = vld [vmem:[#allocation10 + $0x688] sm:$0xff]  ;;  %v4601_v40 = vcombine.low %v1254_v46, %v1258_v47  ;;  %v4594_v57 = vcombine.high %v1246_v53, %v1250_v54 }
 0x345   :  { %v1378_v56 = vld [vmem:[#allocation10 + $0x6a8] sm:$0xff] }
 0x346   :  { %v4722_v19 = vcombine.high %v1374_v55, %v1378_v56  ;;  %v1238_v43 = vld [vmem:[#allocation10 + $0x248] sm:$0xff]  ;;  %v4721_v60 = vcombine.low %v1374_v55, %v1378_v56  ;;  %v1191_v56 = vld [vmem:[#allocation10 + $0xd0] sm:$0xff] }
 0x347   :  { %2838 = vmatpush1.bf16.msra.mxu0 %v4521_v24  ;;  %2879 = vmatpush1.bf16.msra.mxu1 %v4649_v58  ;;  %v1242_v24 = vld [vmem:[#allocation10 + $0x268] sm:$0xff] }
 0x348   :  { %2839 = vmatprep.subr.bf16.mxu0 %v4514_v25  ;;  %2880 = vmatprep.subr.bf16.mxu1 %v4642_v59  ;;  %v1366_v58 = vld [vmem:[#allocation10 + $0x648] sm:$0xff]  ;;  %v4593_v59 = vcombine.low %v1246_v53, %v1250_v54  ;;  %v4586_v61 = vcombine.high %v1238_v43, %v1242_v24 }
 0x349   :  { %v1370_v25 = vld [vmem:[#allocation10 + $0x668] sm:$0xff] }
 0x34a   :  { %v4714_v62 = vcombine.high %v1366_v58, %v1370_v25  ;;  %v1230_v12 = vld [vmem:[#allocation10 + $0x208] sm:$0xff]  ;;  %v4713_v17 = vcombine.low %v1366_v58, %v1370_v25  ;;  %v1183_v25 = vld [vmem:[#allocation10 + $0x90] sm:$0xff] }
 0x34b   :  { %2840 = vmatpush1.bf16.msra.mxu0 %v4513_v13  ;;  %2881 = vmatpush1.bf16.msra.mxu1 %v4641_v14  ;;  %v1234_v13 = vld [vmem:[#allocation10 + $0x228] sm:$0xff] }
 0x34c   :  { %2841 = vmatprep.subr.bf16.mxu0 %v4634_v15  ;;  %2882 = vmatprep.subr.bf16.mxu1 %v4762_v16  ;;  %v1358_v14 = vld [vmem:[#allocation10 + $0x608] sm:$0xff]  ;;  %v4585_v16 = vcombine.low %v1238_v43, %v1242_v24  ;;  %v4578_v20 = vcombine.high %v1230_v12, %v1234_v13 }
 0x34d   :  { %v1362_v15 = vld [vmem:[#allocation10 + $0x628] sm:$0xff] }
 0x34e   :  { %v4706_v21 = vcombine.high %v1358_v14, %v1362_v15  ;;  %v4705_v30 = vcombine.low %v1358_v14, %v1362_v15  ;;  %v1175_v15 = vld [vmem:[#allocation10 + $0x50] sm:$0xff] }
 0x34f   :  { %2842 = vmatpush2.bf16.msra.mxu0 %v4633_v23  ;;  %2883 = vmatpush2.bf16.msra.mxu1 %v4761_v26  ;;  %v1227_v23 = vld [vmem:[#allocation10 + $0x1f0] sm:$0xff] }
 0x350   :  { %2843 = vmatprep.subr.bf16.mxu0 %v4626_v27  ;;  %2884 = vmatprep.subr.bf16.mxu1 %v4754_v28  ;;  %v1351_v26 = vld [vmem:[#allocation10 + $0x5d0] sm:$0xff]  ;;  %v4577_v28 = vcombine.low %v1230_v12, %v1234_v13  ;;  %v4572_v1 = vcombine.high %v1223_v22, %v1227_v23 }
 0x351   :  { %v1355_v27 = vld [vmem:[#allocation10 + $0x5f0] sm:$0xff] }
 0x352   :  { %v4700_v2 = vcombine.high %v1351_v26, %v1355_v27  ;;  %v4699_v37 = vcombine.low %v1351_v26, %v1355_v27  ;;  %v1167_v27 = vld [vmem:[#allocation10 + $0x10] sm:$0xff] }
 0x353   :  { %2844 = vmatpush2.bf16.msra.mxu0 %v4625_v5  ;;  %2885 = vmatpush2.bf16.msra.mxu1 %v4753_v6  ;;  %v1219_v5 = vld [vmem:[#allocation10 + $0x1b0] sm:$0xff] }
 0x354   :  { %2845 = vmatprep.subr.bf16.mxu0 %v4618_v7  ;;  %2886 = vmatprep.subr.bf16.mxu1 %v4746_v36  ;;  %v1343_v6 = vld [vmem:[#allocation10 + $0x590] sm:$0xff]  ;;  %v4571_v36 = vcombine.low %v1223_v22, %v1227_v23  ;;  %v4564_v39 = vcombine.high %v1215_v3, %v1219_v5 }
 0x355   :  { %v1347_v7 = vld [vmem:[#allocation10 + $0x5b0] sm:$0xff] }
 0x356   :  { %v4692_v41 = vcombine.high %v1343_v6, %v1347_v7  ;;  %v4691_v46 = vcombine.low %v1343_v6, %v1347_v7  ;;  %v1287_v7 = vld [vmem:[#allocation10 + $0x3d0] sm:$0xff] }
 0x357   :  { %2846 = vmatpush2.bf16.msra.mxu0 %v4617_v44  ;;  %2887 = vmatpush2.bf16.msra.mxu1 %v4745_v45  ;;  %v1211_v44 = vld [vmem:[#allocation10 + $0x170] sm:$0xff] }
 0x358   :  { %2847 = vmatprep.subr.bf16.mxu0 %v4610_v29  ;;  %2888 = vmatprep.subr.bf16.mxu1 %v4738_v34  ;;  %v1335_v45 = vld [vmem:[#allocation10 + $0x550] sm:$0xff]  ;;  %v4563_v34 = vcombine.low %v1215_v3, %v1219_v5  ;;  %v4556_v47 = vcombine.high %v1207_v42, %v1211_v44 }
 0x359   :  { %v1339_v29 = vld [vmem:[#allocation10 + $0x570] sm:$0xff] }
 0x35a   :  { %v4684_v48 = vcombine.high %v1335_v45, %v1339_v29  ;;  %v4683_v53 = vcombine.low %v1335_v45, %v1339_v29  ;;  %v1279_v29 = vld [vmem:[#allocation10 + $0x390] sm:$0xff] }
 0x35b   :  { %2848 = vmatpush2.bf16.msra.mxu0 %v4609_v0  ;;  %2889 = vmatpush2.bf16.msra.mxu1 %v4737_v50  ;;  %v1203_v0 = vld [vmem:[#allocation10 + $0x130] sm:$0xff] }
 0x35c   :  { %2849 = vmatprep.subr.bf16.mxu0 %v4602_v51  ;;  %2890 = vmatprep.subr.bf16.mxu1 %v4730_v52  ;;  %v1327_v50 = vld [vmem:[#allocation10 + $0x510] sm:$0xff]  ;;  %v4555_v52 = vcombine.low %v1207_v42, %v1211_v44  ;;  %v4548_v54 = vcombine.high %v1199_v49, %v1203_v0 }
 0x35d   :  { %v1331_v51 = vld [vmem:[#allocation10 + $0x530] sm:$0xff] }
 0x35e   :  { %v4676_v55 = vcombine.high %v1327_v50, %v1331_v51  ;;  %v4675_v43 = vcombine.low %v1327_v50, %v1331_v51  ;;  %v1271_v51 = vld [vmem:[#allocation10 + $0x350] sm:$0xff] }
 0x35f   :  { %2850 = vmatpush2.bf16.msra.mxu0 %v4601_v40  ;;  %2891 = vmatpush2.bf16.msra.mxu1 %v4729_v18  ;;  %v1195_v40 = vld [vmem:[#allocation10 + $0xf0] sm:$0xff] }
 0x360   :  { %2851 = vmatprep.subr.bf16.mxu0 %v4594_v57  ;;  %2892 = vmatprep.subr.bf16.mxu1 %v4722_v19  ;;  %v1319_v18 = vld [vmem:[#allocation10 + $0x4d0] sm:$0xff]  ;;  %v4547_v19 = vcombine.low %v1199_v49, %v1203_v0  ;;  %v4540_v24 = vcombine.high %v1191_v56, %v1195_v40 }
 0x361   :  { %v1323_v57 = vld [vmem:[#allocation10 + $0x4f0] sm:$0xff] }
 0x362   :  { %v4668_v58 = vcombine.high %v1319_v18, %v1323_v57  ;;  %v4667_v12 = vcombine.low %v1319_v18, %v1323_v57  ;;  %v1263_v57 = vld [vmem:[#allocation10 + $0x310] sm:$0xff] }
 0x363   :  { %2852 = vmatpush2.bf16.msra.mxu0 %v4593_v59  ;;  %2893 = vmatpush2.bf16.msra.mxu1 %v4721_v60  ;;  %v1187_v59 = vld [vmem:[#allocation10 + $0xb0] sm:$0xff] }
 0x364   :  { %2853 = vmatprep.subr.bf16.mxu0 %v4586_v61  ;;  %2894 = vmatprep.subr.bf16.mxu1 %v4714_v62  ;;  %v1311_v60 = vld [vmem:[#allocation10 + $0x490] sm:$0xff]  ;;  %v4539_v62 = vcombine.low %v1191_v56, %v1195_v40  ;;  %v4532_v13 = vcombine.high %v1183_v25, %v1187_v59 }
 0x365   :  { %v1315_v61 = vld [vmem:[#allocation10 + $0x4b0] sm:$0xff] }
 0x366   :  { %v4660_v14 = vcombine.high %v1311_v60, %v1315_v61  ;;  %v4659_v22 = vcombine.low %v1311_v60, %v1315_v61  ;;  %v1255_v61 = vld [vmem:[#allocation10 + $0x2d0] sm:$0xff] }
 0x367   :  { %2854 = vmatpush2.bf16.msra.mxu0 %v4585_v16  ;;  %2895 = vmatpush2.bf16.msra.mxu1 %v4713_v17  ;;  %v1179_v16 = vld [vmem:[#allocation10 + $0x70] sm:$0xff] }
 0x368   :  { %2855 = vmatprep.subr.bf16.mxu0 %v4578_v20  ;;  %2896 = vmatprep.subr.bf16.mxu1 %v4706_v21  ;;  %v1303_v17 = vld [vmem:[#allocation10 + $0x450] sm:$0xff]  ;;  %v4531_v21 = vcombine.low %v1183_v25, %v1187_v59  ;;  %v4524_v23 = vcombine.high %v1175_v15, %v1179_v16 }
 0x369   :  { %v1307_v20 = vld [vmem:[#allocation10 + $0x470] sm:$0xff] }
 0x36a   :  { %v4652_v26 = vcombine.high %v1303_v17, %v1307_v20  ;;  %v4651_v3 = vcombine.low %v1303_v17, %v1307_v20  ;;  %v1247_v20 = vld [vmem:[#allocation10 + $0x290] sm:$0xff] }
 0x36b   :  { %2856 = vmatpush2.bf16.msra.mxu0 %v4577_v28  ;;  %2897 = vmatpush2.bf16.msra.mxu1 %v4705_v30  ;;  %v1171_v28 = vld [vmem:[#allocation10 + $0x30] sm:$0xff] }
 0x36c   :  { %2907 = vmatprep.subr.bf16.mxu0 %v4572_v1  ;;  %2948 = vmatprep.subr.bf16.mxu1 %v4700_v2  ;;  %v1295_v30 = vld [vmem:[#allocation10 + $0x410] sm:$0xff]  ;;  %v4523_v2 = vcombine.low %v1175_v15, %v1179_v16  ;;  %v4516_v5 = vcombine.high %v1167_v27, %v1171_v28 }
 0x36d   :  { %v1299_v1 = vld [vmem:[#allocation10 + $0x430] sm:$0xff] }
 0x36e   :  { %2858 = vmatmul.mubr.bf16.vlgmr.msra.gmra.mxu0 %v5642_v8  ;;  %2899 = vmatmul.mubr.bf16.vlgmr.msra.gmra.mxu1 %v5644_v10  ;;  %v4644_v6 = vcombine.high %v1295_v30, %v1299_v1  ;;  %v4643_v42 = vcombine.low %v1295_v30, %v1299_v1  ;;  %v1239_v1 = vld [vmem:[#allocation10 + $0x250] sm:$0xff] }
 0x36f   :  { %2908 = vmatpush1.bf16.msra.mxu0 %v4571_v36  ;;  %2939 = vmatprep.mubr.bf16.mxu0 %v5638_v63  ;;  %v1291_v36 = vld [vmem:[#allocation10 + $0x3f0] sm:$0xff] }
 0x370   :  { %2949 = vmatpush1.bf16.msra.mxu1 %v4699_v37  ;;  %2980 = vmatprep.mubr.bf16.mxu1 %v5640_v4  ;;  %v1415_v37 = vld [vmem:[#allocation10 + $0x7d0] sm:$0xff]  ;;  %v4636_v44 = vcombine.high %v1287_v7, %v1291_v36 }
 0x371   :  { %2909 = vmatprep.subr.bf16.mxu0 %v4564_v39  ;;  %2950 = vmatprep.subr.bf16.mxu1 %v4692_v41  ;;  %v1419_v39 = vld [vmem:[#allocation10 + $0x7f0] sm:$0xff]  ;;  %v4515_v41 = vcombine.low %v1167_v27, %v1171_v28 }
 0x372   :  { %v4764_v45 = vcombine.high %v1415_v37, %v1419_v39  ;;  %v4763_v49 = vcombine.low %v1415_v37, %v1419_v39  ;;  %v1231_v39 = vld [vmem:[#allocation10 + $0x210] sm:$0xff] }
 0x373   :  { %2910 = vmatpush1.bf16.msra.mxu0 %v4563_v34  ;;  %v1283_v34 = vld [vmem:[#allocation10 + $0x3b0] sm:$0xff] }
 0x374   :  { %2951 = vmatpush1.bf16.msra.mxu1 %v4691_v46  ;;  %2911 = vmatprep.subr.bf16.mxu0 %v4556_v47  ;;  %v1407_v46 = vld [vmem:[#allocation10 + $0x790] sm:$0xff]  ;;  %v4628_v0 = vcombine.high %v1279_v29, %v1283_v34 }
 0x375   :  { %2952 = vmatprep.subr.bf16.mxu1 %v4684_v48  ;;  %v1411_v47 = vld [vmem:[#allocation10 + $0x7b0] sm:$0xff]  ;;  %v4635_v48 = vcombine.low %v1287_v7, %v1291_v36 }
 0x376   :  { %v4756_v50 = vcombine.high %v1407_v46, %v1411_v47  ;;  %v4755_v56 = vcombine.low %v1407_v46, %v1411_v47  ;;  %v1224_v47 = vld [vmem:[#allocation10 + $0x1d8] sm:$0xff] }
 0x377   :  { %2912 = vmatpush1.bf16.msra.mxu0 %v4555_v52  ;;  %v1275_v52 = vld [vmem:[#allocation10 + $0x370] sm:$0xff] }
 0x378   :  { %2953 = vmatpush1.bf16.msra.mxu1 %v4683_v53  ;;  %2913 = vmatprep.subr.bf16.mxu0 %v4548_v54  ;;  %v1399_v53 = vld [vmem:[#allocation10 + $0x750] sm:$0xff]  ;;  %v4620_v40 = vcombine.high %v1271_v51, %v1275_v52 }
 0x379   :  { %2954 = vmatprep.subr.bf16.mxu1 %v4676_v55  ;;  %v1403_v54 = vld [vmem:[#allocation10 + $0x770] sm:$0xff]  ;;  %v4627_v55 = vcombine.low %v1279_v29, %v1283_v34 }
 0x37a   :  { %v4748_v18 = vcombine.high %v1399_v53, %v1403_v54  ;;  %v4747_v25 = vcombine.low %v1399_v53, %v1403_v54  ;;  %v1216_v54 = vld [vmem:[#allocation10 + $0x198] sm:$0xff] }
 0x37b   :  { %2914 = vmatpush1.bf16.msra.mxu0 %v4547_v19  ;;  %v1267_v19 = vld [vmem:[#allocation10 + $0x330] sm:$0xff] }
 0x37c   :  { %2955 = vmatpush1.bf16.msra.mxu1 %v4675_v43  ;;  %2915 = vmatprep.subr.bf16.mxu0 %v4540_v24  ;;  %v1391_v43 = vld [vmem:[#allocation10 + $0x710] sm:$0xff]  ;;  %v4612_v59 = vcombine.high %v1263_v57, %v1267_v19 }
 0x37d   :  { %2956 = vmatprep.subr.bf16.mxu1 %v4668_v58  ;;  %v1395_v24 = vld [vmem:[#allocation10 + $0x730] sm:$0xff]  ;;  %v4619_v58 = vcombine.low %v1271_v51, %v1275_v52 }
 0x37e   :  { %v4740_v60 = vcombine.high %v1391_v43, %v1395_v24  ;;  %v4739_v15 = vcombine.low %v1391_v43, %v1395_v24  ;;  %v1208_v43 = vld [vmem:[#allocation10 + $0x158] sm:$0xff] }
 0x37f   :  { %2916 = vmatpush1.bf16.msra.mxu0 %v4539_v62  ;;  %v1259_v62 = vld [vmem:[#allocation10 + $0x2f0] sm:$0xff]  ;;  %v1212_v24 = vld [vmem:[#allocation10 + $0x178] sm:$0xff] }
 0x380   :  { %2957 = vmatpush1.bf16.msra.mxu1 %v4667_v12  ;;  %2917 = vmatprep.subr.bf16.mxu0 %v4532_v13  ;;  %v1383_v12 = vld [vmem:[#allocation10 + $0x6d0] sm:$0xff]  ;;  %v4604_v16 = vcombine.high %v1255_v61, %v1259_v62 }
 0x381   :  { %2958 = vmatprep.subr.bf16.mxu1 %v4660_v14  ;;  %v1387_v13 = vld [vmem:[#allocation10 + $0x6f0] sm:$0xff]  ;;  %v4611_v14 = vcombine.low %v1263_v57, %v1267_v19 }
 0x382   :  { %v4732_v17 = vcombine.high %v1383_v12, %v1387_v13  ;;  %v4731_v27 = vcombine.low %v1383_v12, %v1387_v13  ;;  %v1200_v13 = vld [vmem:[#allocation10 + $0x118] sm:$0xff] }
 0x383   :  { %2918 = vmatpush1.bf16.msra.mxu0 %v4531_v21  ;;  %v1251_v21 = vld [vmem:[#allocation10 + $0x2b0] sm:$0xff] }
 0x384   :  { %2959 = vmatpush1.bf16.msra.mxu1 %v4659_v22  ;;  %2919 = vmatprep.subr.bf16.mxu0 %v4524_v23  ;;  %v1375_v22 = vld [vmem:[#allocation10 + $0x690] sm:$0xff]  ;;  %v4596_v28 = vcombine.high %v1247_v20, %v1251_v21 }
 0x385   :  { %2960 = vmatprep.subr.bf16.mxu1 %v4652_v26  ;;  %v1379_v23 = vld [vmem:[#allocation10 + $0x6b0] sm:$0xff]  ;;  %v4603_v26 = vcombine.low %v1255_v61, %v1259_v62  ;;  %v4558_v62 = vcombine.high %v1208_v43, %v1212_v24 }
 0x386   :  { %v4724_v30 = vcombine.high %v1375_v22, %v1379_v23  ;;  %v4723_v7 = vcombine.low %v1375_v22, %v1379_v23  ;;  %v1192_v22 = vld [vmem:[#allocation10 + $0xd8] sm:$0xff] }
 0x387   :  { %2920 = vmatpush1.bf16.msra.mxu0 %v4523_v2  ;;  %v1243_v2 = vld [vmem:[#allocation10 + $0x270] sm:$0xff]  ;;  %v1196_v23 = vld [vmem:[#allocation10 + $0xf8] sm:$0xff] }
 0x388   :  { %2961 = vmatpush1.bf16.msra.mxu1 %v4651_v3  ;;  %2921 = vmatprep.subr.bf16.mxu0 %v4516_v5  ;;  %v1367_v3 = vld [vmem:[#allocation10 + $0x650] sm:$0xff]  ;;  %v4588_v36 = vcombine.high %v1239_v1, %v1243_v2 }
 0x389   :  { %2962 = vmatprep.subr.bf16.mxu1 %v4644_v6  ;;  %v1371_v5 = vld [vmem:[#allocation10 + $0x670] sm:$0xff]  ;;  %v4595_v6 = vcombine.low %v1247_v20, %v1251_v21 }
 0x38a   :  { %v4716_v37 = vcombine.high %v1367_v3, %v1371_v5  ;;  %v4715_v29 = vcombine.low %v1367_v3, %v1371_v5  ;;  %v1188_v3 = vld [vmem:[#allocation10 + $0xb8] sm:$0xff] }
 0x38b   :  { %2922 = vmatpush1.bf16.msra.mxu0 %v4515_v41  ;;  %v1235_v41 = vld [vmem:[#allocation10 + $0x230] sm:$0xff]  ;;  %v1312_v5 = vld [vmem:[#allocation10 + $0x498] sm:$0xff] }
 0x38c   :  { %2963 = vmatpush1.bf16.msra.mxu1 %v4643_v42  ;;  %2923 = vmatprep.subr.bf16.mxu0 %v4636_v44  ;;  %v1359_v42 = vld [vmem:[#allocation10 + $0x610] sm:$0xff]  ;;  %v4580_v34 = vcombine.high %v1231_v39, %v1235_v41 }
 0x38d   :  { %2964 = vmatprep.subr.bf16.mxu1 %v4764_v45  ;;  %v1363_v44 = vld [vmem:[#allocation10 + $0x630] sm:$0xff]  ;;  %v4587_v45 = vcombine.low %v1239_v1, %v1243_v2  ;;  %v1184_v2 = vld [vmem:[#allocation10 + $0x98] sm:$0xff] }
 0x38e   :  { %v4708_v46 = vcombine.high %v1359_v42, %v1363_v44  ;;  %v4707_v51 = vcombine.low %v1359_v42, %v1363_v44  ;;  %v1180_v42 = vld [vmem:[#allocation10 + $0x78] sm:$0xff] }
 0x38f   :  { %2924 = vmatpush2.bf16.msra.mxu0 %v4635_v48  ;;  %v1228_v48 = vld [vmem:[#allocation10 + $0x1f8] sm:$0xff] }
 0x390   :  { %2965 = vmatpush2.bf16.msra.mxu1 %v4763_v49  ;;  %2925 = vmatprep.subr.bf16.mxu0 %v4628_v0  ;;  %v1352_v49 = vld [vmem:[#allocation10 + $0x5d8] sm:$0xff]  ;;  %v4574_v52 = vcombine.high %v1224_v47, %v1228_v48 }
 0x391   :  { %2966 = vmatprep.subr.bf16.mxu1 %v4756_v50  ;;  %v1356_v0 = vld [vmem:[#allocation10 + $0x5f8] sm:$0xff]  ;;  %v4579_v50 = vcombine.low %v1231_v39, %v1235_v41 }
 0x392   :  { %v4702_v53 = vcombine.high %v1352_v49, %v1356_v0  ;;  %v4701_v57 = vcombine.low %v1352_v49, %v1356_v0  ;;  %v1176_v41 = vld [vmem:[#allocation10 + $0x58] sm:$0xff] }
 0x393   :  { %2926 = vmatpush2.bf16.msra.mxu0 %v4627_v55  ;;  %v1220_v55 = vld [vmem:[#allocation10 + $0x1b8] sm:$0xff] }
 0x394   :  { %2967 = vmatpush2.bf16.msra.mxu1 %v4755_v56  ;;  %2927 = vmatprep.subr.bf16.mxu0 %v4620_v40  ;;  %v4573_v56 = vcombine.low %v1224_v47, %v1228_v48  ;;  %v1344_v40 = vld [vmem:[#allocation10 + $0x598] sm:$0xff]  ;;  %v4566_v19 = vcombine.high %v1216_v54, %v1220_v55 }
 0x395   :  { %2968 = vmatprep.subr.bf16.mxu1 %v4748_v18  ;;  %v1348_v18 = vld [vmem:[#allocation10 + $0x5b8] sm:$0xff] }
 0x396   :  { %v4693_v61 = vcombine.low %v1344_v40, %v1348_v18  ;;  %v1304_v44 = vld [vmem:[#allocation10 + $0x458] sm:$0xff] }
 0x397   :  { %2928 = vmatpush2.bf16.msra.mxu0 %v4619_v58  ;;  %v4694_v58 = vcombine.high %v1344_v40, %v1348_v18  ;;  %v1168_v48 = vld [vmem:[#allocation10 + $0x18] sm:$0xff] }
 0x398   :  { %2969 = vmatpush2.bf16.msra.mxu1 %v4747_v25  ;;  %2929 = vmatprep.subr.bf16.mxu0 %v4612_v59  ;;  %v1336_v25 = vld [vmem:[#allocation10 + $0x558] sm:$0xff] }
 0x399   :  { %2970 = vmatprep.subr.bf16.mxu1 %v4740_v60  ;;  %v1340_v59 = vld [vmem:[#allocation10 + $0x578] sm:$0xff]  ;;  %v4565_v60 = vcombine.low %v1216_v54, %v1220_v55 }
 0x39a   :  { %v4686_v12 = vcombine.high %v1336_v25, %v1340_v59  ;;  %v4685_v20 = vcombine.low %v1336_v25, %v1340_v59  ;;  %v1172_v49 = vld [vmem:[#allocation10 + $0x38] sm:$0xff] }
 0x39b   :  { %2930 = vmatpush2.bf16.msra.mxu0 %v4611_v14  ;;  %v1204_v14 = vld [vmem:[#allocation10 + $0x138] sm:$0xff] }
 0x39c   :  { %2971 = vmatpush2.bf16.msra.mxu1 %v4739_v15  ;;  %2931 = vmatprep.subr.bf16.mxu0 %v4604_v16  ;;  %v1328_v15 = vld [vmem:[#allocation10 + $0x518] sm:$0xff]  ;;  %v4550_v21 = vcombine.high %v1200_v13, %v1204_v14 }
 0x39d   :  { %2972 = vmatprep.subr.bf16.mxu1 %v4732_v17  ;;  %v1332_v16 = vld [vmem:[#allocation10 + $0x538] sm:$0xff]  ;;  %v4557_v17 = vcombine.low %v1208_v43, %v1212_v24 }
 0x39e   :  { %v1296_v0 = vld [vmem:[#allocation10 + $0x418] sm:$0xff] }
 0x39f   :  { %2932 = vmatpush2.bf16.msra.mxu0 %v4603_v26  ;;  %v1320_v26 = vld [vmem:[#allocation10 + $0x4d8] sm:$0xff] }
 0x3a0   :  { %2973 = vmatpush2.bf16.msra.mxu1 %v4731_v27  ;;  %2933 = vmatprep.subr.bf16.mxu0 %v4596_v28  ;;  %v1324_v27 = vld [vmem:[#allocation10 + $0x4f8] sm:$0xff]  ;;  %v4677_v28 = vcombine.low %v1328_v15, %v1332_v16 }
 0x3a1   :  { %2974 = vmatprep.subr.bf16.mxu1 %v4724_v30  ;;  %v4542_v30 = vcombine.high %v1192_v22, %v1196_v23  ;;  %v4670_v1 = vcombine.high %v1320_v26, %v1324_v27  ;;  %v1288_v55 = vld [vmem:[#allocation10 + $0x3d8] sm:$0xff] }
 0x3a2   :  { %v1416_v40 = vld [vmem:[#allocation10 + $0x7d8] sm:$0xff] }
 0x3a3   :  { %2934 = vmatpush2.bf16.msra.mxu0 %v4595_v6  ;;  %v1316_v6 = vld [vmem:[#allocation10 + $0x4b8] sm:$0xff] }
 0x3a4   :  { %2975 = vmatpush2.bf16.msra.mxu1 %v4723_v7  ;;  %2935 = vmatprep.subr.bf16.mxu0 %v4588_v36  ;;  %v4541_v7 = vcombine.low %v1192_v22, %v1196_v23  ;;  %v4669_v36 = vcombine.low %v1320_v26, %v1324_v27  ;;  %v4662_v39 = vcombine.high %v1312_v5, %v1316_v6  ;;  %v1420_v18 = vld [vmem:[#allocation10 + $0x7f8] sm:$0xff] }
 0x3a5   :  { %2976 = vmatprep.subr.bf16.mxu1 %v4716_v37  ;;  %v4534_v37 = vcombine.high %v1184_v2, %v1188_v3  ;;  %v4766_v24 = vcombine.high %v1416_v40, %v1420_v18  ;;  %v1284_v25 = vld [vmem:[#allocation10 + $0x3b8] sm:$0xff] }
 0x3a6   :  { %v1408_v59 = vld [vmem:[#allocation10 + $0x798] sm:$0xff] }
 0x3a7   :  { %2936 = vmatpush2.bf16.msra.mxu0 %v4587_v45  ;;  %v1308_v45 = vld [vmem:[#allocation10 + $0x478] sm:$0xff] }
 0x3a8   :  { %2977 = vmatpush2.bf16.msra.mxu1 %v4715_v29  ;;  %2937 = vmatprep.subr.bf16.mxu0 %v4580_v34  ;;  %v4533_v29 = vcombine.low %v1184_v2, %v1188_v3  ;;  %v4661_v34 = vcombine.low %v1312_v5, %v1316_v6  ;;  %v4654_v47 = vcombine.high %v1304_v44, %v1308_v45  ;;  %v1264_v23 = vld [vmem:[#allocation10 + $0x318] sm:$0xff] }
 0x3a9   :  { %2978 = vmatprep.subr.bf16.mxu1 %v4708_v46  ;;  %v4526_v46 = vcombine.high %v1176_v41, %v1180_v42  ;;  %v1268_v26 = vld [vmem:[#allocation10 + $0x338] sm:$0xff] }
 0x3aa   :  { %v1392_v27 = vld [vmem:[#allocation10 + $0x718] sm:$0xff] }
 0x3ab   :  { %2938 = vmatpush2.bf16.msra.mxu0 %v4579_v50  ;;  %v1300_v50 = vld [vmem:[#allocation10 + $0x438] sm:$0xff] }
 0x3ac   :  { %2979 = vmatpush2.bf16.msra.mxu1 %v4707_v51  ;;  %2989 = vmatprep.subr.bf16.mxu0 %v4574_v52  ;;  %v4525_v51 = vcombine.low %v1176_v41, %v1180_v42  ;;  %v4653_v52 = vcombine.low %v1304_v44, %v1308_v45  ;;  %v4646_v54 = vcombine.high %v1296_v0, %v1300_v50  ;;  %v1256_v3 = vld [vmem:[#allocation10 + $0x2d8] sm:$0xff] }
 0x3ad   :  { %3030 = vmatprep.subr.bf16.mxu1 %v4702_v53  ;;  %v4518_v53 = vcombine.high %v1168_v48, %v1172_v49  ;;  %v1260_v5 = vld [vmem:[#allocation10 + $0x2f8] sm:$0xff] }
 0x3ae   :  { %2940 = vmatmul.mubr.bf16.vlgmr.msra.gmra.mxu0 %v5642_v8  ;;  %v1384_v6 = vld [vmem:[#allocation10 + $0x6d8] sm:$0xff] }
 0x3af   :  { %2981 = vmatmul.mubr.bf16.vlgmr.msra.gmra.mxu1 %v5644_v10  ;;  %2990 = vmatpush1.bf16.msra.mxu0 %v4573_v56  ;;  %v1292_v56 = vld [vmem:[#allocation10 + $0x3f8] sm:$0xff] }
 0x3b0   :  { %3021 = vmatprep.mubr.bf16.mxu0 %v5638_v63  ;;  %3031 = vmatpush1.bf16.msra.mxu1 %v4701_v57  ;;  %v4678_v63 = vcombine.high %v1328_v15, %v1332_v16  ;;  %v4517_v57 = vcombine.low %v1168_v48, %v1172_v49  ;;  %v4638_v43 = vcombine.high %v1288_v55, %v1292_v56  ;;  %v1276_v15 = vld [vmem:[#allocation10 + $0x378] sm:$0xff] }
 0x3b1   :  { %3062 = vmatprep.mubr.bf16.mxu1 %v5640_v4  ;;  %2991 = vmatprep.subr.bf16.mxu0 %v4566_v19  ;;  %v4549_v4 = vcombine.low %v1200_v13, %v1204_v14  ;;  %v4645_v19 = vcombine.low %v1296_v0, %v1300_v50  ;;  %v1272_v14 = vld [vmem:[#allocation10 + $0x358] sm:$0xff] }
 0x3b2   :  { %3032 = vmatprep.subr.bf16.mxu1 %v4694_v58  ;;  %v1280_v58 = vld [vmem:[#allocation10 + $0x398] sm:$0xff] }
 0x3b3   :  { %2992 = vmatpush1.bf16.msra.mxu0 %v4565_v60  ;;  %v1412_v60 = vld [vmem:[#allocation10 + $0x7b8] sm:$0xff] }
 0x3b4   :  { %3033 = vmatpush1.bf16.msra.mxu1 %v4693_v61  ;;  %2993 = vmatprep.subr.bf16.mxu0 %v4558_v62  ;;  %v4637_v61 = vcombine.low %v1288_v55, %v1292_v56  ;;  %v4765_v62 = vcombine.low %v1416_v40, %v1420_v18  ;;  %v4758_v13 = vcombine.high %v1408_v59, %v1412_v60  ;;  %v1400_v16 = vld [vmem:[#allocation10 + $0x758] sm:$0xff] }
 0x3b5   :  { %3034 = vmatprep.subr.bf16.mxu1 %v4686_v12  ;;  %v4630_v12 = vcombine.high %v1280_v58, %v1284_v25  ;;  %v1248_v42 = vld [vmem:[#allocation10 + $0x298] sm:$0xff] }
 0x3b6   :  { %v1252_v44 = vld [vmem:[#allocation10 + $0x2b8] sm:$0xff] }
 0x3b7   :  { %2994 = vmatpush1.bf16.msra.mxu0 %v4557_v17  ;;  %v1404_v17 = vld [vmem:[#allocation10 + $0x778] sm:$0xff] }
 0x3b8   :  { %3035 = vmatpush1.bf16.msra.mxu1 %v4685_v20  ;;  %2995 = vmatprep.subr.bf16.mxu0 %v4550_v21  ;;  %v4629_v20 = vcombine.low %v1280_v58, %v1284_v25  ;;  %v4757_v21 = vcombine.low %v1408_v59, %v1412_v60  ;;  %v4750_v22 = vcombine.high %v1400_v16, %v1404_v17  ;;  %v1376_v45 = vld [vmem:[#allocation10 + $0x698] sm:$0xff] }
 0x3b9   :  { %3036 = vmatprep.subr.bf16.mxu1 %v4678_v63  ;;  %v4622_v63 = vcombine.high %v1272_v14, %v1276_v15  ;;  %v1240_v49 = vld [vmem:[#allocation10 + $0x258] sm:$0xff] }
 0x3ba   :  { %v1244_v0 = vld [vmem:[#allocation10 + $0x278] sm:$0xff] }
 0x3bb   :  { %2996 = vmatpush1.bf16.msra.mxu0 %v4549_v4  ;;  %v1396_v4 = vld [vmem:[#allocation10 + $0x738] sm:$0xff] }
 0x3bc   :  { %3037 = vmatpush1.bf16.msra.mxu1 %v4677_v28  ;;  %2997 = vmatprep.subr.bf16.mxu0 %v4542_v30  ;;  %v4621_v28 = vcombine.low %v1272_v14, %v1276_v15  ;;  %v4749_v30 = vcombine.low %v1400_v16, %v1404_v17  ;;  %v4742_v2 = vcombine.high %v1392_v27, %v1396_v4  ;;  %v1368_v50 = vld [vmem:[#allocation10 + $0x658] sm:$0xff] }
 0x3bd   :  { %3038 = vmatprep.subr.bf16.mxu1 %v4670_v1  ;;  %v4614_v1 = vcombine.high %v1264_v23, %v1268_v26  ;;  %v1232_v56 = vld [vmem:[#allocation10 + $0x218] sm:$0xff] }
 0x3be   :  { %v1236_v40 = vld [vmem:[#allocation10 + $0x238] sm:$0xff] }
 0x3bf   :  { %2998 = vmatpush1.bf16.msra.mxu0 %v4541_v7  ;;  %v1388_v7 = vld [vmem:[#allocation10 + $0x6f8] sm:$0xff]  ;;  %v4581_v25 = vcombine.low %v1232_v56, %v1236_v40 }
 0x3c0   :  { %3039 = vmatpush1.bf16.msra.mxu1 %v4669_v36  ;;  %2999 = vmatprep.subr.bf16.mxu0 %v4534_v37  ;;  %v4613_v36 = vcombine.low %v1264_v23, %v1268_v26  ;;  %v4741_v37 = vcombine.low %v1392_v27, %v1396_v4  ;;  %v4734_v41 = vcombine.high %v1384_v6, %v1388_v7  ;;  %v1360_v18 = vld [vmem:[#allocation10 + $0x618] sm:$0xff] }
 0x3c1   :  { %3040 = vmatprep.subr.bf16.mxu1 %v4662_v39  ;;  %v4606_v39 = vcombine.high %v1256_v3, %v1260_v5  ;;  %v5666_v60 = vld [vmem:[#allocation13 + $0x13] sm:$0xff] }
 0x3c3   :  { %3000 = vmatpush1.bf16.msra.mxu0 %v4533_v29  ;;  %v1380_v29 = vld [vmem:[#allocation10 + $0x6b8] sm:$0xff] }
 0x3c4   :  { %3041 = vmatpush1.bf16.msra.mxu1 %v4661_v34  ;;  %3001 = vmatprep.subr.bf16.mxu0 %v4526_v46  ;;  %v4605_v34 = vcombine.low %v1256_v3, %v1260_v5  ;;  %v4733_v46 = vcombine.low %v1384_v6, %v1388_v7  ;;  %v4726_v48 = vcombine.high %v1376_v45, %v1380_v29 }
 0x3c5   :  { %3042 = vmatprep.subr.bf16.mxu1 %v4654_v47  ;;  %v4598_v47 = vcombine.high %v1248_v42, %v1252_v44 }
 0x3c7   :  { %3002 = vmatpush1.bf16.msra.mxu0 %v4525_v51  ;;  %v1372_v51 = vld [vmem:[#allocation10 + $0x678] sm:$0xff] }
 0x3c8   :  { %3043 = vmatpush1.bf16.msra.mxu1 %v4653_v52  ;;  %3003 = vmatprep.subr.bf16.mxu0 %v4518_v53  ;;  %v4597_v52 = vcombine.low %v1248_v42, %v1252_v44  ;;  %v4725_v53 = vcombine.low %v1376_v45, %v1380_v29  ;;  %v4718_v55 = vcombine.high %v1368_v50, %v1372_v51 }
 0x3c9   :  { %3044 = vmatprep.subr.bf16.mxu1 %v4646_v54  ;;  %v4590_v54 = vcombine.high %v1240_v49, %v1244_v0 }
 0x3cb   :  { %3004 = vmatpush1.bf16.msra.mxu0 %v4517_v57  ;;  %v1364_v57 = vld [vmem:[#allocation10 + $0x638] sm:$0xff] }
 0x3cc   :  { %3045 = vmatpush1.bf16.msra.mxu1 %v4645_v19  ;;  %3005 = vmatprep.subr.bf16.mxu0 %v4638_v43  ;;  %v4589_v19 = vcombine.low %v1240_v49, %v1244_v0  ;;  %v4717_v43 = vcombine.low %v1368_v50, %v1372_v51  ;;  %v4710_v58 = vcombine.high %v1360_v18, %v1364_v57 }
 0x3cd   :  { %3046 = vmatprep.subr.bf16.mxu1 %v4766_v24  ;;  %v4582_v24 = vcombine.high %v1232_v56, %v1236_v40  ;;  %v4709_v59 = vcombine.low %v1360_v18, %v1364_v57 }
 0x3cf   :  { %3006 = vmatpush2.bf16.msra.mxu0 %v4637_v61  ;;  %v1426_v61 = vrot.slane %v5666_v60, %v5539_v33 }
 0x3d0   :  { %3047 = vmatpush2.bf16.msra.mxu1 %v4765_v62  ;;  %3007 = vmatprep.subr.bf16.mxu0 %v4630_v12  ;;  %v1430_v62 = vrot.slane %v5666_v60, %v5542_v35 }
 0x3d1   :  { %3048 = vmatprep.subr.bf16.mxu1 %v4758_v13 }
 0x3d3   :  { %3008 = vmatpush2.bf16.msra.mxu0 %v4629_v20 }
 0x3d4   :  { %3049 = vmatpush2.bf16.msra.mxu1 %v4757_v21  ;;  %3009 = vmatprep.subr.bf16.mxu0 %v4622_v63 }
 0x3d5   :  { %3050 = vmatprep.subr.bf16.mxu1 %v4750_v22 }
 0x3d7   :  { %3010 = vmatpush2.bf16.msra.mxu0 %v4621_v28 }
 0x3d8   :  { %3051 = vmatpush2.bf16.msra.mxu1 %v4749_v30  ;;  %3011 = vmatprep.subr.bf16.mxu0 %v4614_v1 }
 0x3d9   :  { %3052 = vmatprep.subr.bf16.mxu1 %v4742_v2 }
 0x3db   :  { %3012 = vmatpush2.bf16.msra.mxu0 %v4613_v36 }
 0x3dc   :  { %3053 = vmatpush2.bf16.msra.mxu1 %v4741_v37  ;;  %3013 = vmatprep.subr.bf16.mxu0 %v4606_v39 }
 0x3dd   :  { %3054 = vmatprep.subr.bf16.mxu1 %v4734_v41 }
 0x3df   :  { %3014 = vmatpush2.bf16.msra.mxu0 %v4605_v34 }
 0x3e0   :  { %3055 = vmatpush2.bf16.msra.mxu1 %v4733_v46  ;;  %3015 = vmatprep.subr.bf16.mxu0 %v4598_v47 }
 0x3e1   :  { %3056 = vmatprep.subr.bf16.mxu1 %v4726_v48 }
 0x3e3   :  { %3016 = vmatpush2.bf16.msra.mxu0 %v4597_v52 }
 0x3e4   :  { %3057 = vmatpush2.bf16.msra.mxu1 %v4725_v53  ;;  %3017 = vmatprep.subr.bf16.mxu0 %v4590_v54 }
 0x3e5   :  { %3058 = vmatprep.subr.bf16.mxu1 %v4718_v55 }
 0x3e7   :  { %3018 = vmatpush2.bf16.msra.mxu0 %v4589_v19 }
 0x3e8   :  { %3059 = vmatpush2.bf16.msra.mxu1 %v4717_v43  ;;  %3019 = vmatprep.subr.bf16.mxu0 %v4582_v24  ;;  %v5684_v24 = vld [vmem:[#allocation13 + $0x1b] sm:$0xff] }
 0x3e9   :  { %3060 = vmatprep.subr.bf16.mxu1 %v4710_v58  ;;  %v3236_v58 = vrot.slane %v5684_v24, %v5539_v33 }
 0x3eb   :  { %3020 = vmatpush2.bf16.msra.mxu0 %v4581_v25  ;;  %v3240_v25 = vrot.slane %v5684_v24, %v5542_v35 }
 0x3ec   :  { %3061 = vmatpush2.bf16.msra.mxu1 %v4709_v59 }
 0x3ee   :  { %3022 = vmatmul.mubr.bf16.vlgmr.msra.gmra.mxu0 %v5642_v8  ;;  %v2777_v12 = vpop.f32.mrf.mxu0  ;;  %v2818_v13 = vpop.f32.mrf.mxu1 }
 0x3ef   :  { %3063 = vmatmul.mubr.bf16.vlgmr.msra.gmra.mxu1 %v5644_v10  ;;  %v2778_v14 = vadd.f32 %v2777_v12, %v1426_v61 }
 0x3f0   :  { %v2779_v15 = vpop.f32.mrf.mxu0  ;;  %v2820_v16 = vpop.f32.mrf.mxu1 }
 0x3f1   :  { %v5674_v17 = vadd.f32 %v2818_v13, %v2778_v14  ;;  %v2780_v20 = vadd.f32 %v2779_v15, %v1430_v62 }
 0x3f2   :  { %v2781_v21 = vpop.f32.mrf.mxu0  ;;  %v2822_v63 = vpop.f32.mrf.mxu1 }
 0x3f3   :  { %v3071_v22 = vmul.f32 %v5548_v38, %v5674_v17  ;;  %v5678_v23 = vadd.f32 %v2820_v16, %v2780_v20  ;;  %v1434_v16 = vrot.slane %v5666_v60, %v5590_v9  ;;  %v1438_v20 = vrot.slane %v5666_v60, %v5593_v11 }
 0x3f4   :  { %v2782_v26 = vpop.f32.mrf.mxu0  ;;  %v2823_v27 = vpop.f32.mrf.mxu1 }
 0x3f5   :  { %v3079_v8 = vrot.slane %v3071_v22, 4  ;;  %v3135_v4 = vmul.f32 %v3071_v22, %v5674_v17  ;;  %v3072_v10 = vmul.f32 %v5548_v38, %v5678_v23 }
 0x3f7   :  { %v3080_v28 = vadd.f32 %v3079_v8, %v3071_v22  ;;  %v3143_v30 = vrot.slane %v3135_v4, 4  ;;  %v3085_v1 = vrot.slane %v3072_v10, 4  ;;  %v3136_v2 = vmul.f32 %v3072_v10, %v5678_v23 }
 0x3f9   :  { %v3081_v3 = vrot.slane %v3080_v28, 2  ;;  %v3144_v5 = vadd.f32 %v3143_v30, %v3135_v4  ;;  %v3086_v6 = vadd.f32 %v3085_v1, %v3072_v10  ;;  %v3149_v7 = vrot.slane %v3136_v2, 4 }
 0x3fb   :  { %v3082_v36 = vadd.f32 %v3081_v3, %v3080_v28  ;;  %v3145_v37 = vrot.slane %v3144_v5, 2  ;;  %v3087_v39 = vrot.slane %v3086_v6, 2  ;;  %v3150_v41 = vadd.f32 %v3149_v7, %v3136_v2  ;;  %v5051_v2 = vld [vmem:[#allocation11 + $0x74] ss:$8 sps:$4 sm:$0xff]   ;;  %v5049_v7 = vld [vmem:[#allocation11 + $0x70] ss:$8 sps:$4 sm:$0xff]  }
 0x3fc   :  { %v5054_v3 = vld [vmem:[#allocation11 + $0x174] ss:$8 sps:$4 sm:$0xff]   ;;  %4242 = vmatprep.subr.bf16.mxu0 %v5051_v2 }
 0x3fd   :  { %v3083_v42 = vrot.slane %v3082_v36, 1  ;;  %v3146_v44 = vadd.f32 %v3145_v37, %v3144_v5  ;;  %v3088_v45 = vadd.f32 %v3087_v39, %v3086_v6  ;;  %v3151_v29 = vrot.slane %v3150_v41, 2  ;;  %4283 = vmatprep.subr.bf16.mxu1 %v5054_v3  ;;  %4243 = vmatpush1.bf16.msra.mxu0 %v5049_v7  ;;  %v5078_v7 = vld [vmem:[#allocation11 + $0x134] ss:$8 sps:$4 sm:$0xff]  }
 0x3ff   :  { %v3084_v34 = vadd.f32 %v3083_v42, %v3082_v36  ;;  %v3147_v46 = vrot.slane %v3146_v44, 1  ;;  %v3089_v47 = vrot.slane %v3088_v45, 1  ;;  %v3152_v48 = vadd.f32 %v3151_v29, %v3150_v41  ;;  %v5052_v36 = vld [vmem:[#allocation11 + $0x170] ss:$8 sps:$4 sm:$0xff]  }
 0x400   :  { %4284 = vmatpush1.bf16.msra.mxu1 %v5052_v36  ;;  %v5073_v36 = vld [vmem:[#allocation11 + $0x30] ss:$8 sps:$4 sm:$0xff]  }
 0x401   :  { %v3127_v49 = vmul.f32 0.25, %v3084_v34  ;;  %v3148_v0 = vadd.f32 %v3147_v46, %v3146_v44  ;;  %v3090_v50 = vadd.f32 %v3089_v47, %v3088_v45  ;;  %v3153_v51 = vrot.slane %v3152_v48, 1  ;;  %v5057_v34 = vld [vmem:[#allocation11 + $0x64] ss:$8 sps:$4 sm:$0xff]   ;;  %v5055_v47 = vld [vmem:[#allocation11 + $0x60] ss:$8 sps:$4 sm:$0xff]  }
 0x402   :  { %v5060_v46 = vld [vmem:[#allocation11 + $0x164] ss:$8 sps:$4 sm:$0xff]   ;;  %4244 = vmatprep.subr.bf16.mxu0 %v5057_v34 }
 0x403   :  { %v3191_v52 = vmul.f32 0.25, %v3148_v0  ;;  %v3199_v53 = vmul.f32 %v3127_v49, %v3127_v49  ;;  %v3128_v54 = vmul.f32 0.25, %v3090_v50  ;;  %v3154_v55 = vadd.f32 %v3153_v51, %v3152_v48  ;;  %v5058_v48 = vld [vmem:[#allocation11 + $0x160] ss:$8 sps:$4 sm:$0xff]   ;;  %4285 = vmatprep.subr.bf16.mxu1 %v5060_v46  ;;  %4245 = vmatpush1.bf16.msra.mxu0 %v5055_v47  ;;  %v5084_v34 = vld [vmem:[#allocation11 + $0x124] ss:$8 sps:$4 sm:$0xff]  }
 0x404   :  { %4286 = vmatpush1.bf16.msra.mxu1 %v5058_v48  ;;  %v5079_v46 = vld [vmem:[#allocation11 + $0x20] ss:$8 sps:$4 sm:$0xff]  }
 0x405   :  { %v3207_v56 = vsub.f32 %v3191_v52, %v3199_v53  ;;  %v3192_v40 = vmul.f32 0.25, %v3154_v55  ;;  %v3200_v18 = vmul.f32 %v3128_v54, %v3128_v54  ;;  %v5082_v47 = vld [vmem:[#allocation11 + $0x120] ss:$8 sps:$4 sm:$0xff]  }
 0x407   :  { %v3215_v57 = vadd.f32 0.8, %v3207_v56  ;;  %v3208_v19 = vsub.f32 %v3192_v40, %v3200_v18  ;;  %v5063_v56 = vld [vmem:[#allocation11 + $0x54] ss:$8 sps:$4 sm:$0xff]   ;;  %v5061_v18 = vld [vmem:[#allocation11 + $0x50] ss:$8 sps:$4 sm:$0xff]  }
 0x408   :  { %v5066_v40 = vld [vmem:[#allocation11 + $0x154] ss:$8 sps:$4 sm:$0xff]   ;;  %4246 = vmatprep.subr.bf16.mxu0 %v5063_v56  ;;  %v3244_v56 = vrot.slane %v5684_v24, %v5590_v9 }
 0x409   :  { %5253 = vrsqrt.f32 %v3215_v57  ;;  %v3216_v43 = vadd.f32 0.8, %v3208_v19  ;;  %v5064_v57 = vld [vmem:[#allocation11 + $0x150] ss:$8 sps:$4 sm:$0xff]   ;;  %4287 = vmatprep.subr.bf16.mxu1 %v5066_v40  ;;  %4247 = vmatpush1.bf16.msra.mxu0 %v5061_v18  ;;  %v5099_v40 = vld [vmem:[#allocation11 + $0xf4] ss:$8 sps:$4 sm:$0xff]  }
 0x40a   :  { %4288 = vmatpush1.bf16.msra.mxu1 %v5064_v57  ;;  %v5102_v18 = vld [vmem:[#allocation11 + $0x1f4] ss:$8 sps:$4 sm:$0xff]   ;;  %v5097_v57 = vld [vmem:[#allocation11 + $0xf0] ss:$8 sps:$4 sm:$0xff]  }
 0x40b   :  { %5255 = vrsqrt.f32 %v3216_v43 }
 0x416   :  { %v5254_v59 = vpop.eup %5253 }
 0x417   :  { %v5690_v61 = vmul.f32 %v5254_v59, %v3236_v58 }
 0x418   :  { %v5256_v62 = vpop.eup %5255 }
 0x419   :  { %v5692_v12 = vmul.f32 %v5256_v62, %v3240_v25  ;;  %v5695_v13 = vmul.f32 %v5690_v61, %v3127_v49 }
 0x41b   :  { %v5698_v14 = vmul.f32 %v5692_v12, %v3128_v54 }
 0x41d   :  { %v3298_v15 = vcombine.low %v5695_v13, %v5698_v14  ;;  %v5121_v13 = vld [vmem:[#allocation11 + $0xb0] ss:$8 sps:$4 sm:$0xff]  }
 0x41e   :  { %v5124_v14 = vld [vmem:[#allocation11 + $0x1b0] ss:$8 sps:$4 sm:$0xff]  }
 0x42e   :  { %v2859_v21 = vpop.f32.mrf.mxu0  ;;  %v2900_v63 = vpop.f32.mrf.mxu1 }
 0x42f   :  { %v2860_v22 = vadd.f32 %v2859_v21, %v1434_v16  ;;  %v5069_v21 = vld [vmem:[#allocation11 + $0x44] ss:$8 sps:$4 sm:$0xff]  }
 0x430   :  { %v2861_v26 = vpop.f32.mrf.mxu0  ;;  %v2902_v27 = vpop.f32.mrf.mxu1  ;;  %4248 = vmatprep.subr.bf16.mxu0 %v5069_v21  ;;  %v5106_v21 = vld [vmem:[#allocation11 + $0x1e0] ss:$8 sps:$4 sm:$0xff]  }
 0x431   :  { %v5706_v8 = vadd.f32 %v2900_v63, %v2860_v22  ;;  %v2862_v4 = vadd.f32 %v2861_v26, %v1438_v20  ;;  %v5072_v63 = vld [vmem:[#allocation11 + $0x144] ss:$8 sps:$4 sm:$0xff]   ;;  %v5067_v22 = vld [vmem:[#allocation11 + $0x40] ss:$8 sps:$4 sm:$0xff]  }
 0x432   :  { %v2863_v10 = vpop.f32.mrf.mxu0  ;;  %v2904_v28 = vpop.f32.mrf.mxu1  ;;  %v5070_v26 = vld [vmem:[#allocation11 + $0x140] ss:$8 sps:$4 sm:$0xff]   ;;  %4289 = vmatprep.subr.bf16.mxu1 %v5072_v63  ;;  %4249 = vmatpush1.bf16.msra.mxu0 %v5067_v22 }
 0x433   :  { %v3073_v30 = vmul.f32 %v5548_v38, %v5706_v8  ;;  %v5710_v1 = vadd.f32 %v2902_v27, %v2862_v4  ;;  %4290 = vmatpush1.bf16.msra.mxu1 %v5070_v26 }
 0x434   :  { %v2864_v5 = vpop.f32.mrf.mxu0  ;;  %v2905_v6 = vpop.f32.mrf.mxu1  ;;  %4291 = vmatprep.subr.bf16.mxu1 %v5078_v7  ;;  %v5115_v7 = vld [vmem:[#allocation11 + $0xc0] ss:$8 sps:$4 sm:$0xff]  }
 0x435   :  { %v3091_v37 = vrot.slane %v3073_v30, 4  ;;  %v3137_v39 = vmul.f32 %v3073_v30, %v5706_v8  ;;  %v3074_v41 = vmul.f32 %v5548_v38, %v5710_v1  ;;  %v5075_v6 = vld [vmem:[#allocation11 + $0x34] ss:$8 sps:$4 sm:$0xff]  }
 0x436   :  { %4250 = vmatprep.subr.bf16.mxu0 %v5075_v6  ;;  %v5120_v6 = vld [vmem:[#allocation11 + $0x1c4] ss:$8 sps:$4 sm:$0xff]  }
 0x437   :  { %v3092_v42 = vadd.f32 %v3091_v37, %v3073_v30  ;;  %v3155_v44 = vrot.slane %v3137_v39, 4  ;;  %v3097_v45 = vrot.slane %v3074_v41, 4  ;;  %v3138_v29 = vmul.f32 %v3074_v41, %v5710_v1  ;;  %v5076_v37 = vld [vmem:[#allocation11 + $0x130] ss:$8 sps:$4 sm:$0xff]   ;;  %4251 = vmatpush1.bf16.msra.mxu0 %v5073_v36  ;;  %v5118_v36 = vld [vmem:[#allocation11 + $0x1c0] ss:$8 sps:$4 sm:$0xff]  }
 0x438   :  { %4292 = vmatpush1.bf16.msra.mxu1 %v5076_v37 }
 0x439   :  { %v3093_v49 = vrot.slane %v3092_v42, 2  ;;  %v3156_v0 = vadd.f32 %v3155_v44, %v3137_v39  ;;  %v3098_v50 = vadd.f32 %v3097_v45, %v3074_v41  ;;  %v3161_v51 = vrot.slane %v3138_v29, 4  ;;  %4293 = vmatprep.subr.bf16.mxu1 %v5084_v34  ;;  %v5135_v34 = vld [vmem:[#allocation11 + $0x94] ss:$8 sps:$4 sm:$0xff]  }
 0x43b   :  { %v3094_v52 = vadd.f32 %v3093_v49, %v3092_v42  ;;  %v3157_v53 = vrot.slane %v3156_v0, 2  ;;  %v3099_v54 = vrot.slane %v3098_v50, 2  ;;  %v3162_v55 = vadd.f32 %v3161_v51, %v3138_v29  ;;  %v5081_v29 = vld [vmem:[#allocation11 + $0x24] ss:$8 sps:$4 sm:$0xff]   ;;  %v5087_v49 = vld [vmem:[#allocation11 + $0x14] ss:$8 sps:$4 sm:$0xff]  }
 0x43c   :  { %4252 = vmatprep.subr.bf16.mxu0 %v5081_v29  ;;  %4294 = vmatpush1.bf16.msra.mxu1 %v5082_v47  ;;  %v5088_v51 = vld [vmem:[#allocation11 + $0x110] ss:$8 sps:$4 sm:$0xff]   ;;  %v5132_v29 = vld [vmem:[#allocation11 + $0x1a4] ss:$8 sps:$4 sm:$0xff]   ;;  %v5138_v47 = vld [vmem:[#allocation11 + $0x194] ss:$8 sps:$4 sm:$0xff]  }
 0x43d   :  { %v3095_v19 = vrot.slane %v3094_v52, 1  ;;  %v3158_v43 = vadd.f32 %v3157_v53, %v3156_v0  ;;  %v3100_v58 = vadd.f32 %v3099_v54, %v3098_v50  ;;  %v3163_v25 = vrot.slane %v3162_v55, 2  ;;  %4253 = vmatpush1.bf16.msra.mxu0 %v5079_v46  ;;  %v5090_v0 = vld [vmem:[#allocation11 + $0x114] ss:$8 sps:$4 sm:$0xff]   ;;  %v5085_v50 = vld [vmem:[#allocation11 + $0x10] ss:$8 sps:$4 sm:$0xff]  }
 0x43e   :  { %4254 = vmatprep.subr.bf16.mxu0 %v5087_v49  ;;  %4295 = vmatprep.subr.bf16.mxu1 %v5090_v0  ;;  %v5096_v53 = vld [vmem:[#allocation11 + $0x104] ss:$8 sps:$4 sm:$0xff]   ;;  %v5091_v54 = vld [vmem:[#allocation11] ss:$8 sps:$4 sm:$0xff]   ;;  %v5751_v46 = vsub.s32 5, %v5536_v32 }
 0x43f   :  { %v3096_v59 = vadd.f32 %v3095_v19, %v3094_v52  ;;  %v3159_v62 = vrot.slane %v3158_v43, 1  ;;  %v3101_v16 = vrot.slane %v3100_v58, 1  ;;  %v3164_v20 = vadd.f32 %v3163_v25, %v3162_v55  ;;  %v5093_v52 = vld [vmem:[#allocation11 + $0x4] ss:$8 sps:$4 sm:$0xff]   ;;  %v5094_v55 = vld [vmem:[#allocation11 + $0x100] ss:$8 sps:$4 sm:$0xff]  }
 0x440   :  { %4296 = vmatpush1.bf16.msra.mxu1 %v5088_v51  ;;  %v5100_v19 = vld [vmem:[#allocation11 + $0x1f0] ss:$8 sps:$4 sm:$0xff]   ;;  %v5144_v51 = vld [vmem:[#allocation11 + $0x184] ss:$8 sps:$4 sm:$0xff]  }
 0x441   :  { %v5716_v27 = vmul.f32 0.25, %v3096_v59  ;;  %v3160_v4 = vadd.f32 %v3159_v62, %v3158_v43  ;;  %v3102_v10 = vadd.f32 %v3101_v16, %v3100_v58  ;;  %v3165_v28 = vrot.slane %v3164_v20, 1  ;;  %4255 = vmatpush1.bf16.msra.mxu0 %v5085_v50  ;;  %4297 = vmatprep.subr.bf16.mxu1 %v5096_v53  ;;  %v5105_v59 = vld [vmem:[#allocation11 + $0xe4] ss:$8 sps:$4 sm:$0xff]   ;;  %v5136_v0 = vld [vmem:[#allocation11 + $0x190] ss:$8 sps:$4 sm:$0xff]  }
 0x442   :  { %4256 = vmatprep.subr.bf16.mxu0 %v5093_v52  ;;  %v3248_v43 = vrot.slane %v5684_v24, %v5593_v11  ;;  %v5108_v62 = vld [vmem:[#allocation11 + $0x1e4] ss:$8 sps:$4 sm:$0xff]   ;;  %v1446_v52 = vrot.slane %v5666_v60, %v5751_v46 }
 0x443   :  { %v3193_v30 = vmul.f32 0.25, %v3160_v4  ;;  %v3201_v2 = vmul.f32 %v5716_v27, %v5716_v27  ;;  %v5720_v3 = vmul.f32 0.25, %v3102_v10  ;;  %v3166_v5 = vadd.f32 %v3165_v28, %v3164_v20  ;;  %v5103_v20 = vld [vmem:[#allocation11 + $0xe0] ss:$8 sps:$4 sm:$0xff]   ;;  %v5111_v4 = vld [vmem:[#allocation11 + $0xd4] ss:$8 sps:$4 sm:$0xff]  }
 0x444   :  { %4298 = vmatpush1.bf16.msra.mxu1 %v5094_v55  ;;  %v5114_v10 = vld [vmem:[#allocation11 + $0x1d4] ss:$8 sps:$4 sm:$0xff]   ;;  %v5109_v28 = vld [vmem:[#allocation11 + $0xd0] ss:$8 sps:$4 sm:$0xff]   ;;  %v5141_v50 = vld [vmem:[#allocation11 + $0x84] ss:$8 sps:$4 sm:$0xff]  }
 0x445   :  { %v3209_v39 = vsub.f32 %v3193_v30, %v3201_v2  ;;  %v3194_v41 = vmul.f32 0.25, %v3166_v5  ;;  %v3202_v42 = vmul.f32 %v5720_v3, %v5720_v3  ;;  %4257 = vmatpush1.bf16.msra.mxu0 %v5091_v54  ;;  %4299 = vmatprep.subr.bf16.mxu1 %v5102_v18  ;;  %v5112_v30 = vld [vmem:[#allocation11 + $0x1d0] ss:$8 sps:$4 sm:$0xff]   ;;  %v5740_v5 = vrot.slane %v3298_v15, %v5563_v31  ;;  %v5139_v54 = vld [vmem:[#allocation11 + $0x80] ss:$8 sps:$4 sm:$0xff]  }
 0x446   :  { %4258 = vmatprep.subr.bf16.mxu0 %v5099_v40  ;;  %v5748_v15 = vsub.s32 4, %v5536_v32  ;;  %v5142_v40 = vld [vmem:[#allocation11 + $0x180] ss:$8 sps:$4 sm:$0xff]  }
 0x447   :  { %v3217_v44 = vadd.f32 0.8, %v3209_v39  ;;  %v3210_v45 = vsub.f32 %v3194_v41, %v3202_v42  ;;  %v5123_v39 = vld [vmem:[#allocation11 + $0xb4] ss:$8 sps:$4 sm:$0xff]   ;;  %v5127_v42 = vld [vmem:[#allocation11 + $0xa0] ss:$8 sps:$4 sm:$0xff]  }
 0x448   :  { %4300 = vmatpush2.bf16.msra.mxu1 %v5100_v19  ;;  %v5126_v41 = vld [vmem:[#allocation11 + $0x1b4] ss:$8 sps:$4 sm:$0xff]   ;;  %v1442_v49 = vrot.slane %v5666_v60, %v5748_v15 }
 0x449   :  { %5257 = vrsqrt.f32 %v3217_v44  ;;  %v3218_v48 = vadd.f32 0.8, %v3210_v45  ;;  %4259 = vmatpush2.bf16.msra.mxu0 %v5097_v57  ;;  %4301 = vmatprep.subr.bf16.mxu1 %v5108_v62  ;;  %v5129_v44 = vld [vmem:[#allocation11 + $0xa4] ss:$8 sps:$4 sm:$0xff]   ;;  %v5130_v45 = vld [vmem:[#allocation11 + $0x1a0] ss:$8 sps:$4 sm:$0xff]  }
 0x44a   :  { %4260 = vmatprep.subr.bf16.mxu0 %v5105_v59 }
 0x44b   :  { %5259 = vrsqrt.f32 %v3218_v48  ;;  %v5133_v48 = vld [vmem:[#allocation11 + $0x90] ss:$8 sps:$4 sm:$0xff]  }
 0x44c   :  { %4302 = vmatpush2.bf16.msra.mxu1 %v5106_v21 }
 0x44d   :  { %4261 = vmatpush2.bf16.msra.mxu0 %v5103_v20  ;;  %4303 = vmatprep.subr.bf16.mxu1 %v5114_v10  ;;  %v5147_v20 = vld [vmem:[#allocation11 + $0x274] ss:$8 sps:$4 sm:$0xff]  }
 0x44e   :  { %4262 = vmatprep.subr.bf16.mxu0 %v5111_v4 }
 0x450   :  { %4304 = vmatpush2.bf16.msra.mxu1 %v5112_v30 }
 0x451   :  { %4263 = vmatpush2.bf16.msra.mxu0 %v5109_v28  ;;  %4305 = vmatprep.subr.bf16.mxu1 %v5120_v6 }
 0x454   :  { %4306 = vmatpush2.bf16.msra.mxu1 %v5118_v36 }
 0x455   :  { %4307 = vmatprep.subr.bf16.mxu1 %v5126_v41 }
 0x456   :  { %v5258_v58 = vpop.eup %5257 }
 0x457   :  { %v5728_v25 = vmul.f32 %v5258_v58, %v3244_v56 }
 0x458   :  { %v5260_v16 = vpop.eup %5259  ;;  %4308 = vmatpush2.bf16.msra.mxu1 %v5124_v14 }
 0x459   :  { %v5730_v63 = vmul.f32 %v5260_v16, %v3248_v43  ;;  %v3284_v22 = vmul.f32 %v5728_v25, %v5716_v27  ;;  %4309 = vmatprep.subr.bf16.mxu1 %v5132_v29 }
 0x45b   :  { %v3285_v26 = vmul.f32 %v5730_v63, %v5720_v3  ;;  %v5117_v3 = vld [vmem:[#allocation11 + $0xc4] ss:$8 sps:$4 sm:$0xff]  }
 0x45c   :  { %4264 = vmatprep.subr.bf16.mxu0 %v5117_v3  ;;  %4310 = vmatpush2.bf16.msra.mxu1 %v5130_v45 }
 0x45d   :  { %v3299_v2 = vcombine.low %v3284_v22, %v3285_v26  ;;  %4265 = vmatpush2.bf16.msra.mxu0 %v5115_v7  ;;  %4311 = vmatprep.subr.bf16.mxu1 %v5138_v47  ;;  %v5150_v22 = vld [vmem:[#allocation11 + $0x374] ss:$8 sps:$4 sm:$0xff]  }
 0x45e   :  { %4266 = vmatprep.subr.bf16.mxu0 %v5123_v39 }
 0x45f   :  { %v5743_v27 = vrot.slane %v3299_v2, %v5563_v31 }
 0x460   :  { %4312 = vmatpush2.bf16.msra.mxu1 %v5136_v0 }
 0x461   :  { %v3330_v37 = vcombine.low %v5740_v5, %v5743_v27  ;;  %4267 = vmatpush2.bf16.msra.mxu0 %v5121_v13  ;;  %4313 = vmatprep.subr.bf16.mxu1 %v5144_v51 }
 0x462   :  { %4268 = vmatprep.subr.bf16.mxu0 %v5129_v44 }
 0x464   :  { %4314 = vmatpush2.bf16.msra.mxu1 %v5142_v40 }
 0x465   :  { %4269 = vmatpush2.bf16.msra.mxu0 %v5127_v42  ;;  %4365 = vmatprep.subr.bf16.mxu1 %v5150_v22  ;;  %v3256_v22 = vrot.slane %v5684_v24, %v5751_v46 }
 0x466   :  { %4270 = vmatprep.subr.bf16.mxu0 %v5135_v34 }
 0x469   :  { %4271 = vmatpush2.bf16.msra.mxu0 %v5133_v48 }
 0x46a   :  { %4272 = vmatprep.subr.bf16.mxu0 %v5141_v50 }
 0x46d   :  { %4273 = vmatpush2.bf16.msra.mxu0 %v5139_v54 }
 0x46e   :  { %v2941_v53 = vpop.f32.mrf.mxu0  ;;  %4324 = vmatprep.subr.bf16.mxu0 %v5147_v20 }
 0x46f   :  { %v2942_v55 = vadd.f32 %v2941_v53, %v1442_v49  ;;  %v2982_v56 = vpop.f32.mrf.mxu1 }
 0x470   :  { %v2943_v18 = vpop.f32.mrf.mxu0 }
 0x471   :  { %v2983_v57 = vadd.f32 %v2982_v56, %v2942_v55  ;;  %v2944_v19 = vadd.f32 %v2943_v18, %v1446_v52  ;;  %v2984_v43 = vpop.f32.mrf.mxu1 }
 0x472   :  { %v2945_v58 = vpop.f32.mrf.mxu0 }
 0x473   :  { %v3075_v59 = vmul.f32 %v5548_v38, %v2983_v57  ;;  %v5758_v62 = vadd.f32 %v2984_v43, %v2944_v19  ;;  %v2986_v16 = vpop.f32.mrf.mxu1 }
 0x474   :  { %v2946_v21 = vpop.f32.mrf.mxu0 }
 0x475   :  { %v3103_v26 = vrot.slane %v3075_v59, 4  ;;  %v3139_v4 = vmul.f32 %v3075_v59, %v2983_v57  ;;  %v3076_v10 = vmul.f32 %v5548_v38, %v5758_v62  ;;  %v2987_v28 = vpop.f32.mrf.mxu1  ;;  %v3252_v21 = vrot.slane %v5684_v24, %v5748_v15 }
 0x477   :  { %v3104_v30 = vadd.f32 %v3103_v26, %v3075_v59  ;;  %v3167_v2 = vrot.slane %v3139_v4, 4  ;;  %v3109_v3 = vrot.slane %v3076_v10, 4  ;;  %v3140_v6 = vmul.f32 %v3076_v10, %v5758_v62 }
 0x479   :  { %v3105_v7 = vrot.slane %v3104_v30, 2  ;;  %v3168_v36 = vadd.f32 %v3167_v2, %v3139_v4  ;;  %v3110_v39 = vadd.f32 %v3109_v3, %v3076_v10  ;;  %v3173_v41 = vrot.slane %v3140_v6, 4 }
 0x47b   :  { %v3106_v13 = vadd.f32 %v3105_v7, %v3104_v30  ;;  %v3169_v14 = vrot.slane %v3168_v36, 2  ;;  %v3111_v42 = vrot.slane %v3110_v39, 2  ;;  %v3174_v44 = vadd.f32 %v3173_v41, %v3140_v6 }
 0x47d   :  { %v3107_v45 = vrot.slane %v3106_v13, 1  ;;  %v3170_v29 = vadd.f32 %v3169_v14, %v3168_v36  ;;  %v3112_v34 = vadd.f32 %v3111_v42, %v3110_v39  ;;  %v3175_v47 = vrot.slane %v3174_v44, 2 }
 0x47e   :  { %v5780_v36 = vsub.s32 6, %v5536_v32  ;;  %v5783_v39 = vsub.s32 7, %v5536_v32 }
 0x47f   :  { %v3108_v48 = vadd.f32 %v3107_v45, %v3106_v13  ;;  %v3171_v49 = vrot.slane %v3170_v29, 1  ;;  %v3113_v0 = vrot.slane %v3112_v34, 1  ;;  %v3176_v50 = vadd.f32 %v3175_v47, %v3174_v44 }
 0x480   :  { %v1450_v41 = vrot.slane %v5666_v60, %v5780_v36  ;;  %v1454_v13 = vrot.slane %v5666_v60, %v5783_v39 }
 0x481   :  { %v3131_v51 = vmul.f32 0.25, %v3108_v48  ;;  %v3172_v52 = vadd.f32 %v3171_v49, %v3170_v29  ;;  %v3114_v53 = vadd.f32 %v3113_v0, %v3112_v34  ;;  %v3177_v54 = vrot.slane %v3176_v50, 1 }
 0x483   :  { %v3195_v55 = vmul.f32 0.25, %v3172_v52  ;;  %v3203_v56 = vmul.f32 %v3131_v51, %v3131_v51  ;;  %v3132_v40 = vmul.f32 0.25, %v3114_v53  ;;  %v3178_v18 = vadd.f32 %v3177_v54, %v3176_v50 }
 0x485   :  { %v3211_v19 = vsub.f32 %v3195_v55, %v3203_v56  ;;  %v3196_v43 = vmul.f32 0.25, %v3178_v18  ;;  %v3204_v58 = vmul.f32 %v3132_v40, %v3132_v40 }
 0x487   :  { %v3219_v59 = vadd.f32 0.8, %v3211_v19  ;;  %v3212_v16 = vsub.f32 %v3196_v43, %v3204_v58 }
 0x489   :  { %5261 = vrsqrt.f32 %v3219_v59  ;;  %v3220_v20 = vadd.f32 0.8, %v3212_v16 }
 0x48b   :  { %5263 = vrsqrt.f32 %v3220_v20 }
 0x496   :  { %v5262_v26 = vpop.eup %5261 }
 0x497   :  { %v3277_v4 = vmul.f32 %v5262_v26, %v3252_v21 }
 0x498   :  { %v5264_v10 = vpop.eup %5263 }
 0x499   :  { %v3368_v28 = vrot.slane %v3277_v4, %v5539_v33  ;;  %v5768_v30 = vmul.f32 %v5264_v10, %v3256_v22  ;;  %v5770_v2 = vmul.f32 %v3277_v4, %v3131_v51 }
 0x49b   :  { %v5772_v3 = vmul.f32 %v3368_v28, %v2983_v57  ;;  %v5775_v6 = vmul.f32 %v5768_v30, %v3132_v40 }
 0x49d   :  { %v3300_v7 = vcombine.low %v5770_v2, %v5775_v6  ;;  %v3360_v2 = vrot.slane %v5728_v25, %v5539_v33  ;;  %v3364_v6 = vrot.slane %v5730_v63, %v5539_v33 }
 0x4ae   :  { %v3023_v57 = vpop.f32.mrf.mxu0 }
 0x4af   :  { %v3024_v14 = vadd.f32 %v3023_v57, %v1450_v41  ;;  %v3064_v42 = vpop.f32.mrf.mxu1 }
 0x4b0   :  { %v3025_v44 = vpop.f32.mrf.mxu0 }
 0x4b1   :  { %v3065_v45 = vadd.f32 %v3064_v42, %v3024_v14  ;;  %v3026_v29 = vadd.f32 %v3025_v44, %v1454_v13  ;;  %v3066_v34 = vpop.f32.mrf.mxu1 }
 0x4b2   :  { %v3027_v47 = vpop.f32.mrf.mxu0 }
 0x4b3   :  { %v3077_v48 = vmul.f32 %v5548_v38, %v3065_v45  ;;  %v5790_v49 = vadd.f32 %v3066_v34, %v3026_v29  ;;  %v3068_v32 = vpop.f32.mrf.mxu1 }
 0x4b4   :  { %v3028_v0 = vpop.f32.mrf.mxu0 }
 0x4b5   :  { %v3115_v50 = vrot.slane %v3077_v48, 4  ;;  %v3141_v51 = vmul.f32 %v3077_v48, %v3065_v45  ;;  %v3078_v52 = vmul.f32 %v5548_v38, %v5790_v49  ;;  %v3069_v60 = vpop.f32.mrf.mxu1 }
 0x4b6   :  { %v3260_v60 = vrot.slane %v5684_v24, %v5780_v36 }
 0x4b7   :  { %v3116_v53 = vadd.f32 %v3115_v50, %v3077_v48  ;;  %v3179_v54 = vrot.slane %v3141_v51, 4  ;;  %v3121_v55 = vrot.slane %v3078_v52, 4  ;;  %v3142_v56 = vmul.f32 %v3078_v52, %v5790_v49 }
 0x4b9   :  { %v3117_v40 = vrot.slane %v3116_v53, 2  ;;  %v3180_v18 = vadd.f32 %v3179_v54, %v3141_v51  ;;  %v3122_v19 = vadd.f32 %v3121_v55, %v3078_v52  ;;  %v3185_v43 = vrot.slane %v3142_v56, 4 }
 0x4bb   :  { %v3118_v58 = vadd.f32 %v3117_v40, %v3116_v53  ;;  %v3181_v59 = vrot.slane %v3180_v18, 2  ;;  %v3123_v16 = vrot.slane %v3122_v19, 2  ;;  %v3186_v20 = vadd.f32 %v3185_v43, %v3142_v56 }
 0x4bc   :  { %v3264_v53 = vrot.slane %v5684_v24, %v5783_v39  ;;  %v3352_v24 = vrot.slane %v5690_v61, %v5539_v33  ;;  %v3281_v61 = vld [vmem:[#allocation13 + $0x23] sm:$0xff] }
 0x4bd   :  { %v3119_v21 = vrot.slane %v3118_v58, 1  ;;  %v3182_v22 = vadd.f32 %v3181_v59, %v3180_v18  ;;  %v3124_v26 = vadd.f32 %v3123_v16, %v3122_v19  ;;  %v3187_v4 = vrot.slane %v3186_v20, 2 }
 0x4be   :  { %v3322_v16 = vrot.slane %v3300_v7, %v5563_v31  ;;  %v3372_v7 = vrot.slane %v5768_v30, %v5539_v33 }
 0x4bf   :  { %v3120_v10 = vadd.f32 %v3119_v21, %v3118_v58  ;;  %v3183_v38 = vrot.slane %v3182_v22, 1  ;;  %v3125_v28 = vrot.slane %v3124_v26, 1  ;;  %v3188_v41 = vadd.f32 %v3187_v4, %v3186_v20 }
 0x4c0   :  { %v3386_v25 = vmul.f32 %v3372_v7, %v5758_v62  ;;  %v5172_v7 = vld [vmem:[#allocation11 + $0x330] ss:$8 sps:$4 sm:$0xff]  }
 0x4c1   :  { %v3133_v13 = vmul.f32 0.25, %v3120_v10  ;;  %v3184_v57 = vadd.f32 %v3183_v38, %v3182_v22  ;;  %v3126_v14 = vadd.f32 %v3125_v28, %v3124_v26  ;;  %v3189_v42 = vrot.slane %v3188_v41, 1 }
 0x4c2   :  { %v3356_v22 = vrot.slane %v5692_v12, %v5539_v33  ;;  %v3381_v10 = vmul.f32 %v3352_v24, %v5674_v17  ;;  %v5168_v24 = vld [vmem:[#allocation11 + $0x344] ss:$8 sps:$4 sm:$0xff]  }
 0x4c3   :  { %v3197_v44 = vmul.f32 0.25, %v3184_v57  ;;  %v3205_v29 = vmul.f32 %v3133_v13, %v3133_v13  ;;  %v3134_v34 = vmul.f32 0.25, %v3126_v14  ;;  %v3190_v47 = vadd.f32 %v3189_v42, %v3188_v41 }
 0x4c4   :  { %v3382_v5 = vmul.f32 %v3356_v22, %v5678_v23  ;;  %v5163_v22 = vld [vmem:[#allocation11 + $0x240] ss:$8 sps:$4 sm:$0xff]  }
 0x4c5   :  { %v3213_v48 = vsub.f32 %v3197_v44, %v3205_v29  ;;  %v3198_v32 = vmul.f32 0.25, %v3190_v47  ;;  %v3206_v0 = vmul.f32 %v3134_v34, %v3134_v34 }
 0x4c7   :  { %v3221_v50 = vadd.f32 0.8, %v3213_v48  ;;  %v3214_v51 = vsub.f32 %v3198_v32, %v3206_v0 }
 0x4c9   :  { %5265 = vrsqrt.f32 %v3221_v50  ;;  %v3222_v52 = vadd.f32 0.8, %v3214_v51 }
 0x4cb   :  { %5267 = vrsqrt.f32 %v3222_v52 }
 0x4d6   :  { %v5266_v54 = vpop.eup %5265 }
 0x4d7   :  { %v3279_v55 = vmul.f32 %v5266_v54, %v3260_v60  ;;  %v5145_v60 = vld [vmem:[#allocation11 + $0x270] ss:$8 sps:$4 sm:$0xff]  }
 0x4d8   :  { %v5268_v56 = vpop.eup %5267 }
 0x4d9   :  { %v3376_v40 = vrot.slane %v3279_v55, %v5539_v33  ;;  %v3280_v18 = vmul.f32 %v5268_v56, %v3264_v53  ;;  %v3288_v19 = vmul.f32 %v3279_v55, %v3133_v13  ;;  %v5148_v53 = vld [vmem:[#allocation11 + $0x370] ss:$8 sps:$4 sm:$0xff]   ;;  %v5153_v55 = vld [vmem:[#allocation11 + $0x264] ss:$8 sps:$4 sm:$0xff]  }
 0x4da   :  { %v5156_v56 = vld [vmem:[#allocation11 + $0x364] ss:$8 sps:$4 sm:$0xff]  }
 0x4db   :  { %v3387_v43 = vmul.f32 %v3376_v40, %v3065_v45  ;;  %v3289_v58 = vmul.f32 %v3280_v18, %v3134_v34  ;;  %v3338_v45 = vrot.slane %v3330_v37, %v5563_v31  ;;  %v3380_v4 = vrot.slane %v3280_v18, %v5539_v33 }
 0x4dc   :  { %v3384_v37 = vmul.f32 %v3364_v6, %v5710_v1  ;;  %v5169_v6 = vld [vmem:[#allocation11 + $0x230] ss:$8 sps:$4 sm:$0xff]  }
 0x4dd   :  { %v3301_v59 = vcombine.low %v3288_v19, %v3289_v58  ;;  %v3388_v63 = vmul.f32 %v3380_v4, %v5790_v49  ;;  %v5151_v19 = vld [vmem:[#allocation11 + $0x260] ss:$8 sps:$4 sm:$0xff]   ;;  %v5159_v58 = vld [vmem:[#allocation11 + $0x254] ss:$8 sps:$4 sm:$0xff]   ;;  %v5180_v4 = vld [vmem:[#allocation11 + $0x324] ss:$8 sps:$4 sm:$0xff]  }
 0x4df   :  { %v3329_v20 = vrot.slane %v3301_v59, %v5563_v31  ;;  %v5162_v59 = vld [vmem:[#allocation11 + $0x354] ss:$8 sps:$4 sm:$0xff]  }
 0x4e1   :  { %v3331_v21 = vcombine.low %v3322_v16, %v3329_v20  ;;  %v5157_v16 = vld [vmem:[#allocation11 + $0x250] ss:$8 sps:$4 sm:$0xff]  }
 0x4e2   :  { %v5160_v20 = vld [vmem:[#allocation11 + $0x350] ss:$8 sps:$4 sm:$0xff]  }
 0x4e3   :  { %v3345_v26 = vrot.slane %v3331_v21, %v5563_v31  ;;  %v3383_v31 = vmul.f32 %v3360_v2, %v5706_v8  ;;  %v5165_v21 = vld [vmem:[#allocation11 + $0x244] ss:$8 sps:$4 sm:$0xff]   ;;  %v5174_v2 = vld [vmem:[#allocation11 + $0x334] ss:$8 sps:$4 sm:$0xff]  }
 0x4e5   :  { %v3346_v12 = vcombine.low %v3338_v45, %v3345_v26  ;;  %v5166_v45 = vld [vmem:[#allocation11 + $0x340] ss:$8 sps:$4 sm:$0xff]   ;;  %v5171_v26 = vld [vmem:[#allocation11 + $0x234] ss:$8 sps:$4 sm:$0xff]  }
 0x4e7   :  { %v3348_v27 = vsub.f32 %v3281_v61, %v3346_v12  ;;  %v5177_v61 = vld [vmem:[#allocation11 + $0x224] ss:$8 sps:$4 sm:$0xff]   ;;  %v5175_v12 = vld [vmem:[#allocation11 + $0x220] ss:$8 sps:$4 sm:$0xff]  }
 0x4e9   :  { %v3397_v38 = vrot.slane %v3348_v27, %v5542_v35  ;;  %v3405_v30 = vrot.slane %v3348_v27, %v5593_v11  ;;  %v3393_v28 = vrot.slane %v3348_v27, %v5539_v33  ;;  %v3401_v41 = vrot.slane %v3348_v27, %v5590_v9 }
 0x4ea   :  { %v3413_v17 = vrot.slane %v3348_v27, %v5751_v46  ;;  %v3421_v23 = vrot.slane %v3348_v27, %v5783_v39  ;;  %v3409_v8 = vrot.slane %v3348_v27, %v5748_v15  ;;  %v3417_v1 = vrot.slane %v3348_v27, %v5780_v36  ;;  %v5186_v27 = vld [vmem:[#allocation11 + $0x314] ss:$8 sps:$4 sm:$0xff]  }
 0x4eb   :  { %v3431_v13 = vadd.f32 %v3397_v38, %v3382_v5  ;;  %v3433_v62 = vadd.f32 %v3405_v30, %v3384_v37  ;;  %v3430_v57 = vadd.f32 %v3393_v28, %v3381_v10  ;;  %v3432_v49 = vadd.f32 %v3401_v41, %v3383_v31  ;;  %v5178_v10 = vld [vmem:[#allocation11 + $0x320] ss:$8 sps:$4 sm:$0xff]   ;;  %v5183_v5 = vld [vmem:[#allocation11 + $0x214] ss:$8 sps:$4 sm:$0xff]   ;;  %v5181_v31 = vld [vmem:[#allocation11 + $0x210] ss:$8 sps:$4 sm:$0xff]  }
 0x4ec   :  { %v3435_v14 = vadd.f32 %v3413_v17, %v3386_v25  ;;  %v3437_v42 = vadd.f32 %v3421_v23, %v3388_v63  ;;  %v5836_v11 = vadd.f32 %v3409_v8, %v5772_v3  ;;  %v5838_v44 = vadd.f32 %v3417_v1, %v3387_v43  ;;  %v5154_v43 = vld [vmem:[#allocation11 + $0x360] ss:$8 sps:$4 sm:$0xff]   ;;  %v5184_v37 = vld [vmem:[#allocation11 + $0x310] ss:$8 sps:$4 sm:$0xff]   ;;  %v5189_v25 = vld [vmem:[#allocation11 + $0x204] ss:$8 sps:$4 sm:$0xff]  }
 0x4ed   :  { %v3439_v9 = vmul.f32 0.2, %v3431_v13  ;;  %v3441_v29 = vmul.f32 0.2, %v3433_v62  ;;  %v3438_v46 = vmul.f32 0.2, %v3430_v57 }
 0x4ee   :  { %v3440_v34 = vmul.f32 0.2, %v3432_v49  ;;  %v3443_v39 = vmul.f32 0.2, %v3435_v14  ;;  %v3445_v47 = vmul.f32 0.2, %v3437_v42 }
 0x4ef   :  { %v3447_v15 = vmax.f32 %v3431_v13, %v3439_v9  ;;  %v3449_v48 = vmax.f32 %v3433_v62, %v3441_v29  ;;  %v3446_v36 = vmax.f32 %v3430_v57, %v3438_v46  ;;  %v5192_v63 = vld [vmem:[#allocation11 + $0x304] ss:$8 sps:$4 sm:$0xff]   ;;  %v5187_v38 = vld [vmem:[#allocation11 + $0x200] ss:$8 sps:$4 sm:$0xff]   ;;  %v5195_v28 = vld [vmem:[#allocation11 + $0x2f4] ss:$8 sps:$4 sm:$0xff]  }
 0x4f0   :  { %v3448_v32 = vmax.f32 %v3432_v49, %v3440_v34  ;;  %v3451_v0 = vmax.f32 %v3435_v14, %v3443_v39  ;;  %v3453_v50 = vmax.f32 %v3437_v42, %v3445_v47  ;;  %v5190_v30 = vld [vmem:[#allocation11 + $0x300] ss:$8 sps:$4 sm:$0xff]   ;;  %v5198_v41 = vld [vmem:[#allocation11 + $0x3f4] ss:$8 sps:$4 sm:$0xff]   ;;  %v5193_v17 = vld [vmem:[#allocation11 + $0x2f0] ss:$8 sps:$4 sm:$0xff]  }
 0x4f1   :  { %v3455_v51 = vpack.c.bf16 %v3447_v15, %v3447_v15  ;;  %v3457_v52 = vpack.c.bf16 %v3449_v48, %v3449_v48  ;;  %v3454_v3 = vpack.c.bf16 %v3446_v36, %v3446_v36  ;;  %v5196_v23 = vld [vmem:[#allocation11 + $0x3f0] ss:$8 sps:$4 sm:$0xff]   ;;  %v5201_v8 = vld [vmem:[#allocation11 + $0x2e4] ss:$8 sps:$4 sm:$0xff]   ;;  %v5199_v13 = vld [vmem:[#allocation11 + $0x2e0] ss:$8 sps:$4 sm:$0xff]  }
 0x4f2   :  { %v3456_v54 = vpack.c.bf16 %v3448_v32, %v3448_v32  ;;  %v3459_v40 = vpack.c.bf16 %v3451_v0, %v3451_v0  ;;  %v3461_v18 = vpack.c.bf16 %v3453_v50, %v3453_v50  ;;  %v5204_v1 = vld [vmem:[#allocation11 + $0x3e4] ss:$8 sps:$4 sm:$0xff]   ;;  %v5202_v62 = vld [vmem:[#allocation11 + $0x3e0] ss:$8 sps:$4 sm:$0xff]   ;;  %v5207_v57 = vld [vmem:[#allocation11 + $0x2d4] ss:$8 sps:$4 sm:$0xff]  }
 0x4f3   :  { %4274 = vmatprep.mubr.bf16.mxu0 %v3455_v51  ;;  %4315 = vmatprep.mubr.bf16.mxu1 %v3457_v52  ;;  %v5210_v49 = vld [vmem:[#allocation11 + $0x3d4] ss:$8 sps:$4 sm:$0xff]   ;;  %v5205_v14 = vld [vmem:[#allocation11 + $0x2d0] ss:$8 sps:$4 sm:$0xff]   ;;  %v5213_v9 = vld [vmem:[#allocation11 + $0x2c4] ss:$8 sps:$4 sm:$0xff]  }
 0x4f4   :  { %4275 = vmatmul.mubr.bf16.vlgmr.msra.gmra.mxu0 %v3454_v3  ;;  %4316 = vmatmul.mubr.bf16.vlgmr.msra.gmra.mxu1 %v3456_v54  ;;  %v5208_v42 = vld [vmem:[#allocation11 + $0x3d0] ss:$8 sps:$4 sm:$0xff]   ;;  %v5216_v29 = vld [vmem:[#allocation11 + $0x3c4] ss:$8 sps:$4 sm:$0xff]   ;;  %v5211_v46 = vld [vmem:[#allocation11 + $0x2c0] ss:$8 sps:$4 sm:$0xff]  }
 0x4f5   :  { %4325 = vmatpush1.bf16.msra.mxu0 %v5145_v60  ;;  %4366 = vmatpush1.bf16.msra.mxu1 %v5148_v53  ;;  %v5214_v34 = vld [vmem:[#allocation11 + $0x3c0] ss:$8 sps:$4 sm:$0xff]   ;;  %v5219_v39 = vld [vmem:[#allocation11 + $0x2b4] ss:$8 sps:$4 sm:$0xff]   ;;  %v5217_v15 = vld [vmem:[#allocation11 + $0x2b0] ss:$8 sps:$4 sm:$0xff]  }
 0x4f6   :  { %4356 = vmatprep.mubr.bf16.mxu0 %v3459_v40  ;;  %4397 = vmatprep.mubr.bf16.mxu1 %v3461_v18  ;;  %v5222_v47 = vld [vmem:[#allocation11 + $0x3b4] ss:$8 sps:$4 sm:$0xff]   ;;  %v5220_v48 = vld [vmem:[#allocation11 + $0x3b0] ss:$8 sps:$4 sm:$0xff]   ;;  %v5225_v36 = vld [vmem:[#allocation11 + $0x2a4] ss:$8 sps:$4 sm:$0xff]  }
 0x4f7   :  { %4326 = vmatprep.subr.bf16.mxu0 %v5153_v55  ;;  %4367 = vmatprep.subr.bf16.mxu1 %v5156_v56  ;;  %v5228_v32 = vld [vmem:[#allocation11 + $0x3a4] ss:$8 sps:$4 sm:$0xff]   ;;  %v5223_v0 = vld [vmem:[#allocation11 + $0x2a0] ss:$8 sps:$4 sm:$0xff]   ;;  %v5231_v51 = vld [vmem:[#allocation11 + $0x294] ss:$8 sps:$4 sm:$0xff]  }
 0x4f8   :  { %v5226_v50 = vld [vmem:[#allocation11 + $0x3a0] ss:$8 sps:$4 sm:$0xff]   ;;  %v5234_v52 = vld [vmem:[#allocation11 + $0x394] ss:$8 sps:$4 sm:$0xff]   ;;  %v5229_v60 = vld [vmem:[#allocation11 + $0x290] ss:$8 sps:$4 sm:$0xff]  }
 0x4f9   :  { %4327 = vmatpush1.bf16.msra.mxu0 %v5151_v19  ;;  %4368 = vmatpush1.bf16.msra.mxu1 %v5154_v43  ;;  %v5232_v53 = vld [vmem:[#allocation11 + $0x390] ss:$8 sps:$4 sm:$0xff]   ;;  %v5237_v3 = vld [vmem:[#allocation11 + $0x284] ss:$8 sps:$4 sm:$0xff]   ;;  %v3442_v55 = vmul.f32 0.2, %v5836_v11 }
 0x4fa   :  { %4328 = vmatprep.subr.bf16.mxu0 %v5159_v58  ;;  %4369 = vmatprep.subr.bf16.mxu1 %v5162_v59  ;;  %v5240_v54 = vld [vmem:[#allocation11 + $0x384] ss:$8 sps:$4 sm:$0xff]   ;;  %v3444_v56 = vmul.f32 0.2, %v5838_v44  ;;  %v5235_v40 = vld [vmem:[#allocation11 + $0x280] ss:$8 sps:$4 sm:$0xff]  }
 0x4fb   :  { %v5238_v18 = vld [vmem:[#allocation11 + $0x380] ss:$8 sps:$4 sm:$0xff]   ;;  %v3450_v19 = vmax.f32 %v5836_v11, %v3442_v55 }
 0x4fc   :  { %v3452_v43 = vmax.f32 %v5838_v44, %v3444_v56 }
 0x4fd   :  { %4329 = vmatpush1.bf16.msra.mxu0 %v5157_v16  ;;  %4370 = vmatpush1.bf16.msra.mxu1 %v5160_v20  ;;  %v3458_v58 = vpack.c.bf16 %v3450_v19, %v3450_v19 }
 0x4fe   :  { %4330 = vmatprep.subr.bf16.mxu0 %v5165_v21  ;;  %4371 = vmatprep.subr.bf16.mxu1 %v5168_v24  ;;  %v3460_v59 = vpack.c.bf16 %v3452_v43, %v3452_v43 }
 0x501   :  { %4331 = vmatpush1.bf16.msra.mxu0 %v5163_v22  ;;  %4372 = vmatpush1.bf16.msra.mxu1 %v5166_v45 }
 0x502   :  { %4332 = vmatprep.subr.bf16.mxu0 %v5171_v26  ;;  %4373 = vmatprep.subr.bf16.mxu1 %v5174_v2 }
 0x505   :  { %4333 = vmatpush1.bf16.msra.mxu0 %v5169_v6  ;;  %4374 = vmatpush1.bf16.msra.mxu1 %v5172_v7  ;;  %v3590_v6 = vld [vmem:[#allocation13 + $0x2b] sm:$0x3] }
 0x506   :  { %4334 = vmatprep.subr.bf16.mxu0 %v5177_v61  ;;  %4375 = vmatprep.subr.bf16.mxu1 %v5180_v4  ;;  %v3595_v7 = vrot.slane %v3590_v6, %v5539_v33  ;;  %v3599_v11 = vrot.slane %v3590_v6, %v5542_v35 }
 0x509   :  { %4335 = vmatpush1.bf16.msra.mxu0 %v5175_v12  ;;  %4376 = vmatpush1.bf16.msra.mxu1 %v5178_v10 }
 0x50a   :  { %4336 = vmatprep.subr.bf16.mxu0 %v5183_v5  ;;  %4377 = vmatprep.subr.bf16.mxu1 %v5186_v27 }
 0x50d   :  { %4337 = vmatpush1.bf16.msra.mxu0 %v5181_v31  ;;  %4378 = vmatpush1.bf16.msra.mxu1 %v5184_v37 }
 0x50e   :  { %4338 = vmatprep.subr.bf16.mxu0 %v5189_v25  ;;  %4379 = vmatprep.subr.bf16.mxu1 %v5192_v63 }
 0x511   :  { %4339 = vmatpush1.bf16.msra.mxu0 %v5187_v38  ;;  %4380 = vmatpush1.bf16.msra.mxu1 %v5190_v30 }
 0x512   :  { %4340 = vmatprep.subr.bf16.mxu0 %v5195_v28  ;;  %4381 = vmatprep.subr.bf16.mxu1 %v5198_v41 }
 0x515   :  { %4341 = vmatpush2.bf16.msra.mxu0 %v5193_v17  ;;  %4382 = vmatpush2.bf16.msra.mxu1 %v5196_v23 }
 0x516   :  { %4342 = vmatprep.subr.bf16.mxu0 %v5201_v8  ;;  %4383 = vmatprep.subr.bf16.mxu1 %v5204_v1 }
 0x519   :  { %4343 = vmatpush2.bf16.msra.mxu0 %v5199_v13  ;;  %4384 = vmatpush2.bf16.msra.mxu1 %v5202_v62 }
 0x51a   :  { %4344 = vmatprep.subr.bf16.mxu0 %v5207_v57  ;;  %4385 = vmatprep.subr.bf16.mxu1 %v5210_v49 }
 0x51d   :  { %4345 = vmatpush2.bf16.msra.mxu0 %v5205_v14  ;;  %4386 = vmatpush2.bf16.msra.mxu1 %v5208_v42 }
 0x51e   :  { %4346 = vmatprep.subr.bf16.mxu0 %v5213_v9  ;;  %4387 = vmatprep.subr.bf16.mxu1 %v5216_v29 }
 0x521   :  { %4347 = vmatpush2.bf16.msra.mxu0 %v5211_v46  ;;  %4388 = vmatpush2.bf16.msra.mxu1 %v5214_v34 }
 0x522   :  { %4348 = vmatprep.subr.bf16.mxu0 %v5219_v39  ;;  %4389 = vmatprep.subr.bf16.mxu1 %v5222_v47 }
 0x525   :  { %4349 = vmatpush2.bf16.msra.mxu0 %v5217_v15  ;;  %4390 = vmatpush2.bf16.msra.mxu1 %v5220_v48 }
 0x526   :  { %4350 = vmatprep.subr.bf16.mxu0 %v5225_v36  ;;  %4391 = vmatprep.subr.bf16.mxu1 %v5228_v32 }
 0x529   :  { %4351 = vmatpush2.bf16.msra.mxu0 %v5223_v0  ;;  %4392 = vmatpush2.bf16.msra.mxu1 %v5226_v50 }
 0x52a   :  { %4352 = vmatprep.subr.bf16.mxu0 %v5231_v51  ;;  %4393 = vmatprep.subr.bf16.mxu1 %v5234_v52 }
 0x52d   :  { %4353 = vmatpush2.bf16.msra.mxu0 %v5229_v60  ;;  %4394 = vmatpush2.bf16.msra.mxu1 %v5232_v53 }
 0x52e   :  { %4354 = vmatprep.subr.bf16.mxu0 %v5237_v3  ;;  %4395 = vmatprep.subr.bf16.mxu1 %v5240_v54 }
 0x531   :  { %4355 = vmatpush2.bf16.msra.mxu0 %v5235_v40  ;;  %4396 = vmatpush2.bf16.msra.mxu1 %v5238_v18 }
 0x534   :  { %4357 = vmatmul.mubr.bf16.vlgmr.msra.gmra.mxu0 %v3458_v58  ;;  %4398 = vmatmul.mubr.bf16.vlgmr.msra.gmra.mxu1 %v3460_v59 }
 0x5b4   :  { %v4276_v16 = vpop.f32.mrf.mxu0  ;;  %v4317_v20 = vpop.f32.mrf.mxu1 }
 0x5b5   :  { %v4277_v44 = vadd.f32 %v4276_v16, %v3595_v7 }
 0x5b6   :  { %v4278_v21 = vpop.f32.mrf.mxu0  ;;  %v4319_v24 = vpop.f32.mrf.mxu1 }
 0x5b7   :  { %v4279_v61 = vadd.f32 %v4278_v21, %v3599_v11  ;;  %v4318_v4 = vadd.f32 %v4317_v20, %v4277_v44 }
 0x5b8   :  { %v4280_v22 = vpop.f32.mrf.mxu0  ;;  %v4321_v45 = vpop.f32.mrf.mxu1 }
 0x5b9   :  { %v4320_v5 = vadd.f32 %v4319_v24, %v4279_v61 }
 0x5ba   :  { %v4281_v26 = vpop.f32.mrf.mxu0  ;;  %v4322_v2 = vpop.f32.mrf.mxu1 }
 0x5f4   :  { %v4358_v12 = vpop.f32.mrf.mxu0  ;;  %v4399_v10 = vpop.f32.mrf.mxu1 }
 0x5f5   :  { %v4359_v27 = vadd.f32 %v4358_v12, %v4318_v4 }
 0x5f6   :  { %v4360_v31 = vpop.f32.mrf.mxu0  ;;  %v4401_v37 = vpop.f32.mrf.mxu1 }
 0x5f7   :  { %v4400_v25 = vadd.f32 %v4399_v10, %v4359_v27  ;;  %v4361_v63 = vadd.f32 %v4360_v31, %v4320_v5 }
 0x5f8   :  { %v4362_v38 = vpop.f32.mrf.mxu0  ;;  %v4403_v30 = vpop.f32.mrf.mxu1 }
 0x5f9   :  { %5269 = vtanh.f32 %v4400_v25  ;;  %v4402_v28 = vadd.f32 %v4401_v37, %v4361_v63 }
 0x5fa   :  { %v4363_v41 = vpop.f32.mrf.mxu0  ;;  %v4404_v17 = vpop.f32.mrf.mxu1 }
 0x5fb   :  { %5271 = vtanh.f32 %v4402_v28 }
 0x606   :  { %v5270_v33 = vpop.eup %5269 }
 0x607   :  { %4408 = vst [vmem:[#allocation14] sm:$0xff] %v5270_v33 }
 0x608   :  { %v5272_v35 = vpop.eup %5271 }
 0x609   :  { %4409 = vst [vmem:[#allocation14 + $0x8] sm:$0xff] %v5272_v35 }
 0x60a   :  { %5424 = shalt.err (!%p5421_p11)
}
 0x60b   :  { %4419 = dma.vmem_to_hbm [thread:$0]  %s4417_s6, 256, %s5856_s7, [#allocation4]  }
 0x60c   :  { %5441 = dma.done.wait [#allocation4], 256  }
 0x60d   :  { %5442 = vsyncadd [#allocation4], 4294967040 }
 0x60e   :  { %4423 = vsyncpa [#allocation3], 1 }
 0x60f   :  { %4424 = vsyncpa [#allocation6], 1 }
 0x610   :  { %4425 = vsyncpa [#allocation9], 1 }
 0x611   :  { %4426 = vsyncpa [#allocation12], 1 }
 0x612   :  { %4427 = vsyncpa [#allocation4], 1 }

</bundles_post_ra>
